<compile_context>
chip_gen: v7x
topology: tpu7x:2x2x1
jax: 0.10.0
libtpu: 0.0.40
codegen_flags: <defaults>
</compile_context>

<pallas_src>
import functools

import jax
import jax.numpy as jnp
from jax.experimental import pallas as pl
from jax.experimental.pallas import tpu as pltpu


def lstm_forward(x, wx, wh, b, wo, bo, *, t_blk=8, matmul_dtype=jnp.float32):
    """x: (N, L, D) f32.  Returns (y: (N, L, H), c: (N, H), h: (N, H)).

    matmul_dtype: dtype of the MXU operands (gates_x / Wh / Wo / the h operand).
                  jnp.float32 = accuracy mode, jnp.bfloat16 = fast mode.
                  Accumulation and all gate/state math stay in f32 either way.
    """
    N, L, D = x.shape
    H = wh.shape[0]
    assert wx.shape == (D, 4 * H) and wh.shape == (H, 4 * H)
    assert b.shape == (4 * H,) and wo.shape == (H, H) and bo.shape == (H,)

    # ---- batch chunking -----------------------------------------------------
    # Pad N to a sublane multiple.  Each grid step processes nb rows:
    #   * small batches: one chunk (fills as many MXU rows as we have),
    #   * n_pad >= 256: 128-row chunks -> n_bc >= 2, so the "parallel" batch
    #     axis can actually split across v7x's two TensorCores.  (On 1-TC
    #     v5e/v6e a single big chunk would also be fine.)
    n_pad = ((N + 7) // 8) * 8
    if n_pad >= 256:
        nb = 128
        n_pad = ((n_pad + nb - 1) // nb) * nb
    else:
        nb = n_pad
    n_bc = n_pad // nb

    # ---- time chunking ------------------------------------------------------
    # t_blk must be a multiple of 8 so batch-major (nb, t_blk, 4H) blocks are
    # legal; pad L up to a multiple of t_blk instead of shrinking t_blk.
    t_blk = max(8, (int(t_blk) // 8) * 8)
    l_pad = ((L + t_blk - 1) // t_blk) * t_blk
    n_tc = l_pad // t_blk
    need_mask = l_pad != L  # tail timesteps must not advance the c/h state

    x_p = jnp.pad(x.astype(jnp.float32),
                  ((0, n_pad - N), (0, l_pad - L), (0, 0)))

    # Hoisted input projection for ALL timesteps, emitted in natural batch-major
    # layout (plain dot, no transposed copy of the (N, L, 4H) tensor).
    gates_x = (jnp.einsum('nld,dg->nlg', x_p, wx,
                          preferred_element_type=jnp.float32) + b)
    gates_x = gates_x.astype(matmul_dtype)   # bf16 halves the dominant HBM read

    wh_c = wh.astype(matmul_dtype)
    wo_c = wo.astype(matmul_dtype)
    bo2 = bo.reshape(1, H).astype(jnp.float32)

    def kernel(gx_ref, wh_hbm, wo_hbm, bo_ref, y_ref, c_ref, h_ref,
               wh_vmem, wo_vmem, dma_sem):
        """One grid step = t_blk timesteps of the recurrence for one batch chunk.

        gx_ref:  (nb, t_blk, 4H) precomputed x@Wx + b (batch-major block)
        wh_hbm:  (H, 4H) in HBM (pl.ANY); wo_hbm: (H, H) in HBM (pl.ANY)
        bo_ref:  (1, H)
        y_ref:   (nb, t_blk, H) output block (fc_out fused in-kernel)
        c_ref/h_ref: (nb, H) state, carried across the "arbitrary" time axis
        wh_vmem/wo_vmem: persistent VMEM scratch holding the resident weights
                         (single-buffered -- DMA'd once per batch chunk)
        """
        @pl.when(pl.program_id(1) == 0)
        def _init():
            # Single-buffered resident weights: one manual DMA per batch chunk.
            cp_wh = pltpu.make_async_copy(wh_hbm, wh_vmem, dma_sem.at[0])
            cp_wo = pltpu.make_async_copy(wo_hbm, wo_vmem, dma_sem.at[1])
            cp_wh.start()
            cp_wo.start()
            cp_wh.wait()
            cp_wo.wait()
            c_ref[...] = jnp.zeros_like(c_ref)
            h_ref[...] = jnp.zeros_like(h_ref)

        whv = wh_vmem[...]
        wov = wo_vmem[...]
        bov = bo_ref[...]
        mm_dtype = whv.dtype

        c = c_ref[...]
        h = h_ref[...]
        t0 = pl.program_id(1) * t_blk

        # Static Python loop -> fully unrolled, every slice index is static.
        for s in range(t_blk):
            # Only the truly serial matmul stays on the chain: (nb,H)@(H,4H).
            gates = gx_ref[:, s, :].astype(jnp.float32) + jnp.dot(
                h.astype(mm_dtype), whv, preferred_element_type=jnp.float32)
            # Packed gate order along 4H: [f | i | c | o] (this module's order).
            f_t = jax.nn.sigmoid(gates[:, 0 * H:1 * H])
            i_t = jax.nn.sigmoid(gates[:, 1 * H:2 * H])
            g_t = jnp.tanh(gates[:, 2 * H:3 * H])
            o_t = jax.nn.sigmoid(gates[:, 3 * H:4 * H])
            c_new = f_t * c + i_t * g_t
            h_new = o_t * jnp.tanh(c_new)
            if need_mask:
                # Padded tail timesteps must not advance the state, so the
                # returned final (c, h) correspond to exactly L real steps.
                valid = (t0 + s) < L
                c_new = jnp.where(valid, c_new, c)
                h_new = jnp.where(valid, h_new, h)
            # Fused fc_out: nothing on the serial c/h chain depends on it, so
            # the scheduler overlaps it with the next step's recurrent dot.
            # (Per-step 2D dots keep lowering simple; with nb=128 each already
            # fills the MXU rows.)  y never round-trips through HBM anymore.
            y_ref[:, s, :] = (jnp.dot(h_new.astype(mm_dtype), wov,
                                      preferred_element_type=jnp.float32) + bov)
            c, h = c_new, h_new

        c_ref[...] = c
        h_ref[...] = h

    w_bytes = jnp.dtype(matmul_dtype).itemsize
    vmem_need = (2 * nb * t_blk * 4 * H * w_bytes     # gx, double-buffered
                 + 2 * nb * t_blk * H * 4             # y,  double-buffered
                 + (H * 4 * H + H * H) * w_bytes      # resident Wh + Wo (x1)
                 + 4 * nb * H * 4                     # c/h blocks + slack
                 + (2 << 20))
    # v5e/v6e: 128 MiB physical VMEM, feel free to sweep t_blk up to 16.
    # v7x: 64 MiB per TC -> keep this <= ~48 MiB (bf16 weights / t_blk=8).
    vmem_limit = int(min(96 << 20, max(32 << 20, int(vmem_need * 1.5))))

    y_p, c_p, h_p = pl.pallas_call(
        kernel,
        out_shape=(jax.ShapeDtypeStruct((n_pad, l_pad, H), jnp.float32),
                   jax.ShapeDtypeStruct((n_pad, H), jnp.float32),
                   jax.ShapeDtypeStruct((n_pad, H), jnp.float32)),
        grid_spec=pltpu.PrefetchScalarGridSpec(
            num_scalar_prefetch=0,
            grid=(n_bc, n_tc),                      # (batch chunks, time chunks)
            in_specs=[
                # Batch-major gx block; no wrapper transpose of the big tensor.
                pl.BlockSpec((nb, t_blk, 4 * H), lambda bi, ti: (bi, ti, 0)),
                # Resident weights stay in HBM; DMA'd once into VMEM scratch.
                pl.BlockSpec(memory_space=pl.ANY),   # wh
                pl.BlockSpec(memory_space=pl.ANY),   # wo
                pl.BlockSpec((1, H), lambda bi, ti: (0, 0)),   # bo (tiny)
            ],
            out_specs=[
                pl.BlockSpec((nb, t_blk, H), lambda bi, ti: (bi, ti, 0)),
                # Constant time index -> VMEM-resident across the "arbitrary"
                # time axis; doubles as the recurrence state carry.
                pl.BlockSpec((nb, H), lambda bi, ti: (bi, 0)),
                pl.BlockSpec((nb, H), lambda bi, ti: (bi, 0)),
            ],
            scratch_shapes=[
                pltpu.VMEM((H, 4 * H), matmul_dtype),   # resident Wh (x1)
                pltpu.VMEM((H, H), matmul_dtype),       # resident Wo (x1)
                pltpu.SemaphoreType.DMA((2,)),
            ],
        ),
        compiler_params=pltpu.CompilerParams(
            dimension_semantics=("parallel", "arbitrary"),
            vmem_limit_bytes=vmem_limit),
    )(gates_x, wh_c, wo_c, bo2)

    return y_p[:N, :L], c_p[:N], h_p[:N]


def lstm_reference(x, wx, wh, b, wo, bo):
    """Pure-JAX reference matching the PyTorch forward (zero-init c, h)."""
    N, L, D = x.shape
    H = wo.shape[0]
    c = jnp.zeros((N, H), jnp.float32)
    h = jnp.zeros((N, H), jnp.float32)
    ys = []
    for t in range(L):
        gates = x[:, t] @ wx + h @ wh + b
        f_t = jax.nn.sigmoid(gates[:, 0 * H:1 * H])
        i_t = jax.nn.sigmoid(gates[:, 1 * H:2 * H])
        g_t = jnp.tanh(gates[:, 2 * H:3 * H])
        o_t = jax.nn.sigmoid(gates[:, 3 * H:4 * H])
        c = f_t * c + i_t * g_t
        h = o_t * jnp.tanh(c)
        ys.append(h @ wo + bo)
    return jnp.stack(ys, axis=1), c, h


if __name__ == "__main__":
    N, L, D, H = 2, 8, 4, 32

    key = jax.random.PRNGKey(0)
    kx, kwx, kwh, kb, kwo, kbo = jax.random.split(key, 6)

    x = jax.random.normal(kx, (N, L, D), jnp.float32)
    scale_g = 1.0 / jnp.sqrt(D + H)
    wx = jax.random.uniform(kwx, (D, 4 * H), jnp.float32, -scale_g, scale_g)
    wh = jax.random.uniform(kwh, (H, 4 * H), jnp.float32, -scale_g, scale_g)
    b = jax.random.uniform(kb, (4 * H,), jnp.float32, -scale_g, scale_g)
    scale_o = 1.0 / jnp.sqrt(H)
    wo = jax.random.uniform(kwo, (H, H), jnp.float32, -scale_o, scale_o)
    bo = jax.random.uniform(kbo, (H,), jnp.float32, -scale_o, scale_o)

    y_r, c_r, h_r = lstm_reference(x, wx, wh, b, wo, bo)

    # --- f32 accuracy mode ---------------------------------------------------
    fwd_f32 = jax.jit(functools.partial(lstm_forward, matmul_dtype=jnp.float32))
    y, c, h = fwd_f32(x, wx, wh, b, wo, bo)
    jax.block_until_ready((y, c, h))
    assert y.shape == (N, L, H) and c.shape == (N, H) and h.shape == (N, H)
    assert jnp.allclose(y, y_r, atol=1e-4, rtol=1e-4)
    assert jnp.allclose(c, c_r, atol=1e-4, rtol=1e-4)
    assert jnp.allclose(h, h_r, atol=1e-4, rtol=1e-4)

    # --- bf16 MXU-operand mode (looser tolerance, same f32 state math) --------
    fwd_bf16 = jax.jit(functools.partial(lstm_forward, matmul_dtype=jnp.bfloat16))
    y16, c16, h16 = fwd_bf16(x, wx, wh, b, wo, bo)
    jax.block_until_ready((y16, c16, h16))
    assert jnp.allclose(y16, y_r, atol=5e-2, rtol=5e-2)
    assert jnp.allclose(c16, c_r, atol=5e-2, rtol=5e-2)
    assert jnp.allclose(h16, h_r, atol=5e-2, rtol=5e-2)

    # --- ragged length: exercises the L-padding + tail-masking path -----------
    N2, L2 = 3, 5
    x2 = jax.random.normal(jax.random.PRNGKey(1), (N2, L2, D), jnp.float32)
    y2, c2, h2 = fwd_f32(x2, wx, wh, b, wo, bo)
    jax.block_until_ready((y2, c2, h2))
    y2r, c2r, h2r = lstm_reference(x2, wx, wh, b, wo, bo)
    assert jnp.allclose(y2, y2r, atol=1e-4, rtol=1e-4)
    assert jnp.allclose(c2, c2r, atol=1e-4, rtol=1e-4)
    assert jnp.allclose(h2, h2r, atol=1e-4, rtol=1e-4)

    print("KERNEL_OK")
</pallas_src>

<mosaic_0001>
module attributes {stable_mosaic.version = 11 : i64} {
  func.func @kernel(%arg0: i32, %arg1: i32, %arg2: memref<8x8x128xf32, #tpu.memory_space<vmem>>, %arg3: memref<32x128xf32, #tpu.memory_space<any>>, %arg4: memref<32x32xf32, #tpu.memory_space<any>>, %arg5: memref<1x32xf32, #tpu.memory_space<vmem>>, %arg6: memref<8x8x32xf32, #tpu.memory_space<vmem>>, %arg7: memref<8x32xf32, #tpu.memory_space<vmem>>, %arg8: memref<8x32xf32, #tpu.memory_space<vmem>>, %arg9: memref<32x128xf32, #tpu.memory_space<vmem>>, %arg10: memref<32x32xf32, #tpu.memory_space<vmem>>, %arg11: memref<2x!tpu.dma_semaphore, #tpu.memory_space<semaphore_mem>>) attributes {dimension_semantics = [#tpu.dimension_semantics<parallel>, #tpu.dimension_semantics<arbitrary>], iteration_bounds = array<i64: 1, 1>, scalar_prefetch = 0 : i64, scratch_operands = 3 : i64, tpu.core_type = #tpu.core_type<tc>, window_params = [{transform_indices = @transform_0, window_bounds = array<i64: 8, 8, 128>}, {}, {}, {pipeline_mode = #tpu.pipeline_mode<synchronous>, transform_indices = @transform_3, window_bounds = array<i64: 1, 32>}, {transform_indices = @transform_4, window_bounds = array<i64: 8, 8, 32>}, {transform_indices = @transform_5, window_bounds = array<i64: 8, 32>}, {transform_indices = @transform_6, window_bounds = array<i64: 8, 32>}]} {
    %c0_i32 = arith.constant 0 : i32
    %0 = arith.cmpi eq, %arg1, %c0_i32 : i32
    %1 = arith.extui %0 : i1 to i32
    %c0_i32_0 = arith.constant 0 : i32
    %2 = arith.cmpi ne, %1, %c0_i32_0 : i32
    scf.if %2 {
      %c0_i32_94 = arith.constant 0 : i32
      %290 = tpu.memref_slice %arg11[%c0_i32_94] : memref<2x!tpu.dma_semaphore, #tpu.memory_space<semaphore_mem>> -> memref<1x!tpu.dma_semaphore, #tpu.memory_space<semaphore_mem>>
      %291 = tpu.memref_squeeze %290 : memref<1x!tpu.dma_semaphore, #tpu.memory_space<semaphore_mem>> -> memref<!tpu.dma_semaphore, #tpu.memory_space<semaphore_mem>>
      tpu.enqueue_dma source(%arg3 : memref<32x128xf32, #tpu.memory_space<any>>) target(%arg9 : memref<32x128xf32, #tpu.memory_space<vmem>>) target_semaphore(%291 : memref<!tpu.dma_semaphore, #tpu.memory_space<semaphore_mem>>)
      %c1_i32 = arith.constant 1 : i32
      %292 = tpu.memref_slice %arg11[%c1_i32] : memref<2x!tpu.dma_semaphore, #tpu.memory_space<semaphore_mem>> -> memref<1x!tpu.dma_semaphore, #tpu.memory_space<semaphore_mem>>
      %293 = tpu.memref_squeeze %292 : memref<1x!tpu.dma_semaphore, #tpu.memory_space<semaphore_mem>> -> memref<!tpu.dma_semaphore, #tpu.memory_space<semaphore_mem>>
      tpu.enqueue_dma source(%arg4 : memref<32x32xf32, #tpu.memory_space<any>>) target(%arg10 : memref<32x32xf32, #tpu.memory_space<vmem>>) target_semaphore(%293 : memref<!tpu.dma_semaphore, #tpu.memory_space<semaphore_mem>>)
      %c0_i32_95 = arith.constant 0 : i32
      %294 = tpu.memref_slice %arg11[%c0_i32_95] : memref<2x!tpu.dma_semaphore, #tpu.memory_space<semaphore_mem>> -> memref<1x!tpu.dma_semaphore, #tpu.memory_space<semaphore_mem>>
      %295 = tpu.memref_squeeze %294 : memref<1x!tpu.dma_semaphore, #tpu.memory_space<semaphore_mem>> -> memref<!tpu.dma_semaphore, #tpu.memory_space<semaphore_mem>>
      tpu.wait_dma2 semaphore(%295 : memref<!tpu.dma_semaphore, #tpu.memory_space<semaphore_mem>>) src(%arg3 : memref<32x128xf32, #tpu.memory_space<any>>) dst(%arg9 : memref<32x128xf32, #tpu.memory_space<vmem>>)
      %c1_i32_96 = arith.constant 1 : i32
      %296 = tpu.memref_slice %arg11[%c1_i32_96] : memref<2x!tpu.dma_semaphore, #tpu.memory_space<semaphore_mem>> -> memref<1x!tpu.dma_semaphore, #tpu.memory_space<semaphore_mem>>
      %297 = tpu.memref_squeeze %296 : memref<1x!tpu.dma_semaphore, #tpu.memory_space<semaphore_mem>> -> memref<!tpu.dma_semaphore, #tpu.memory_space<semaphore_mem>>
      tpu.wait_dma2 semaphore(%297 : memref<!tpu.dma_semaphore, #tpu.memory_space<semaphore_mem>>) src(%arg4 : memref<32x32xf32, #tpu.memory_space<any>>) dst(%arg10 : memref<32x32xf32, #tpu.memory_space<vmem>>)
      %cst_97 = arith.constant 0.000000e+00 : f32
      %298 = vector.broadcast %cst_97 : f32 to vector<8x32xf32>
      %c0_98 = arith.constant 0 : index
      %c0_99 = arith.constant 0 : index
      %299 = vector.load %arg7[%c0_98, %c0_99] : memref<8x32xf32, #tpu.memory_space<vmem>>, vector<8x32xf32>
      tpu.vector_store %arg7[%c0_98, %c0_99], %298 {strides = array<i32>} : memref<8x32xf32, #tpu.memory_space<vmem>>, vector<8x32xf32>,
      %cst_100 = arith.constant 0.000000e+00 : f32
      %300 = vector.broadcast %cst_100 : f32 to vector<8x32xf32>
      %c0_101 = arith.constant 0 : index
      %c0_102 = arith.constant 0 : index
      %301 = vector.load %arg8[%c0_101, %c0_102] : memref<8x32xf32, #tpu.memory_space<vmem>>, vector<8x32xf32>
      tpu.vector_store %arg8[%c0_101, %c0_102], %300 {strides = array<i32>} : memref<8x32xf32, #tpu.memory_space<vmem>>, vector<8x32xf32>,
    } else {
    }
    %c0 = arith.constant 0 : index
    %c0_1 = arith.constant 0 : index
    %3 = vector.load %arg9[%c0, %c0_1] : memref<32x128xf32, #tpu.memory_space<vmem>>, vector<32x128xf32>
    %c0_2 = arith.constant 0 : index
    %c0_3 = arith.constant 0 : index
    %4 = vector.load %arg10[%c0_2, %c0_3] : memref<32x32xf32, #tpu.memory_space<vmem>>, vector<32x32xf32>
    %c0_4 = arith.constant 0 : index
    %c0_5 = arith.constant 0 : index
    %5 = vector.load %arg5[%c0_4, %c0_5] : memref<1x32xf32, #tpu.memory_space<vmem>>, vector<1x32xf32>
    %c0_6 = arith.constant 0 : index
    %c0_7 = arith.constant 0 : index
    %6 = vector.load %arg7[%c0_6, %c0_7] : memref<8x32xf32, #tpu.memory_space<vmem>>, vector<8x32xf32>
    %c0_8 = arith.constant 0 : index
    %c0_9 = arith.constant 0 : index
    %7 = vector.load %arg8[%c0_8, %c0_9] : memref<8x32xf32, #tpu.memory_space<vmem>>, vector<8x32xf32>
    %c0_10 = arith.constant 0 : index
    %c0_11 = arith.constant 0 : index
    %c0_12 = arith.constant 0 : index
    %8 = vector.load %arg2[%c0_10, %c0_11, %c0_12] : memref<8x8x128xf32, #tpu.memory_space<vmem>>, vector<8x1x128xf32>
    %9 = vector.shape_cast %8 : vector<8x1x128xf32> to vector<8x128xf32>
    %cst = arith.constant dense<0.000000e+00> : vector<8x128xf32>
    %10 = tpu.matmul %7, %3, %cst {dimension_numbers = #tpu.dot_dimension_numbers<[1], [0], [0], [1], [0, 0, 1, 1], [], []>} : vector<8x32xf32>, vector<32x128xf32>, vector<8x128xf32> -> vector<8x128xf32>
    %11 = arith.addf %9, %10 : vector<8x128xf32>
    %12 = vector.extract_strided_slice %11 {offsets = [0, 0], sizes = [8, 32], strides = [1, 1]} : vector<8x128xf32> to vector<8x32xf32>
    %13 = arith.negf %12 : vector<8x32xf32>
    %14 = math.exp %13 : vector<8x32xf32>
    %cst_13 = arith.constant 1.000000e+00 : f32
    %15 = vector.broadcast %cst_13 : f32 to vector<8x32xf32>
    %16 = arith.addf %15, %14 : vector<8x32xf32>
    %17 = arith.divf %15, %16 : vector<8x32xf32>
    %18 = vector.extract_strided_slice %11 {offsets = [0, 32], sizes = [8, 32], strides = [1, 1]} : vector<8x128xf32> to vector<8x32xf32>
    %19 = arith.negf %18 : vector<8x32xf32>
    %20 = math.exp %19 : vector<8x32xf32>
    %cst_14 = arith.constant 1.000000e+00 : f32
    %21 = vector.broadcast %cst_14 : f32 to vector<8x32xf32>
    %22 = arith.addf %21, %20 : vector<8x32xf32>
    %23 = arith.divf %21, %22 : vector<8x32xf32>
    %24 = vector.extract_strided_slice %11 {offsets = [0, 64], sizes = [8, 32], strides = [1, 1]} : vector<8x128xf32> to vector<8x32xf32>
    %25 = math.tanh %24 : vector<8x32xf32>
    %26 = vector.extract_strided_slice %11 {offsets = [0, 96], sizes = [8, 32], strides = [1, 1]} : vector<8x128xf32> to vector<8x32xf32>
    %27 = arith.negf %26 : vector<8x32xf32>
    %28 = math.exp %27 : vector<8x32xf32>
    %cst_15 = arith.constant 1.000000e+00 : f32
    %29 = vector.broadcast %cst_15 : f32 to vector<8x32xf32>
    %30 = arith.addf %29, %28 : vector<8x32xf32>
    %31 = arith.divf %29, %30 : vector<8x32xf32>
    %32 = arith.mulf %17, %6 : vector<8x32xf32>
    %33 = arith.mulf %23, %25 : vector<8x32xf32>
    %34 = arith.addf %32, %33 : vector<8x32xf32>
    %35 = math.tanh %34 : vector<8x32xf32>
    %36 = arith.mulf %31, %35 : vector<8x32xf32>
    %cst_16 = arith.constant dense<0.000000e+00> : vector<8x32xf32>
    %37 = tpu.matmul %36, %4, %cst_16 {dimension_numbers = #tpu.dot_dimension_numbers<[1], [0], [0], [1], [0, 0, 1, 1], [], []>} : vector<8x32xf32>, vector<32x32xf32>, vector<8x32xf32> -> vector<8x32xf32>
    %38 = vector.broadcast %5 : vector<1x32xf32> to vector<8x32xf32>
    %39 = arith.addf %37, %38 : vector<8x32xf32>
    %c0_17 = arith.constant 0 : index
    %c0_18 = arith.constant 0 : index
    %c0_19 = arith.constant 0 : index
    %40 = vector.load %arg6[%c0_17, %c0_18, %c0_19] : memref<8x8x32xf32, #tpu.memory_space<vmem>>, vector<8x1x32xf32>
    %41 = vector.shape_cast %40 : vector<8x1x32xf32> to vector<8x32xf32>
    %42 = vector.shape_cast %39 : vector<8x32xf32> to vector<8x1x32xf32>
    tpu.vector_store %arg6[%c0_17, %c0_18, %c0_19], %42 {strides = array<i32>} : memref<8x8x32xf32, #tpu.memory_space<vmem>>, vector<8x1x32xf32>,
    %c0_20 = arith.constant 0 : index
    %c1 = arith.constant 1 : index
    %c0_21 = arith.constant 0 : index
    %43 = vector.load %arg2[%c0_20, %c1, %c0_21] : memref<8x8x128xf32, #tpu.memory_space<vmem>>, vector<8x1x128xf32>
    %44 = vector.shape_cast %43 : vector<8x1x128xf32> to vector<8x128xf32>
    %cst_22 = arith.constant dense<0.000000e+00> : vector<8x128xf32>
    %45 = tpu.matmul %36, %3, %cst_22 {dimension_numbers = #tpu.dot_dimension_numbers<[1], [0], [0], [1], [0, 0, 1, 1], [], []>} : vector<8x32xf32>, vector<32x128xf32>, vector<8x128xf32> -> vector<8x128xf32>
    %46 = arith.addf %44, %45 : vector<8x128xf32>
    %47 = vector.extract_strided_slice %46 {offsets = [0, 0], sizes = [8, 32], strides = [1, 1]} : vector<8x128xf32> to vector<8x32xf32>
    %48 = arith.negf %47 : vector<8x32xf32>
    %49 = math.exp %48 : vector<8x32xf32>
    %cst_23 = arith.constant 1.000000e+00 : f32
    %50 = vector.broadcast %cst_23 : f32 to vector<8x32xf32>
    %51 = arith.addf %50, %49 : vector<8x32xf32>
    %52 = arith.divf %50, %51 : vector<8x32xf32>
    %53 = vector.extract_strided_slice %46 {offsets = [0, 32], sizes = [8, 32], strides = [1, 1]} : vector<8x128xf32> to vector<8x32xf32>
    %54 = arith.negf %53 : vector<8x32xf32>
    %55 = math.exp %54 : vector<8x32xf32>
    %cst_24 = arith.constant 1.000000e+00 : f32
    %56 = vector.broadcast %cst_24 : f32 to vector<8x32xf32>
    %57 = arith.addf %56, %55 : vector<8x32xf32>
    %58 = arith.divf %56, %57 : vector<8x32xf32>
    %59 = vector.extract_strided_slice %46 {offsets = [0, 64], sizes = [8, 32], strides = [1, 1]} : vector<8x128xf32> to vector<8x32xf32>
    %60 = math.tanh %59 : vector<8x32xf32>
    %61 = vector.extract_strided_slice %46 {offsets = [0, 96], sizes = [8, 32], strides = [1, 1]} : vector<8x128xf32> to vector<8x32xf32>
    %62 = arith.negf %61 : vector<8x32xf32>
    %63 = math.exp %62 : vector<8x32xf32>
    %cst_25 = arith.constant 1.000000e+00 : f32
    %64 = vector.broadcast %cst_25 : f32 to vector<8x32xf32>
    %65 = arith.addf %64, %63 : vector<8x32xf32>
    %66 = arith.divf %64, %65 : vector<8x32xf32>
    %67 = arith.mulf %52, %34 : vector<8x32xf32>
    %68 = arith.mulf %58, %60 : vector<8x32xf32>
    %69 = arith.addf %67, %68 : vector<8x32xf32>
    %70 = math.tanh %69 : vector<8x32xf32>
    %71 = arith.mulf %66, %70 : vector<8x32xf32>
    %cst_26 = arith.constant dense<0.000000e+00> : vector<8x32xf32>
    %72 = tpu.matmul %71, %4, %cst_26 {dimension_numbers = #tpu.dot_dimension_numbers<[1], [0], [0], [1], [0, 0, 1, 1], [], []>} : vector<8x32xf32>, vector<32x32xf32>, vector<8x32xf32> -> vector<8x32xf32>
    %73 = vector.broadcast %5 : vector<1x32xf32> to vector<8x32xf32>
    %74 = arith.addf %72, %73 : vector<8x32xf32>
    %c0_27 = arith.constant 0 : index
    %c1_28 = arith.constant 1 : index
    %c0_29 = arith.constant 0 : index
    %75 = vector.load %arg6[%c0_27, %c1_28, %c0_29] : memref<8x8x32xf32, #tpu.memory_space<vmem>>, vector<8x1x32xf32>
    %76 = vector.shape_cast %75 : vector<8x1x32xf32> to vector<8x32xf32>
    %77 = vector.shape_cast %74 : vector<8x32xf32> to vector<8x1x32xf32>
    tpu.vector_store %arg6[%c0_27, %c1_28, %c0_29], %77 {strides = array<i32>} : memref<8x8x32xf32, #tpu.memory_space<vmem>>, vector<8x1x32xf32>,
    %c0_30 = arith.constant 0 : index
    %c2 = arith.constant 2 : index
    %c0_31 = arith.constant 0 : index
    %78 = vector.load %arg2[%c0_30, %c2, %c0_31] : memref<8x8x128xf32, #tpu.memory_space<vmem>>, vector<8x1x128xf32>
    %79 = vector.shape_cast %78 : vector<8x1x128xf32> to vector<8x128xf32>
    %cst_32 = arith.constant dense<0.000000e+00> : vector<8x128xf32>
    %80 = tpu.matmul %71, %3, %cst_32 {dimension_numbers = #tpu.dot_dimension_numbers<[1], [0], [0], [1], [0, 0, 1, 1], [], []>} : vector<8x32xf32>, vector<32x128xf32>, vector<8x128xf32> -> vector<8x128xf32>
    %81 = arith.addf %79, %80 : vector<8x128xf32>
    %82 = vector.extract_strided_slice %81 {offsets = [0, 0], sizes = [8, 32], strides = [1, 1]} : vector<8x128xf32> to vector<8x32xf32>
    %83 = arith.negf %82 : vector<8x32xf32>
    %84 = math.exp %83 : vector<8x32xf32>
    %cst_33 = arith.constant 1.000000e+00 : f32
    %85 = vector.broadcast %cst_33 : f32 to vector<8x32xf32>
    %86 = arith.addf %85, %84 : vector<8x32xf32>
    %87 = arith.divf %85, %86 : vector<8x32xf32>
    %88 = vector.extract_strided_slice %81 {offsets = [0, 32], sizes = [8, 32], strides = [1, 1]} : vector<8x128xf32> to vector<8x32xf32>
    %89 = arith.negf %88 : vector<8x32xf32>
    %90 = math.exp %89 : vector<8x32xf32>
    %cst_34 = arith.constant 1.000000e+00 : f32
    %91 = vector.broadcast %cst_34 : f32 to vector<8x32xf32>
    %92 = arith.addf %91, %90 : vector<8x32xf32>
    %93 = arith.divf %91, %92 : vector<8x32xf32>
    %94 = vector.extract_strided_slice %81 {offsets = [0, 64], sizes = [8, 32], strides = [1, 1]} : vector<8x128xf32> to vector<8x32xf32>
    %95 = math.tanh %94 : vector<8x32xf32>
    %96 = vector.extract_strided_slice %81 {offsets = [0, 96], sizes = [8, 32], strides = [1, 1]} : vector<8x128xf32> to vector<8x32xf32>
    %97 = arith.negf %96 : vector<8x32xf32>
    %98 = math.exp %97 : vector<8x32xf32>
    %cst_35 = arith.constant 1.000000e+00 : f32
    %99 = vector.broadcast %cst_35 : f32 to vector<8x32xf32>
    %100 = arith.addf %99, %98 : vector<8x32xf32>
    %101 = arith.divf %99, %100 : vector<8x32xf32>
    %102 = arith.mulf %87, %69 : vector<8x32xf32>
    %103 = arith.mulf %93, %95 : vector<8x32xf32>
    %104 = arith.addf %102, %103 : vector<8x32xf32>
    %105 = math.tanh %104 : vector<8x32xf32>
    %106 = arith.mulf %101, %105 : vector<8x32xf32>
    %cst_36 = arith.constant dense<0.000000e+00> : vector<8x32xf32>
    %107 = tpu.matmul %106, %4, %cst_36 {dimension_numbers = #tpu.dot_dimension_numbers<[1], [0], [0], [1], [0, 0, 1, 1], [], []>} : vector<8x32xf32>, vector<32x32xf32>, vector<8x32xf32> -> vector<8x32xf32>
    %108 = vector.broadcast %5 : vector<1x32xf32> to vector<8x32xf32>
    %109 = arith.addf %107, %108 : vector<8x32xf32>
    %c0_37 = arith.constant 0 : index
    %c2_38 = arith.constant 2 : index
    %c0_39 = arith.constant 0 : index
    %110 = vector.load %arg6[%c0_37, %c2_38, %c0_39] : memref<8x8x32xf32, #tpu.memory_space<vmem>>, vector<8x1x32xf32>
    %111 = vector.shape_cast %110 : vector<8x1x32xf32> to vector<8x32xf32>
    %112 = vector.shape_cast %109 : vector<8x32xf32> to vector<8x1x32xf32>
    tpu.vector_store %arg6[%c0_37, %c2_38, %c0_39], %112 {strides = array<i32>} : memref<8x8x32xf32, #tpu.memory_space<vmem>>, vector<8x1x32xf32>,
    %c0_40 = arith.constant 0 : index
    %c3 = arith.constant 3 : index
    %c0_41 = arith.constant 0 : index
    %113 = vector.load %arg2[%c0_40, %c3, %c0_41] : memref<8x8x128xf32, #tpu.memory_space<vmem>>, vector<8x1x128xf32>
    %114 = vector.shape_cast %113 : vector<8x1x128xf32> to vector<8x128xf32>
    %cst_42 = arith.constant dense<0.000000e+00> : vector<8x128xf32>
    %115 = tpu.matmul %106, %3, %cst_42 {dimension_numbers = #tpu.dot_dimension_numbers<[1], [0], [0], [1], [0, 0, 1, 1], [], []>} : vector<8x32xf32>, vector<32x128xf32>, vector<8x128xf32> -> vector<8x128xf32>
    %116 = arith.addf %114, %115 : vector<8x128xf32>
    %117 = vector.extract_strided_slice %116 {offsets = [0, 0], sizes = [8, 32], strides = [1, 1]} : vector<8x128xf32> to vector<8x32xf32>
    %118 = arith.negf %117 : vector<8x32xf32>
    %119 = math.exp %118 : vector<8x32xf32>
    %cst_43 = arith.constant 1.000000e+00 : f32
    %120 = vector.broadcast %cst_43 : f32 to vector<8x32xf32>
    %121 = arith.addf %120, %119 : vector<8x32xf32>
    %122 = arith.divf %120, %121 : vector<8x32xf32>
    %123 = vector.extract_strided_slice %116 {offsets = [0, 32], sizes = [8, 32], strides = [1, 1]} : vector<8x128xf32> to vector<8x32xf32>
    %124 = arith.negf %123 : vector<8x32xf32>
    %125 = math.exp %124 : vector<8x32xf32>
    %cst_44 = arith.constant 1.000000e+00 : f32
    %126 = vector.broadcast %cst_44 : f32 to vector<8x32xf32>
    %127 = arith.addf %126, %125 : vector<8x32xf32>
    %128 = arith.divf %126, %127 : vector<8x32xf32>
    %129 = vector.extract_strided_slice %116 {offsets = [0, 64], sizes = [8, 32], strides = [1, 1]} : vector<8x128xf32> to vector<8x32xf32>
    %130 = math.tanh %129 : vector<8x32xf32>
    %131 = vector.extract_strided_slice %116 {offsets = [0, 96], sizes = [8, 32], strides = [1, 1]} : vector<8x128xf32> to vector<8x32xf32>
    %132 = arith.negf %131 : vector<8x32xf32>
    %133 = math.exp %132 : vector<8x32xf32>
    %cst_45 = arith.constant 1.000000e+00 : f32
    %134 = vector.broadcast %cst_45 : f32 to vector<8x32xf32>
    %135 = arith.addf %134, %133 : vector<8x32xf32>
    %136 = arith.divf %134, %135 : vector<8x32xf32>
    %137 = arith.mulf %122, %104 : vector<8x32xf32>
    %138 = arith.mulf %128, %130 : vector<8x32xf32>
    %139 = arith.addf %137, %138 : vector<8x32xf32>
    %140 = math.tanh %139 : vector<8x32xf32>
    %141 = arith.mulf %136, %140 : vector<8x32xf32>
    %cst_46 = arith.constant dense<0.000000e+00> : vector<8x32xf32>
    %142 = tpu.matmul %141, %4, %cst_46 {dimension_numbers = #tpu.dot_dimension_numbers<[1], [0], [0], [1], [0, 0, 1, 1], [], []>} : vector<8x32xf32>, vector<32x32xf32>, vector<8x32xf32> -> vector<8x32xf32>
    %143 = vector.broadcast %5 : vector<1x32xf32> to vector<8x32xf32>
    %144 = arith.addf %142, %143 : vector<8x32xf32>
    %c0_47 = arith.constant 0 : index
    %c3_48 = arith.constant 3 : index
    %c0_49 = arith.constant 0 : index
    %145 = vector.load %arg6[%c0_47, %c3_48, %c0_49] : memref<8x8x32xf32, #tpu.memory_space<vmem>>, vector<8x1x32xf32>
    %146 = vector.shape_cast %145 : vector<8x1x32xf32> to vector<8x32xf32>
    %147 = vector.shape_cast %144 : vector<8x32xf32> to vector<8x1x32xf32>
    tpu.vector_store %arg6[%c0_47, %c3_48, %c0_49], %147 {strides = array<i32>} : memref<8x8x32xf32, #tpu.memory_space<vmem>>, vector<8x1x32xf32>,
    %c0_50 = arith.constant 0 : index
    %c4 = arith.constant 4 : index
    %c0_51 = arith.constant 0 : index
    %148 = vector.load %arg2[%c0_50, %c4, %c0_51] : memref<8x8x128xf32, #tpu.memory_space<vmem>>, vector<8x1x128xf32>
    %149 = vector.shape_cast %148 : vector<8x1x128xf32> to vector<8x128xf32>
    %cst_52 = arith.constant dense<0.000000e+00> : vector<8x128xf32>
    %150 = tpu.matmul %141, %3, %cst_52 {dimension_numbers = #tpu.dot_dimension_numbers<[1], [0], [0], [1], [0, 0, 1, 1], [], []>} : vector<8x32xf32>, vector<32x128xf32>, vector<8x128xf32> -> vector<8x128xf32>
    %151 = arith.addf %149, %150 : vector<8x128xf32>
    %152 = vector.extract_strided_slice %151 {offsets = [0, 0], sizes = [8, 32], strides = [1, 1]} : vector<8x128xf32> to vector<8x32xf32>
    %153 = arith.negf %152 : vector<8x32xf32>
    %154 = math.exp %153 : vector<8x32xf32>
    %cst_53 = arith.constant 1.000000e+00 : f32
    %155 = vector.broadcast %cst_53 : f32 to vector<8x32xf32>
    %156 = arith.addf %155, %154 : vector<8x32xf32>
    %157 = arith.divf %155, %156 : vector<8x32xf32>
    %158 = vector.extract_strided_slice %151 {offsets = [0, 32], sizes = [8, 32], strides = [1, 1]} : vector<8x128xf32> to vector<8x32xf32>
    %159 = arith.negf %158 : vector<8x32xf32>
    %160 = math.exp %159 : vector<8x32xf32>
    %cst_54 = arith.constant 1.000000e+00 : f32
    %161 = vector.broadcast %cst_54 : f32 to vector<8x32xf32>
    %162 = arith.addf %161, %160 : vector<8x32xf32>
    %163 = arith.divf %161, %162 : vector<8x32xf32>
    %164 = vector.extract_strided_slice %151 {offsets = [0, 64], sizes = [8, 32], strides = [1, 1]} : vector<8x128xf32> to vector<8x32xf32>
    %165 = math.tanh %164 : vector<8x32xf32>
    %166 = vector.extract_strided_slice %151 {offsets = [0, 96], sizes = [8, 32], strides = [1, 1]} : vector<8x128xf32> to vector<8x32xf32>
    %167 = arith.negf %166 : vector<8x32xf32>
    %168 = math.exp %167 : vector<8x32xf32>
    %cst_55 = arith.constant 1.000000e+00 : f32
    %169 = vector.broadcast %cst_55 : f32 to vector<8x32xf32>
    %170 = arith.addf %169, %168 : vector<8x32xf32>
    %171 = arith.divf %169, %170 : vector<8x32xf32>
    %172 = arith.mulf %157, %139 : vector<8x32xf32>
    %173 = arith.mulf %163, %165 : vector<8x32xf32>
    %174 = arith.addf %172, %173 : vector<8x32xf32>
    %175 = math.tanh %174 : vector<8x32xf32>
    %176 = arith.mulf %171, %175 : vector<8x32xf32>
    %cst_56 = arith.constant dense<0.000000e+00> : vector<8x32xf32>
    %177 = tpu.matmul %176, %4, %cst_56 {dimension_numbers = #tpu.dot_dimension_numbers<[1], [0], [0], [1], [0, 0, 1, 1], [], []>} : vector<8x32xf32>, vector<32x32xf32>, vector<8x32xf32> -> vector<8x32xf32>
    %178 = vector.broadcast %5 : vector<1x32xf32> to vector<8x32xf32>
    %179 = arith.addf %177, %178 : vector<8x32xf32>
    %c0_57 = arith.constant 0 : index
    %c4_58 = arith.constant 4 : index
    %c0_59 = arith.constant 0 : index
    %180 = vector.load %arg6[%c0_57, %c4_58, %c0_59] : memref<8x8x32xf32, #tpu.memory_space<vmem>>, vector<8x1x32xf32>
    %181 = vector.shape_cast %180 : vector<8x1x32xf32> to vector<8x32xf32>
    %182 = vector.shape_cast %179 : vector<8x32xf32> to vector<8x1x32xf32>
    tpu.vector_store %arg6[%c0_57, %c4_58, %c0_59], %182 {strides = array<i32>} : memref<8x8x32xf32, #tpu.memory_space<vmem>>, vector<8x1x32xf32>,
    %c0_60 = arith.constant 0 : index
    %c5 = arith.constant 5 : index
    %c0_61 = arith.constant 0 : index
    %183 = vector.load %arg2[%c0_60, %c5, %c0_61] : memref<8x8x128xf32, #tpu.memory_space<vmem>>, vector<8x1x128xf32>
    %184 = vector.shape_cast %183 : vector<8x1x128xf32> to vector<8x128xf32>
    %cst_62 = arith.constant dense<0.000000e+00> : vector<8x128xf32>
    %185 = tpu.matmul %176, %3, %cst_62 {dimension_numbers = #tpu.dot_dimension_numbers<[1], [0], [0], [1], [0, 0, 1, 1], [], []>} : vector<8x32xf32>, vector<32x128xf32>, vector<8x128xf32> -> vector<8x128xf32>
    %186 = arith.addf %184, %185 : vector<8x128xf32>
    %187 = vector.extract_strided_slice %186 {offsets = [0, 0], sizes = [8, 32], strides = [1, 1]} : vector<8x128xf32> to vector<8x32xf32>
    %188 = arith.negf %187 : vector<8x32xf32>
    %189 = math.exp %188 : vector<8x32xf32>
    %cst_63 = arith.constant 1.000000e+00 : f32
    %190 = vector.broadcast %cst_63 : f32 to vector<8x32xf32>
    %191 = arith.addf %190, %189 : vector<8x32xf32>
    %192 = arith.divf %190, %191 : vector<8x32xf32>
    %193 = vector.extract_strided_slice %186 {offsets = [0, 32], sizes = [8, 32], strides = [1, 1]} : vector<8x128xf32> to vector<8x32xf32>
    %194 = arith.negf %193 : vector<8x32xf32>
    %195 = math.exp %194 : vector<8x32xf32>
    %cst_64 = arith.constant 1.000000e+00 : f32
    %196 = vector.broadcast %cst_64 : f32 to vector<8x32xf32>
    %197 = arith.addf %196, %195 : vector<8x32xf32>
    %198 = arith.divf %196, %197 : vector<8x32xf32>
    %199 = vector.extract_strided_slice %186 {offsets = [0, 64], sizes = [8, 32], strides = [1, 1]} : vector<8x128xf32> to vector<8x32xf32>
    %200 = math.tanh %199 : vector<8x32xf32>
    %201 = vector.extract_strided_slice %186 {offsets = [0, 96], sizes = [8, 32], strides = [1, 1]} : vector<8x128xf32> to vector<8x32xf32>
    %202 = arith.negf %201 : vector<8x32xf32>
    %203 = math.exp %202 : vector<8x32xf32>
    %cst_65 = arith.constant 1.000000e+00 : f32
    %204 = vector.broadcast %cst_65 : f32 to vector<8x32xf32>
    %205 = arith.addf %204, %203 : vector<8x32xf32>
    %206 = arith.divf %204, %205 : vector<8x32xf32>
    %207 = arith.mulf %192, %174 : vector<8x32xf32>
    %208 = arith.mulf %198, %200 : vector<8x32xf32>
    %209 = arith.addf %207, %208 : vector<8x32xf32>
    %210 = math.tanh %209 : vector<8x32xf32>
    %211 = arith.mulf %206, %210 : vector<8x32xf32>
    %cst_66 = arith.constant dense<0.000000e+00> : vector<8x32xf32>
    %212 = tpu.matmul %211, %4, %cst_66 {dimension_numbers = #tpu.dot_dimension_numbers<[1], [0], [0], [1], [0, 0, 1, 1], [], []>} : vector<8x32xf32>, vector<32x32xf32>, vector<8x32xf32> -> vector<8x32xf32>
    %213 = vector.broadcast %5 : vector<1x32xf32> to vector<8x32xf32>
    %214 = arith.addf %212, %213 : vector<8x32xf32>
    %c0_67 = arith.constant 0 : index
    %c5_68 = arith.constant 5 : index
    %c0_69 = arith.constant 0 : index
    %215 = vector.load %arg6[%c0_67, %c5_68, %c0_69] : memref<8x8x32xf32, #tpu.memory_space<vmem>>, vector<8x1x32xf32>
    %216 = vector.shape_cast %215 : vector<8x1x32xf32> to vector<8x32xf32>
    %217 = vector.shape_cast %214 : vector<8x32xf32> to vector<8x1x32xf32>
    tpu.vector_store %arg6[%c0_67, %c5_68, %c0_69], %217 {strides = array<i32>} : memref<8x8x32xf32, #tpu.memory_space<vmem>>, vector<8x1x32xf32>,
    %c0_70 = arith.constant 0 : index
    %c6 = arith.constant 6 : index
    %c0_71 = arith.constant 0 : index
    %218 = vector.load %arg2[%c0_70, %c6, %c0_71] : memref<8x8x128xf32, #tpu.memory_space<vmem>>, vector<8x1x128xf32>
    %219 = vector.shape_cast %218 : vector<8x1x128xf32> to vector<8x128xf32>
    %cst_72 = arith.constant dense<0.000000e+00> : vector<8x128xf32>
    %220 = tpu.matmul %211, %3, %cst_72 {dimension_numbers = #tpu.dot_dimension_numbers<[1], [0], [0], [1], [0, 0, 1, 1], [], []>} : vector<8x32xf32>, vector<32x128xf32>, vector<8x128xf32> -> vector<8x128xf32>
    %221 = arith.addf %219, %220 : vector<8x128xf32>
    %222 = vector.extract_strided_slice %221 {offsets = [0, 0], sizes = [8, 32], strides = [1, 1]} : vector<8x128xf32> to vector<8x32xf32>
    %223 = arith.negf %222 : vector<8x32xf32>
    %224 = math.exp %223 : vector<8x32xf32>
    %cst_73 = arith.constant 1.000000e+00 : f32
    %225 = vector.broadcast %cst_73 : f32 to vector<8x32xf32>
    %226 = arith.addf %225, %224 : vector<8x32xf32>
    %227 = arith.divf %225, %226 : vector<8x32xf32>
    %228 = vector.extract_strided_slice %221 {offsets = [0, 32], sizes = [8, 32], strides = [1, 1]} : vector<8x128xf32> to vector<8x32xf32>
    %229 = arith.negf %228 : vector<8x32xf32>
    %230 = math.exp %229 : vector<8x32xf32>
    %cst_74 = arith.constant 1.000000e+00 : f32
    %231 = vector.broadcast %cst_74 : f32 to vector<8x32xf32>
    %232 = arith.addf %231, %230 : vector<8x32xf32>
    %233 = arith.divf %231, %232 : vector<8x32xf32>
    %234 = vector.extract_strided_slice %221 {offsets = [0, 64], sizes = [8, 32], strides = [1, 1]} : vector<8x128xf32> to vector<8x32xf32>
    %235 = math.tanh %234 : vector<8x32xf32>
    %236 = vector.extract_strided_slice %221 {offsets = [0, 96], sizes = [8, 32], strides = [1, 1]} : vector<8x128xf32> to vector<8x32xf32>
    %237 = arith.negf %236 : vector<8x32xf32>
    %238 = math.exp %237 : vector<8x32xf32>
    %cst_75 = arith.constant 1.000000e+00 : f32
    %239 = vector.broadcast %cst_75 : f32 to vector<8x32xf32>
    %240 = arith.addf %239, %238 : vector<8x32xf32>
    %241 = arith.divf %239, %240 : vector<8x32xf32>
    %242 = arith.mulf %227, %209 : vector<8x32xf32>
    %243 = arith.mulf %233, %235 : vector<8x32xf32>
    %244 = arith.addf %242, %243 : vector<8x32xf32>
    %245 = math.tanh %244 : vector<8x32xf32>
    %246 = arith.mulf %241, %245 : vector<8x32xf32>
    %cst_76 = arith.constant dense<0.000000e+00> : vector<8x32xf32>
    %247 = tpu.matmul %246, %4, %cst_76 {dimension_numbers = #tpu.dot_dimension_numbers<[1], [0], [0], [1], [0, 0, 1, 1], [], []>} : vector<8x32xf32>, vector<32x32xf32>, vector<8x32xf32> -> vector<8x32xf32>
    %248 = vector.broadcast %5 : vector<1x32xf32> to vector<8x32xf32>
    %249 = arith.addf %247, %248 : vector<8x32xf32>
    %c0_77 = arith.constant 0 : index
    %c6_78 = arith.constant 6 : index
    %c0_79 = arith.constant 0 : index
    %250 = vector.load %arg6[%c0_77, %c6_78, %c0_79] : memref<8x8x32xf32, #tpu.memory_space<vmem>>, vector<8x1x32xf32>
    %251 = vector.shape_cast %250 : vector<8x1x32xf32> to vector<8x32xf32>
    %252 = vector.shape_cast %249 : vector<8x32xf32> to vector<8x1x32xf32>
    tpu.vector_store %arg6[%c0_77, %c6_78, %c0_79], %252 {strides = array<i32>} : memref<8x8x32xf32, #tpu.memory_space<vmem>>, vector<8x1x32xf32>,
    %c0_80 = arith.constant 0 : index
    %c7 = arith.constant 7 : index
    %c0_81 = arith.constant 0 : index
    %253 = vector.load %arg2[%c0_80, %c7, %c0_81] : memref<8x8x128xf32, #tpu.memory_space<vmem>>, vector<8x1x128xf32>
    %254 = vector.shape_cast %253 : vector<8x1x128xf32> to vector<8x128xf32>
    %cst_82 = arith.constant dense<0.000000e+00> : vector<8x128xf32>
    %255 = tpu.matmul %246, %3, %cst_82 {dimension_numbers = #tpu.dot_dimension_numbers<[1], [0], [0], [1], [0, 0, 1, 1], [], []>} : vector<8x32xf32>, vector<32x128xf32>, vector<8x128xf32> -> vector<8x128xf32>
    %256 = arith.addf %254, %255 : vector<8x128xf32>
    %257 = vector.extract_strided_slice %256 {offsets = [0, 0], sizes = [8, 32], strides = [1, 1]} : vector<8x128xf32> to vector<8x32xf32>
    %258 = arith.negf %257 : vector<8x32xf32>
    %259 = math.exp %258 : vector<8x32xf32>
    %cst_83 = arith.constant 1.000000e+00 : f32
    %260 = vector.broadcast %cst_83 : f32 to vector<8x32xf32>
    %261 = arith.addf %260, %259 : vector<8x32xf32>
    %262 = arith.divf %260, %261 : vector<8x32xf32>
    %263 = vector.extract_strided_slice %256 {offsets = [0, 32], sizes = [8, 32], strides = [1, 1]} : vector<8x128xf32> to vector<8x32xf32>
    %264 = arith.negf %263 : vector<8x32xf32>
    %265 = math.exp %264 : vector<8x32xf32>
    %cst_84 = arith.constant 1.000000e+00 : f32
    %266 = vector.broadcast %cst_84 : f32 to vector<8x32xf32>
    %267 = arith.addf %266, %265 : vector<8x32xf32>
    %268 = arith.divf %266, %267 : vector<8x32xf32>
    %269 = vector.extract_strided_slice %256 {offsets = [0, 64], sizes = [8, 32], strides = [1, 1]} : vector<8x128xf32> to vector<8x32xf32>
    %270 = math.tanh %269 : vector<8x32xf32>
    %271 = vector.extract_strided_slice %256 {offsets = [0, 96], sizes = [8, 32], strides = [1, 1]} : vector<8x128xf32> to vector<8x32xf32>
    %272 = arith.negf %271 : vector<8x32xf32>
    %273 = math.exp %272 : vector<8x32xf32>
    %cst_85 = arith.constant 1.000000e+00 : f32
    %274 = vector.broadcast %cst_85 : f32 to vector<8x32xf32>
    %275 = arith.addf %274, %273 : vector<8x32xf32>
    %276 = arith.divf %274, %275 : vector<8x32xf32>
    %277 = arith.mulf %262, %244 : vector<8x32xf32>
    %278 = arith.mulf %268, %270 : vector<8x32xf32>
    %279 = arith.addf %277, %278 : vector<8x32xf32>
    %280 = math.tanh %279 : vector<8x32xf32>
    %281 = arith.mulf %276, %280 : vector<8x32xf32>
    %cst_86 = arith.constant dense<0.000000e+00> : vector<8x32xf32>
    %282 = tpu.matmul %281, %4, %cst_86 {dimension_numbers = #tpu.dot_dimension_numbers<[1], [0], [0], [1], [0, 0, 1, 1], [], []>} : vector<8x32xf32>, vector<32x32xf32>, vector<8x32xf32> -> vector<8x32xf32>
    %283 = vector.broadcast %5 : vector<1x32xf32> to vector<8x32xf32>
    %284 = arith.addf %282, %283 : vector<8x32xf32>
    %c0_87 = arith.constant 0 : index
    %c7_88 = arith.constant 7 : index
    %c0_89 = arith.constant 0 : index
    %285 = vector.load %arg6[%c0_87, %c7_88, %c0_89] : memref<8x8x32xf32, #tpu.memory_space<vmem>>, vector<8x1x32xf32>
    %286 = vector.shape_cast %285 : vector<8x1x32xf32> to vector<8x32xf32>
    %287 = vector.shape_cast %284 : vector<8x32xf32> to vector<8x1x32xf32>
    tpu.vector_store %arg6[%c0_87, %c7_88, %c0_89], %287 {strides = array<i32>} : memref<8x8x32xf32, #tpu.memory_space<vmem>>, vector<8x1x32xf32>,
    %c0_90 = arith.constant 0 : index
    %c0_91 = arith.constant 0 : index
    %288 = vector.load %arg7[%c0_90, %c0_91] : memref<8x32xf32, #tpu.memory_space<vmem>>, vector<8x32xf32>
    tpu.vector_store %arg7[%c0_90, %c0_91], %279 {strides = array<i32>} : memref<8x32xf32, #tpu.memory_space<vmem>>, vector<8x32xf32>,
    %c0_92 = arith.constant 0 : index
    %c0_93 = arith.constant 0 : index
    %289 = vector.load %arg8[%c0_92, %c0_93] : memref<8x32xf32, #tpu.memory_space<vmem>>, vector<8x32xf32>
    tpu.vector_store %arg8[%c0_92, %c0_93], %281 {strides = array<i32>} : memref<8x32xf32, #tpu.memory_space<vmem>>, vector<8x32xf32>,
    return
  }
  func.func @transform_0(%arg0: i32, %arg1: i32) -> (i32, i32, i32) {
    %c0_i32 = arith.constant 0 : i32
    %c0_i32_0 = arith.constant 0 : i32
    return %arg0, %arg1, %c0_i32 : i32, i32, i32
  }
  func.func @transform_3(%arg0: i32, %arg1: i32) -> (i32, i32) {
    %c0_i32 = arith.constant 0 : i32
    %c0_i32_0 = arith.constant 0 : i32
    %c0_i32_1 = arith.constant 0 : i32
    return %c0_i32, %c0_i32_0 : i32, i32
  }
  func.func @transform_4(%arg0: i32, %arg1: i32) -> (i32, i32, i32) {
    %c0_i32 = arith.constant 0 : i32
    %c0_i32_0 = arith.constant 0 : i32
    return %arg0, %arg1, %c0_i32 : i32, i32, i32
  }
  func.func @transform_5(%arg0: i32, %arg1: i32) -> (i32, i32) {
    %c0_i32 = arith.constant 0 : i32
    %c0_i32_0 = arith.constant 0 : i32
    return %arg0, %c0_i32 : i32, i32
  }
  func.func @transform_6(%arg0: i32, %arg1: i32) -> (i32, i32) {
    %c0_i32 = arith.constant 0 : i32
    %c0_i32_0 = arith.constant 0 : i32
    return %arg0, %c0_i32 : i32, i32
  }
}

</mosaic_0001>

<bundles_post_ra>
// kernel: lstm_forward.1
= control target key start
LH: loop header
LB: loop body
LE: loop exit
PB: predicated region body
PF: predicated region fallthrough
CT: control target
= control target key end

     0   :  { %s6393_s0 = inlined_call_operand.vmem [shape: f32[8,8,128], index: 0, kind: input, shape index: {}]   ;;  %s6394_s1 = inlined_call_operand.vmem [shape: f32[32,128], index: 1, kind: input, shape index: {}]   ;;  %s6395_s2 = inlined_call_operand.vmem [shape: f32[32,32], index: 2, kind: input, shape index: {}]   ;;  %s6396_s3 = inlined_call_operand.vmem [shape: f32[1,32], index: 3, kind: input, shape index: {}]   ;;  %s6397_s4 = inlined_call_operand.vmem [shape: f32[8,8,32], index: 4, kind: output, shape index: {0}]   ;;  %s6398_s5 = inlined_call_operand.vmem [shape: f32[8,32], index: 5, kind: output, shape index: {1}]   ;;  %s6399_s6 = inlined_call_operand.vmem [shape: f32[8,32], index: 6, kind: output, shape index: {2}]  }
   0x1   :  { %v52_v0 = vld [vmem:[%s6394_s1] sm:$0xff]  ;;  %v54_v1 = vld [vmem:[%s6394_s1 + $0x8] sm:$0xff]  ;;  %v56_v2 = vld [vmem:[%s6394_s1 + $0x10] sm:$0xff] }
   0x2   :  { %v58_v3 = vld [vmem:[%s6394_s1 + $0x18] sm:$0xff] }
   0x3   :  { %67 = vsyncadd [#allocation4], 512  ;;  %v4900_v4 = vld [vmem:[%s6395_s2] sm:$0xff]  ;;  %v4905_v5 = vld [vmem:[%s6395_s2 + $0x8] sm:$0xff] }
   0x4   :  { %v4910_v6 = vld [vmem:[%s6395_s2 + $0x10] sm:$0xff]  ;;  %v4915_v7 = vld [vmem:[%s6395_s2 + $0x18] sm:$0xff] }
   0x5   :  { %116 = vsyncadd [#allocation4 + $0x1], 512 }
   0x6   :  { %4840 = dma.done.wait [#allocation4], 512 }
   0x7   :  { %4841 = vsyncadd [#allocation4], 4294966784 }
   0x8   :  { %4842 = dma.done.wait [#allocation4 + $0x1], 512 }
   0x9   :  { %4843 = vsyncadd [#allocation4 + $0x1], 4294966784  ;;  %v4917_v8 = vpack.c.bf16 %v54_v1, %v52_v0  ;;  %v4844_v9 = vmov 0.0|0.0   ;;  %vm122_vm0 = vcmask 261120   ;;  %v4922_v10 = vpack.c.bf16 %v58_v3, %v56_v2  ;;  %v136_v13 = vld [vmem:[%s6393_s0] sm:$0x1] }
   0xa   :  { %4224 = vmatprep.subr.bf16.mxu0 %v4844_v9  ;;  %4230 = vmatprep.subr.bf16.mxu1 %v4844_v9  ;;  %vm4845_vm1 = vmmov 0   ;;  %v4846_v11 = vmov 0.0   ;;  %v139_v15 = vld [vmem:[%s6393_s0 + $0x18] sm:$0x1]  ;;  %v141_v21 = vld [vmem:[%s6393_s0 + $0x28] sm:$0x1] }
   0xb   :  { %4226 = vmatpush3.bf16.msra.mxu0 %v4917_v8  ;;  %4056 = vmatprep.mubr.msk.f32.mxu0 %vm4845_vm1, %v4846_v11  ;;  %124 = vst.msk [vmem:[%s6399_s6] sm:$0xff] %vm122_vm0, %v4846_v11  ;;  %123 = vst.msk [vmem:[%s6398_s5] sm:$0xff] %vm122_vm0, %v4846_v11  ;;  %v143_v23 = vld [vmem:[%s6393_s0 + $0x38] sm:$0x1]  ;;  %v137_v26 = vld [vmem:[%s6393_s0 + $0x8] sm:$0x1] }
   0xc   :  { %4227 = vmatprep.subr.bf16.mxu0 %v4844_v9  ;;  %4067 = vmatprep.mubr.msk.f32.mxu1 %vm4845_vm1, %v4846_v11  ;;  %v138_v31 = vld [vmem:[%s6393_s0 + $0x10] sm:$0x1]  ;;  %s4847_s29 = smov 96   ;;  %v140_v35 = vld [vmem:[%s6393_s0 + $0x20] sm:$0x1]  ;;  %vm465_vm2 = vcmask 1041409  }
   0xd   :  { %v142_v38 = vld [vmem:[%s6393_s0 + $0x30] sm:$0x1]  ;;  %vm468_vm3 = vcmask 1042434   ;;  %vm471_vm4 = vcmask 1043459   ;;  %vm474_vm5 = vcmask 1044484   ;;  %vm477_vm6 = vcmask 1045509  }
   0xe   :  { %vm480_vm7 = vcmask 1046534   ;;  %vm483_vm8 = vcmask 1047559   ;;  %s4848_s12 = smov 32   ;;  %vm617_vm9 = vcmask 253952  }
   0xf   :  { %4229 = vmatpush3.bf16.msra.mxu0 %v4922_v10 }
  0x10   :  { %4236 = vmatprep.subr.bf16.mxu0 %v4844_v9 }
  0x12   :  { %v135_v12 = vld [vmem:[%s6399_s6] sm:$0xff] }
  0x13   :  { %4057 = vmatmul.mubr.msk.f32.vlgmr.msra.gmra.mrb[0].mxu0 %vm122_vm0, %v135_v12 }
  0x14   :  { %4238 = vmatpush3.bf16.msra.mxu0 %v4917_v8  ;;  %4078 = vmatprep.mubr.msk.f32.mxu0 %vm4845_vm1, %v4846_v11 }
  0x15   :  { %4239 = vmatprep.subr.bf16.mxu0 %v4844_v9 }
  0x18   :  { %4241 = vmatpush3.bf16.msra.mxu0 %v4922_v10 }
  0x19   :  { %4248 = vmatprep.subr.bf16.mxu0 %v4844_v9 }
  0xe6   :  { %v214_v14 = vpop.f32.mrb[0].mxu0 }
  0xe7   :  { %v221_v16 = vrot.slane %v214_v14, 3  ;;  %v4058_v17 = vpop.f32.mrb[1].mxu0  ;;  %v234_v18 = vadd.f32 %v214_v14, %v136_v13  ;;  %v223_v20 = vrot.slane %v214_v14, 5  ;;  %v225_v22 = vrot.slane %v214_v14, 7 }
  0xe8   :  { %v219_v25 = vrot.slane %v214_v14, 1  ;;  %v220_v29 = vrot.slane %v214_v14, 2  ;;  %v222_v33 = vrot.slane %v214_v14, 4  ;;  %v224_v36 = vrot.slane %v214_v14, 6 }
  0xe9   :  { %v237_v19 = vadd.f32 %v221_v16, %v139_v15  ;;  %4326 = vtanh.f32 %v234_v18  ;;  %v239_v24 = vadd.f32 %v223_v20, %v141_v21  ;;  %v241_v27 = vadd.f32 %v225_v22, %v143_v23 }
  0xea   :  { %v235_v30 = vadd.f32 %v219_v25, %v137_v26  ;;  %v236_v34 = vadd.f32 %v220_v29, %v138_v31  ;;  %v238_v37 = vadd.f32 %v222_v33, %v140_v35  ;;  %v240_v40 = vadd.f32 %v224_v36, %v142_v38  ;;  %v134_v38 = vld [vmem:[%s6398_s5] sm:$0xff] }
  0xeb   :  { %4328 = vtanh.f32 %v237_v19  ;;  %v3886_v46 = vmul.f32 -1.442695, %v234_v18  ;;  %v3889_v51 = vmul.f32 -1.442695, %v237_v19  ;;  %v3891_v53 = vmul.f32 -1.442695, %v239_v24 }
  0xec   :  { %4330 = vtanh.f32 %v239_v24  ;;  %v3887_v48 = vmul.f32 -1.442695, %v235_v30  ;;  %v3888_v50 = vmul.f32 -1.442695, %v236_v34  ;;  %v3890_v52 = vmul.f32 -1.442695, %v238_v37 }
  0xed   :  { %4332 = vtanh.f32 %v241_v27  ;;  %v3892_v54 = vmul.f32 -1.442695, %v240_v40  ;;  %v3893_v56 = vmul.f32 -1.442695, %v241_v27 }
  0xee   :  { %4334 = vtanh.f32 %v235_v30 }
  0xef   :  { %4336 = vtanh.f32 %v236_v34 }
  0xf0   :  { %4338 = vtanh.f32 %v238_v37 }
  0xf1   :  { %4340 = vtanh.f32 %v240_v40 }
  0xf2   :  { %4342 = vpow2.f32 %v3886_v46 }
  0xf3   :  { %v4327_v28 = vpop.eup %4326  ;;  %4344 = vpow2.f32 %v3887_v48 }
  0xf4   :  { %330 = vrot.lane.b32.xlu1 %v4327_v28, %s4847_s29 }
  0xf5   :  { %v4329_v32 = vpop.eup %4328 }
  0xf6   :  { %v4331_v39 = vpop.eup %4330 }
  0xf7   :  { %v4333_v41 = vpop.eup %4332 }
  0xf8   :  { %336 = vrot.lane.b32.xlu1 %v4329_v32, %s4847_s29  ;;  %v4335_v42 = vpop.eup %4334 }
  0xf9   :  { %332 = vrot.lane.b32.xlu0 %v4335_v42, %s4847_s29  ;;  %v4337_v43 = vpop.eup %4336  ;;  %v299_v42 = vrot.slane %v134_v38, 1 }
  0xfa   :  { %v4339_v44 = vpop.eup %4338 }
  0xfb   :  { %v4341_v45 = vpop.eup %4340 }
  0xfc   :  { %340 = vrot.lane.b32.xlu1 %v4331_v39, %s4847_s29  ;;  %v4343_v47 = vpop.eup %4342 }
  0xfd   :  { %334 = vrot.lane.b32.xlu0 %v4337_v43, %s4847_s29  ;;  %v266_v49 = vadd.f32 1.0, %v4343_v47  ;;  %v4345_v55 = vpop.eup %4344 }
  0xfe   :  { %v267_v58 = vadd.f32 1.0, %v4345_v55 }
  0xff   :  { %4346 = vrcp.f32 %v266_v49  ;;  %v301_v49 = vrot.slane %v134_v38, 3 }
 0x100   :  { %344 = vrot.lane.b32.xlu1 %v4333_v41, %s4847_s29  ;;  %4348 = vpow2.f32 %v3888_v50  ;;  %v302_v50 = vrot.slane %v134_v38, 4 }
 0x101   :  { %338 = vrot.lane.b32.xlu0 %v4339_v44, %s4847_s29  ;;  %4350 = vpow2.f32 %v3889_v51 }
 0x102   :  { %4352 = vpow2.f32 %v3890_v52 }
 0x103   :  { %4354 = vpow2.f32 %v3891_v53  ;;  %v303_v53 = vrot.slane %v134_v38, 5 }
 0x104   :  { %4356 = vpow2.f32 %v3892_v54 }
 0x105   :  { %342 = vrot.lane.b32.xlu0 %v4341_v45, %s4847_s29  ;;  %4358 = vpow2.f32 %v3893_v56  ;;  %v300_v45 = vrot.slane %v134_v38, 2  ;;  %v304_v56 = vrot.slane %v134_v38, 6 }
 0x106   :  { %4360 = vrcp.f32 %v267_v58 }
 0x109   :  { %v4983_v57 = vpop.eup %4346 }
 0x10a   :  { %v4349_v60 = vpop.eup %4348  ;;  %v314_v39 = vmul.f32 %v4983_v57, %v134_v38 }
 0x10b   :  { %v4351_v62 = vpop.eup %4350  ;;  %v268_v63 = vadd.f32 1.0, %v4349_v60 }
 0x10c   :  { %v4353_v0 = vpop.eup %4352  ;;  %v269_v1 = vadd.f32 1.0, %v4351_v62 }
 0x10d   :  { %v4355_v2 = vpop.eup %4354  ;;  %4362 = vrcp.f32 %v268_v63  ;;  %v270_v3 = vadd.f32 1.0, %v4353_v0  ;;  %v305_v0 = vrot.slane %v134_v38, 7 }
 0x10e   :  { %v4357_v12 = vpop.eup %4356  ;;  %4364 = vrcp.f32 %v269_v1  ;;  %v271_v13 = vadd.f32 1.0, %v4355_v2 }
 0x10f   :  { %4366 = vrcp.f32 %v270_v3  ;;  %v272_v14 = vadd.f32 1.0, %v4357_v12  ;;  %v4359_v15 = vpop.eup %4358 }
 0x110   :  { %v4987_v16 = vpop.eup %4360  ;;  %4368 = vrcp.f32 %v271_v13  ;;  %v273_v20 = vadd.f32 1.0, %v4359_v15 }
 0x111   :  { %4370 = vrcp.f32 %v272_v14  ;;  %v315_v44 = vmul.f32 %v4987_v16, %v299_v42 }
 0x112   :  { %4372 = vrcp.f32 %v273_v20 }
 0x117   :  { %v4991_v21 = vpop.eup %4362 }
 0x118   :  { %v4994_v24 = vpop.eup %4364  ;;  %v316_v48 = vmul.f32 %v4991_v21, %v300_v45 }
 0x119   :  { %v4997_v25 = vpop.eup %4366  ;;  %v317_v54 = vmul.f32 %v4994_v24, %v301_v49 }
 0x11a   :  { %v5001_v30 = vpop.eup %4368  ;;  %v318_v55 = vmul.f32 %v4997_v25, %v302_v50 }
 0x11b   :  { %v5005_v31 = vpop.eup %4370  ;;  %v319_v62 = vmul.f32 %v5001_v30, %v303_v53 }
 0x11c   :  { %v5011_v36 = vpop.eup %4372  ;;  %v320_v63 = vmul.f32 %v5005_v31, %v304_v56  ;;  %v564_v56 = vlaneseq }
 0x11d   :  { %v321_v14 = vmul.f32 %v5011_v36, %v305_v0 }
 0x166   :  { %v331_v59 = vpop.permute.xlu1 %330 }
 0x167   :  { %v354_v61 = vmul.f32 %v4983_v57, %v331_v59 }
 0x169   :  { %370 = vrot.lane.b32.xlu0 %v354_v61, %s4847_s29 }
 0x16a   :  { %v337_v19 = vpop.permute.xlu1 %336 }
 0x16b   :  { %v333_v17 = vpop.permute.xlu0 %332  ;;  %v357_v28 = vmul.f32 %v4994_v24, %v337_v19 }
 0x16c   :  { %v355_v18 = vmul.f32 %v4987_v16, %v333_v17 }
 0x16e   :  { %372 = vrot.lane.b32.xlu0 %v355_v18, %s4847_s29  ;;  %v341_v26 = vpop.permute.xlu1 %340 }
 0x16f   :  { %v335_v22 = vpop.permute.xlu0 %334  ;;  %v359_v33 = vmul.f32 %v5001_v30, %v341_v26 }
 0x170   :  { %v356_v23 = vmul.f32 %v4991_v21, %v335_v22  ;;  %v5056_v22 = vpack.c.bf16 %v4905_v5, %v4900_v4 }
 0x172   :  { %374 = vrot.lane.b32.xlu1 %v356_v23, %s4847_s29  ;;  %v345_v35 = vpop.permute.xlu1 %344  ;;  %4232 = vmatpush3.bf16.msra.mxu1 %v5056_v22  ;;  %v5062_v23 = vpack.c.bf16 %v4915_v7, %v4910_v6 }
 0x173   :  { %v339_v27 = vpop.permute.xlu0 %338  ;;  %v361_v37 = vmul.f32 %v5011_v36, %v345_v35  ;;  %4233 = vmatprep.subr.bf16.mxu1 %v4844_v9 }
 0x174   :  { %v358_v29 = vmul.f32 %v4997_v25, %v339_v27 }
 0x176   :  { %376 = vrot.lane.b32.xlu1 %v357_v28, %s4847_s29  ;;  %378 = vrot.lane.b32.xlu0 %v358_v29, %s4847_s29 }
 0x177   :  { %v343_v32 = vpop.permute.xlu0 %342  ;;  %4235 = vmatpush3.bf16.msra.mxu1 %v5062_v23 }
 0x178   :  { %v360_v34 = vmul.f32 %v5005_v31, %v343_v32  ;;  %4242 = vmatprep.subr.bf16.mxu1 %v4844_v9 }
 0x17a   :  { %380 = vrot.lane.b32.xlu1 %v359_v33, %s4847_s29  ;;  %382 = vrot.lane.b32.xlu0 %v360_v34, %s4847_s29 }
 0x17e   :  { %384 = vrot.lane.b32.xlu1 %v361_v37, %s4847_s29 }
 0x1db   :  { %v371_v40 = vpop.permute.xlu0 %370 }
 0x1dc   :  { %v5019_v41 = vadd.f32 %v371_v40, %v314_v39 }
 0x1de   :  { %4374 = vtanh.f32 %v5019_v41 }
 0x1e0   :  { %v373_v46 = vpop.permute.xlu0 %372 }
 0x1e1   :  { %v5024_v47 = vadd.f32 %v373_v46, %v315_v44 }
 0x1e3   :  { %4376 = vtanh.f32 %v5024_v47 }
 0x1e4   :  { %v375_v51 = vpop.permute.xlu1 %374 }
 0x1e5   :  { %v5028_v52 = vadd.f32 %v375_v51, %v316_v48 }
 0x1e7   :  { %4378 = vtanh.f32 %v5028_v52 }
 0x1e8   :  { %v4375_v43 = vpop.eup %4374  ;;  %v377_v58 = vpop.permute.xlu1 %376 }
 0x1e9   :  { %418 = vrot.lane.b32.xlu0 %v4375_v43, %s4847_s29  ;;  %v379_v59 = vpop.permute.xlu0 %378  ;;  %v5033_v60 = vadd.f32 %v377_v58, %v317_v54 }
 0x1ea   :  { %v5035_v61 = vadd.f32 %v379_v59, %v318_v55  ;;  %v565_v59 = vshrl.u32 %v564_v56, 7 }
 0x1eb   :  { %4380 = vtanh.f32 %v5033_v60 }
 0x1ec   :  { %4382 = vtanh.f32 %v5035_v61  ;;  %v381_v1 = vpop.permute.xlu1 %380 }
 0x1ed   :  { %v383_v2 = vpop.permute.xlu0 %382  ;;  %v4377_v3 = vpop.eup %4376  ;;  %v5041_v12 = vadd.f32 %v381_v1, %v319_v62  ;;  %v5103_v62 = vld [vmem:[%s6396_s3] ss:$0 sm:$0xff] }
 0x1ee   :  { %v5043_v13 = vadd.f32 %v383_v2, %v320_v63  ;;  %420 = vrot.lane.b32.xlu0 %v4377_v3, %s4847_s29 }
 0x1ef   :  { %4384 = vtanh.f32 %v5041_v12 }
 0x1f0   :  { %4386 = vtanh.f32 %v5043_v13  ;;  %v385_v15 = vpop.permute.xlu1 %384 }
 0x1f1   :  { %v4379_v17 = vpop.eup %4378  ;;  %v5049_v18 = vadd.f32 %v385_v15, %v321_v14 }
 0x1f2   :  { %422 = vrot.lane.b32.xlu1 %v4379_v17, %s4847_s29 }
 0x1f3   :  { %4388 = vtanh.f32 %v5049_v18 }
 0x1f5   :  { %v4381_v19 = vpop.eup %4380 }
 0x1f6   :  { %v4383_v20 = vpop.eup %4382  ;;  %424 = vrot.lane.b32.xlu1 %v4381_v19, %s4847_s29 }
 0x1f7   :  { %426 = vrot.lane.b32.xlu0 %v4383_v20, %s4847_s29 }
 0x1f9   :  { %v4385_v26 = vpop.eup %4384 }
 0x1fa   :  { %v4387_v27 = vpop.eup %4386  ;;  %428 = vrot.lane.b32.xlu1 %v4385_v26, %s4847_s29 }
 0x1fb   :  { %430 = vrot.lane.b32.xlu0 %v4387_v27, %s4847_s29 }
 0x1fd   :  { %v4389_v4 = vpop.eup %4388 }
 0x1fe   :  { %432 = vrot.lane.b32.xlu1 %v4389_v4, %s4847_s29 }
 0x25b   :  { %v419_v5 = vpop.permute.xlu0 %418 }
 0x25c   :  { %v442_v33 = vmul.f32 %v4983_v57, %v419_v5 }
 0x260   :  { %v421_v28 = vpop.permute.xlu0 %420 }
 0x261   :  { %v443_v6 = vmul.f32 %v4987_v16, %v421_v28 }
 0x263   :  { %v464_v29 = vrot.slane %v443_v6, 7 }
 0x264   :  { %v423_v7 = vpop.permute.xlu1 %422 }
 0x265   :  { %v444_v32 = vmul.f32 %v4991_v21, %v423_v7  ;;  %v466_v37 = vsel %vm465_vm2, %v464_v29, %v442_v33 }
 0x267   :  { %v467_v34 = vrot.slane %v444_v32, 6  ;;  %v626_v32 = vld [vmem:[%s6393_s0 + $0x1] sm:$0x1] }
 0x268   :  { %v425_v35 = vpop.permute.xlu1 %424 }
 0x269   :  { %v445_v38 = vmul.f32 %v4994_v24, %v425_v35  ;;  %v427_v39 = vpop.permute.xlu0 %426  ;;  %v469_v16 = vsel %vm468_vm3, %v467_v34, %v466_v37  ;;  %v628_v35 = vld [vmem:[%s6393_s0 + $0x11] sm:$0x1] }
 0x26a   :  { %v446_v40 = vmul.f32 %v4997_v25, %v427_v39  ;;  %v627_v39 = vld [vmem:[%s6393_s0 + $0x9] sm:$0x1] }
 0x26b   :  { %v470_v42 = vrot.slane %v445_v38, 5 }
 0x26c   :  { %v473_v43 = vrot.slane %v446_v40, 4  ;;  %v429_v44 = vpop.permute.xlu1 %428 }
 0x26d   :  { %v472_v21 = vsel %vm471_vm4, %v470_v42, %v469_v16  ;;  %v447_v57 = vmul.f32 %v5001_v30, %v429_v44  ;;  %v431_v45 = vpop.permute.xlu0 %430  ;;  %v629_v16 = vld [vmem:[%s6393_s0 + $0x19] sm:$0x1] }
 0x26e   :  { %v448_v46 = vmul.f32 %v5005_v31, %v431_v45  ;;  %v475_v24 = vsel %vm474_vm5, %v473_v43, %v472_v21  ;;  %v630_v21 = vld [vmem:[%s6393_s0 + $0x21] sm:$0x1] }
 0x26f   :  { %v476_v48 = vrot.slane %v447_v57, 3 }
 0x270   :  { %v479_v49 = vrot.slane %v448_v46, 2  ;;  %v433_v50 = vpop.permute.xlu1 %432  ;;  %v631_v46 = vld [vmem:[%s6393_s0 + $0x29] sm:$0x1] }
 0x271   :  { %v449_v25 = vmul.f32 %v5011_v36, %v433_v50  ;;  %v478_v51 = vsel %vm477_vm6, %v476_v48, %v475_v24  ;;  %v4849_v36 = vmov 1966171168  }
 0x272   :  { %v481_v54 = vsel %vm480_vm7, %v479_v49, %v478_v51  ;;  %v562_v55 = vunpack.c.l.s4 %v4849_v36  ;;  %v632_v49 = vld [vmem:[%s6393_s0 + $0x31] sm:$0x1]  ;;  %v633_v51 = vld [vmem:[%s6393_s0 + $0x39] sm:$0x1] }
 0x273   :  { %v482_v53 = vrot.slane %v449_v25, 1 }
 0x274   :  { %v563_v58 = vunpack.c.0.s8 %v562_v55 }
 0x275   :  { %v484_v30 = vsel %vm483_vm8, %v482_v53, %v481_v54 }
 0x276   :  { %485 = vrot.lane.b32.xlu0 %v484_v30, %s4848_s12  ;;  %v5105_v63 = vsub.s32 %v563_v58, %v565_v59 }
 0x2e8   :  { %v486_v31 = vpop.permute.xlu0 %485 }
 0x2e9   :  { %4068 = vmatmul.mubr.msk.f32.vlgmr.msra.gmra.mrb[0].mxu1 %vm122_vm0, %v486_v31  ;;  %4079 = vmatmul.mubr.msk.f32.vlgmr.msra.gmra.mrb[2].mxu0 %vm122_vm0, %v486_v31 }
 0x2ea   :  { %4244 = vmatpush3.bf16.msra.mxu1 %v5056_v22  ;;  %4250 = vmatpush3.bf16.msra.mxu0 %v4917_v8 }
 0x2eb   :  { %4245 = vmatprep.subr.bf16.mxu1 %v4844_v9  ;;  %4251 = vmatprep.subr.bf16.mxu0 %v4844_v9 }
 0x2ec   :  { %4100 = vmatprep.mubr.msk.f32.mxu0 %vm4845_vm1, %v4846_v11  ;;  %4089 = vmatprep.mubr.msk.f32.mxu1 %vm4845_vm1, %v4846_v11 }
 0x2ee   :  { %4247 = vmatpush3.bf16.msra.mxu1 %v5062_v23  ;;  %4253 = vmatpush3.bf16.msra.mxu0 %v4922_v10 }
 0x2ef   :  { %4254 = vmatprep.subr.bf16.mxu1 %v4844_v9  ;;  %4260 = vmatprep.subr.bf16.mxu0 %v4844_v9 }
 0x3bc   :  { %v555_v0 = vpop.f32.mrb[0].mxu1  ;;  %v700_v1 = vpop.f32.mrb[2].mxu0 }
 0x3bd   :  { %v556_v2 = vadd.f32 %v5103_v62, %v555_v0  ;;  %v4069_v3 = vpop.f32.mrb[1].mxu1  ;;  %v4080_v14 = vpop.f32.mrb[3].mxu0  ;;  %v706_v33 = vrot.slane %v700_v1, 2  ;;  %v705_v37 = vrot.slane %v700_v1, 1  ;;  %v720_v38 = vadd.f32 %v700_v1, %v626_v32 }
 0x3be   :  { %v707_v40 = vrot.slane %v700_v1, 3  ;;  %v708_v43 = vrot.slane %v700_v1, 4  ;;  %v709_v57 = vrot.slane %v700_v1, 5  ;;  %v710_v48 = vrot.slane %v700_v1, 6 }
 0x3bf   :  { %v560_v15 = vcombine.high %v556_v2, %v556_v2  ;;  %v567_v17 = vrot.slane %v556_v2, %v5105_v63  ;;  %v722_v42 = vadd.f32 %v706_v33, %v628_v35  ;;  %v721_v44 = vadd.f32 %v705_v37, %v627_v39 }
 0x3c0   :  { %4390 = vtanh.f32 %v720_v38  ;;  %v723_v45 = vadd.f32 %v707_v40, %v629_v16  ;;  %v724_v24 = vadd.f32 %v708_v43, %v630_v21  ;;  %v711_v50 = vrot.slane %v700_v1, 7 }
 0x3c1   :  { %v574_v19 = vrot.slane %v560_v15, %v5105_v63  ;;  %v575_v20 = vcombine.high %v567_v17, %v567_v17  ;;  %v583_v26 = vrot.slane %v567_v17, %v5105_v63  ;;  %4392 = vtanh.f32 %v722_v42 }
 0x3c2   :  { %4394 = vtanh.f32 %v721_v44  ;;  %v725_v25 = vadd.f32 %v709_v57, %v631_v46  ;;  %v726_v53 = vadd.f32 %v710_v48, %v632_v49  ;;  %v727_v30 = vadd.f32 %v711_v50, %v633_v51 }
 0x3c3   :  { %v576_v27 = vcombine.high %v574_v19, %v574_v19  ;;  %v590_v4 = vrot.slane %v574_v19, %v5105_v63  ;;  %v597_v5 = vrot.slane %v575_v20, %v5105_v63  ;;  %v605_v28 = vcombine.high %v583_v26, %v583_v26  ;;  %618 = vst.msk [vmem:[%s6397_s4] sm:$0x1] %vm617_vm9, %v583_v26 }
 0x3c4   :  { %4396 = vtanh.f32 %v723_v45  ;;  %v3897_v1 = vmul.f32 -1.442695, %v720_v38  ;;  %v3899_v2 = vmul.f32 -1.442695, %v722_v42  ;;  %v3898_v3 = vmul.f32 -1.442695, %v721_v44 }
 0x3c5   :  { %v604_v6 = vrot.slane %v576_v27, %v5105_v63  ;;  %v606_v7 = vcombine.high %v590_v4, %v590_v4  ;;  %v607_v29 = vcombine.high %v597_v5, %v597_v5  ;;  %619 = vst.msk [vmem:[%s6397_s4 + $0x8] sm:$0x1] %vm617_vm9, %v597_v5  ;;  %620 = vst.msk [vmem:[%s6397_s4 + $0x10] sm:$0x1] %vm617_vm9, %v605_v28  ;;  %4398 = vtanh.f32 %v724_v24 }
 0x3c6   :  { %622 = vst.msk [vmem:[%s6397_s4 + $0x20] sm:$0x1] %vm617_vm9, %v590_v4  ;;  %4400 = vtanh.f32 %v725_v25  ;;  %v3900_v14 = vmul.f32 -1.442695, %v723_v45  ;;  %v3901_v15 = vmul.f32 -1.442695, %v724_v24 }
 0x3c7   :  { %v608_v34 = vcombine.high %v604_v6, %v604_v6  ;;  %621 = vst.msk [vmem:[%s6397_s4 + $0x18] sm:$0x1] %vm617_vm9, %v607_v29  ;;  %623 = vst.msk [vmem:[%s6397_s4 + $0x28] sm:$0x1] %vm617_vm9, %v604_v6  ;;  %4402 = vtanh.f32 %v726_v53  ;;  %v3902_v17 = vmul.f32 -1.442695, %v725_v25 }
 0x3c8   :  { %624 = vst.msk [vmem:[%s6397_s4 + $0x30] sm:$0x1] %vm617_vm9, %v606_v7  ;;  %4404 = vtanh.f32 %v727_v30  ;;  %v3903_v19 = vmul.f32 -1.442695, %v726_v53  ;;  %v3904_v26 = vmul.f32 -1.442695, %v727_v30 }
 0x3c9   :  { %625 = vst.msk [vmem:[%s6397_s4 + $0x38] sm:$0x1] %vm617_vm9, %v608_v34  ;;  %4406 = vpow2.f32 %v3897_v1 }
 0x3ca   :  { %v4391_v54 = vpop.eup %4390  ;;  %4408 = vpow2.f32 %v3899_v2 }
 0x3cb   :  { %800 = vrot.lane.b32.xlu1 %v4391_v54, %s4847_s29  ;;  %v4393_v31 = vpop.eup %4392  ;;  %4410 = vpow2.f32 %v3898_v3 }
 0x3cc   :  { %804 = vrot.lane.b32.xlu0 %v4393_v31, %s4847_s29  ;;  %v4395_v36 = vpop.eup %4394  ;;  %4412 = vpow2.f32 %v3900_v14 }
 0x3cd   :  { %4414 = vpow2.f32 %v3901_v15 }
 0x3ce   :  { %v4397_v55 = vpop.eup %4396  ;;  %4416 = vpow2.f32 %v3902_v17 }
 0x3cf   :  { %802 = vrot.lane.b32.xlu1 %v4395_v36, %s4847_s29  ;;  %v4399_v56 = vpop.eup %4398  ;;  %4418 = vpow2.f32 %v3903_v19 }
 0x3d0   :  { %806 = vrot.lane.b32.xlu0 %v4397_v55, %s4847_s29  ;;  %v4401_v58 = vpop.eup %4400  ;;  %4420 = vpow2.f32 %v3904_v26 }
 0x3d1   :  { %v4403_v59 = vpop.eup %4402 }
 0x3d2   :  { %v4405_v0 = vpop.eup %4404 }
 0x3d3   :  { %808 = vrot.lane.b32.xlu1 %v4399_v56, %s4847_s29  ;;  %v4407_v20 = vpop.eup %4406 }
 0x3d4   :  { %810 = vrot.lane.b32.xlu0 %v4401_v58, %s4847_s29  ;;  %v4409_v27 = vpop.eup %4408  ;;  %v752_v4 = vadd.f32 1.0, %v4407_v20 }
 0x3d5   :  { %v4411_v5 = vpop.eup %4410  ;;  %v754_v28 = vadd.f32 1.0, %v4409_v27 }
 0x3d6   :  { %v4413_v6 = vpop.eup %4412  ;;  %4422 = vrcp.f32 %v752_v4  ;;  %v753_v7 = vadd.f32 1.0, %v4411_v5 }
 0x3d7   :  { %812 = vrot.lane.b32.xlu1 %v4403_v59, %s4847_s29  ;;  %v4415_v29 = vpop.eup %4414  ;;  %4424 = vrcp.f32 %v754_v28  ;;  %v755_v32 = vadd.f32 1.0, %v4413_v6 }
 0x3d8   :  { %814 = vrot.lane.b32.xlu0 %v4405_v0, %s4847_s29  ;;  %v4417_v33 = vpop.eup %4416  ;;  %4426 = vrcp.f32 %v753_v7  ;;  %v756_v34 = vadd.f32 1.0, %v4415_v29 }
 0x3d9   :  { %v4419_v35 = vpop.eup %4418  ;;  %4428 = vrcp.f32 %v755_v32  ;;  %v757_v37 = vadd.f32 1.0, %v4417_v33 }
 0x3da   :  { %v4421_v38 = vpop.eup %4420  ;;  %4430 = vrcp.f32 %v756_v34  ;;  %v758_v39 = vadd.f32 1.0, %v4419_v35 }
 0x3db   :  { %4432 = vrcp.f32 %v757_v37  ;;  %v759_v16 = vadd.f32 1.0, %v4421_v38 }
 0x3dc   :  { %4434 = vrcp.f32 %v758_v39 }
 0x3dd   :  { %4436 = vrcp.f32 %v759_v16 }
 0x3e0   :  { %v5178_v40 = vpop.eup %4422 }
 0x3e1   :  { %v5181_v44 = vpop.eup %4424  ;;  %v784_v1 = vmul.f32 %v5178_v40, %v5019_v41 }
 0x3e2   :  { %v5185_v45 = vpop.eup %4426  ;;  %v786_v14 = vmul.f32 %v5181_v44, %v5028_v52 }
 0x3e3   :  { %v5189_v24 = vpop.eup %4428  ;;  %v785_v19 = vmul.f32 %v5185_v45, %v5024_v47 }
 0x3e4   :  { %v5193_v25 = vpop.eup %4430  ;;  %v787_v41 = vmul.f32 %v5189_v24, %v5033_v60 }
 0x3e5   :  { %v5197_v54 = vpop.eup %4432  ;;  %v788_v4 = vmul.f32 %v5193_v25, %v5035_v61 }
 0x3e6   :  { %v5201_v36 = vpop.eup %4434  ;;  %v789_v28 = vmul.f32 %v5197_v54, %v5041_v12 }
 0x3e7   :  { %v5205_v58 = vpop.eup %4436  ;;  %v790_v7 = vmul.f32 %v5201_v36, %v5043_v13 }
 0x3e8   :  { %v791_v33 = vmul.f32 %v5205_v58, %v5049_v18 }
 0x43d   :  { %v801_v42 = vpop.permute.xlu1 %800 }
 0x43e   :  { %v824_v43 = vmul.f32 %v5178_v40, %v801_v42  ;;  %v805_v21 = vpop.permute.xlu0 %804 }
 0x43f   :  { %v826_v57 = vmul.f32 %v5181_v44, %v805_v21 }
 0x440   :  { %840 = vrot.lane.b32.xlu1 %v824_v43, %s4847_s29 }
 0x441   :  { %v803_v46 = vpop.permute.xlu1 %802  ;;  %844 = vrot.lane.b32.xlu0 %v826_v57, %s4847_s29 }
 0x442   :  { %v825_v48 = vmul.f32 %v5185_v45, %v803_v46  ;;  %v807_v49 = vpop.permute.xlu0 %806 }
 0x443   :  { %v827_v50 = vmul.f32 %v5189_v24, %v807_v49 }
 0x444   :  { %842 = vrot.lane.b32.xlu1 %v825_v48, %s4847_s29 }
 0x445   :  { %v809_v51 = vpop.permute.xlu1 %808  ;;  %846 = vrot.lane.b32.xlu0 %v827_v50, %s4847_s29 }
 0x446   :  { %v828_v53 = vmul.f32 %v5193_v25, %v809_v51  ;;  %v811_v30 = vpop.permute.xlu0 %810 }
 0x447   :  { %v829_v31 = vmul.f32 %v5197_v54, %v811_v30 }
 0x448   :  { %848 = vrot.lane.b32.xlu1 %v828_v53, %s4847_s29 }
 0x449   :  { %v813_v55 = vpop.permute.xlu1 %812  ;;  %850 = vrot.lane.b32.xlu0 %v829_v31, %s4847_s29 }
 0x44a   :  { %v830_v56 = vmul.f32 %v5201_v36, %v813_v55  ;;  %v815_v59 = vpop.permute.xlu0 %814 }
 0x44b   :  { %v831_v0 = vmul.f32 %v5205_v58, %v815_v59 }
 0x44c   :  { %852 = vrot.lane.b32.xlu1 %v830_v56, %s4847_s29 }
 0x44d   :  { %854 = vrot.lane.b32.xlu0 %v831_v0, %s4847_s29 }
 0x4b2   :  { %v841_v2 = vpop.permute.xlu1 %840 }
 0x4b3   :  { %v5212_v3 = vadd.f32 %v841_v2, %v784_v1  ;;  %v845_v15 = vpop.permute.xlu0 %844 }
 0x4b4   :  { %v5217_v17 = vadd.f32 %v845_v15, %v786_v14 }
 0x4b5   :  { %4438 = vtanh.f32 %v5212_v3 }
 0x4b6   :  { %v843_v20 = vpop.permute.xlu1 %842  ;;  %4440 = vtanh.f32 %v5217_v17 }
 0x4b7   :  { %v5222_v26 = vadd.f32 %v843_v20, %v785_v19  ;;  %v847_v27 = vpop.permute.xlu0 %846 }
 0x4b8   :  { %v5227_v52 = vadd.f32 %v847_v27, %v787_v41 }
 0x4b9   :  { %4442 = vtanh.f32 %v5222_v26 }
 0x4ba   :  { %v849_v5 = vpop.permute.xlu1 %848  ;;  %4444 = vtanh.f32 %v5227_v52 }
 0x4bb   :  { %v5232_v47 = vadd.f32 %v849_v5, %v788_v4  ;;  %v851_v6 = vpop.permute.xlu0 %850 }
 0x4bc   :  { %v5237_v60 = vadd.f32 %v851_v6, %v789_v28 }
 0x4bd   :  { %4446 = vtanh.f32 %v5232_v47 }
 0x4be   :  { %v853_v29 = vpop.permute.xlu1 %852  ;;  %4448 = vtanh.f32 %v5237_v60 }
 0x4bf   :  { %v4439_v32 = vpop.eup %4438  ;;  %v5242_v61 = vadd.f32 %v853_v29, %v790_v7  ;;  %v855_v34 = vpop.permute.xlu0 %854 }
 0x4c0   :  { %888 = vrot.lane.b32.xlu1 %v4439_v32, %s4847_s29  ;;  %v4441_v12 = vpop.eup %4440  ;;  %v5248_v35 = vadd.f32 %v855_v34, %v791_v33 }
 0x4c1   :  { %4450 = vtanh.f32 %v5242_v61  ;;  %892 = vrot.lane.b32.xlu0 %v4441_v12, %s4847_s29 }
 0x4c2   :  { %4452 = vtanh.f32 %v5248_v35 }
 0x4c3   :  { %v4443_v13 = vpop.eup %4442 }
 0x4c4   :  { %890 = vrot.lane.b32.xlu1 %v4443_v13, %s4847_s29  ;;  %v4445_v37 = vpop.eup %4444 }
 0x4c5   :  { %894 = vrot.lane.b32.xlu0 %v4445_v37, %s4847_s29 }
 0x4c7   :  { %v4447_v38 = vpop.eup %4446 }
 0x4c8   :  { %896 = vrot.lane.b32.xlu1 %v4447_v38, %s4847_s29  ;;  %v4449_v18 = vpop.eup %4448 }
 0x4c9   :  { %898 = vrot.lane.b32.xlu0 %v4449_v18, %s4847_s29 }
 0x4cb   :  { %v4451_v39 = vpop.eup %4450 }
 0x4cc   :  { %900 = vrot.lane.b32.xlu1 %v4451_v39, %s4847_s29  ;;  %v4453_v42 = vpop.eup %4452 }
 0x4cd   :  { %902 = vrot.lane.b32.xlu0 %v4453_v42, %s4847_s29 }
 0x532   :  { %v889_v16 = vpop.permute.xlu1 %888 }
 0x533   :  { %v893_v43 = vpop.permute.xlu0 %892  ;;  %v912_v49 = vmul.f32 %v5178_v40, %v889_v16  ;;  %v1082_v16 = vld [vmem:[%s6393_s0 + $0x2] sm:$0x1] }
 0x534   :  { %v914_v21 = vmul.f32 %v5181_v44, %v893_v43 }
 0x536   :  { %v891_v57 = vpop.permute.xlu1 %890  ;;  %v930_v53 = vrot.slane %v914_v21, 6 }
 0x537   :  { %v913_v46 = vmul.f32 %v5185_v45, %v891_v57  ;;  %v895_v48 = vpop.permute.xlu0 %894  ;;  %v1084_v57 = vld [vmem:[%s6393_s0 + $0x12] sm:$0x1] }
 0x538   :  { %v915_v51 = vmul.f32 %v5189_v24, %v895_v48 }
 0x539   :  { %v928_v50 = vrot.slane %v913_v46, 7 }
 0x53a   :  { %v897_v30 = vpop.permute.xlu1 %896  ;;  %v932_v55 = vrot.slane %v915_v51, 5 }
 0x53b   :  { %v929_v31 = vsel %vm465_vm2, %v928_v50, %v912_v49  ;;  %v916_v56 = vmul.f32 %v5193_v25, %v897_v30  ;;  %v899_v0 = vpop.permute.xlu0 %898  ;;  %v1083_v49 = vld [vmem:[%s6393_s0 + $0xa] sm:$0x1] }
 0x53c   :  { %v931_v59 = vsel %vm468_vm3, %v930_v53, %v929_v31  ;;  %v917_v45 = vmul.f32 %v5197_v54, %v899_v0  ;;  %v1085_v53 = vld [vmem:[%s6393_s0 + $0x1a] sm:$0x1]  ;;  %v1087_v0 = vld [vmem:[%s6393_s0 + $0x2a] sm:$0x1] }
 0x53d   :  { %v933_v44 = vsel %vm471_vm4, %v932_v55, %v931_v59  ;;  %v934_v1 = vrot.slane %v916_v56, 4  ;;  %v1086_v55 = vld [vmem:[%s6393_s0 + $0x22] sm:$0x1] }
 0x53e   :  { %v901_v2 = vpop.permute.xlu1 %900  ;;  %v936_v14 = vrot.slane %v917_v45, 3  ;;  %v1088_v45 = vld [vmem:[%s6393_s0 + $0x32] sm:$0x1] }
 0x53f   :  { %v935_v40 = vsel %vm474_vm5, %v934_v1, %v933_v44  ;;  %v918_v24 = vmul.f32 %v5201_v36, %v901_v2  ;;  %v903_v15 = vpop.permute.xlu0 %902 }
 0x540   :  { %v919_v20 = vmul.f32 %v5205_v58, %v903_v15  ;;  %v937_v25 = vsel %vm477_vm6, %v936_v14, %v935_v40  ;;  %v1089_v14 = vld [vmem:[%s6393_s0 + $0x3a] sm:$0x1] }
 0x541   :  { %v938_v19 = vrot.slane %v918_v24, 2 }
 0x542   :  { %v940_v41 = vrot.slane %v919_v20, 1 }
 0x543   :  { %v939_v27 = vsel %vm480_vm7, %v938_v19, %v937_v25 }
 0x544   :  { %v941_v4 = vsel %vm483_vm8, %v940_v41, %v939_v27 }
 0x545   :  { %942 = vrot.lane.b32.xlu1 %v941_v4, %s4848_s12 }
 0x5b7   :  { %v943_v54 = vpop.permute.xlu1 %942 }
 0x5b8   :  { %4090 = vmatmul.mubr.msk.f32.vlgmr.msra.gmra.mrb[2].mxu1 %vm122_vm0, %v943_v54  ;;  %4101 = vmatmul.mubr.msk.f32.vlgmr.msra.gmra.mrb[4].mxu0 %vm122_vm0, %v943_v54 }
 0x5b9   :  { %4256 = vmatpush3.bf16.msra.mxu1 %v5056_v22  ;;  %4262 = vmatpush3.bf16.msra.mxu0 %v4917_v8 }
 0x5ba   :  { %4257 = vmatprep.subr.bf16.mxu1 %v4844_v9  ;;  %4263 = vmatprep.subr.bf16.mxu0 %v4844_v9 }
 0x5bb   :  { %4122 = vmatprep.mubr.msk.f32.mxu0 %vm4845_vm1, %v4846_v11  ;;  %4111 = vmatprep.mubr.msk.f32.mxu1 %vm4845_vm1, %v4846_v11 }
 0x5bd   :  { %4259 = vmatpush3.bf16.msra.mxu1 %v5062_v23  ;;  %4265 = vmatpush3.bf16.msra.mxu0 %v4922_v10 }
 0x5be   :  { %4266 = vmatprep.subr.bf16.mxu1 %v4844_v9  ;;  %4272 = vmatprep.subr.bf16.mxu0 %v4844_v9 }
 0x68b   :  { %v1012_v36 = vpop.f32.mrb[2].mxu1  ;;  %v1156_v58 = vpop.f32.mrb[4].mxu0 }
 0x68c   :  { %v1013_v5 = vadd.f32 %v5103_v62, %v1012_v36  ;;  %v4091_v28 = vpop.f32.mrb[3].mxu1  ;;  %v4102_v6 = vpop.f32.mrb[5].mxu0  ;;  %v1162_v43 = vrot.slane %v1156_v58, 2  ;;  %v1161_v46 = vrot.slane %v1156_v58, 1  ;;  %v1176_v48 = vadd.f32 %v1156_v58, %v1082_v16 }
 0x68d   :  { %v1163_v50 = vrot.slane %v1156_v58, 3  ;;  %v1164_v30 = vrot.slane %v1156_v58, 4  ;;  %v1165_v56 = vrot.slane %v1156_v58, 5  ;;  %v1166_v44 = vrot.slane %v1156_v58, 6 }
 0x68e   :  { %v1017_v7 = vcombine.high %v1013_v5, %v1013_v5  ;;  %v1024_v29 = vrot.slane %v1013_v5, %v5105_v63  ;;  %v1178_v51 = vadd.f32 %v1162_v43, %v1084_v57  ;;  %v1177_v31 = vadd.f32 %v1161_v46, %v1083_v49 }
 0x68f   :  { %4454 = vtanh.f32 %v1176_v48  ;;  %v1179_v59 = vadd.f32 %v1163_v50, %v1085_v53  ;;  %v1180_v1 = vadd.f32 %v1164_v30, %v1086_v55  ;;  %v1167_v2 = vrot.slane %v1156_v58, 7 }
 0x690   :  { %v1031_v32 = vrot.slane %v1017_v7, %v5105_v63  ;;  %v1032_v33 = vcombine.high %v1024_v29, %v1024_v29  ;;  %v1040_v34 = vrot.slane %v1024_v29, %v5105_v63  ;;  %4456 = vtanh.f32 %v1178_v51 }
 0x691   :  { %4458 = vtanh.f32 %v1177_v31  ;;  %v1181_v40 = vadd.f32 %v1165_v56, %v1087_v0  ;;  %v1182_v24 = vadd.f32 %v1166_v44, %v1088_v45  ;;  %v1183_v19 = vadd.f32 %v1167_v2, %v1089_v14 }
 0x692   :  { %v1033_v12 = vcombine.high %v1031_v32, %v1031_v32  ;;  %v1047_v13 = vrot.slane %v1031_v32, %v5105_v63  ;;  %v1054_v37 = vrot.slane %v1032_v33, %v5105_v63  ;;  %v1062_v38 = vcombine.high %v1040_v34, %v1040_v34  ;;  %1074 = vst.msk [vmem:[%s6397_s4 + $0x1] sm:$0x1] %vm617_vm9, %v1040_v34 }
 0x693   :  { %4460 = vtanh.f32 %v1179_v59  ;;  %v3907_v58 = vmul.f32 -1.442695, %v1176_v48  ;;  %v3909_v5 = vmul.f32 -1.442695, %v1178_v51  ;;  %v3908_v28 = vmul.f32 -1.442695, %v1177_v31 }
 0x694   :  { %v1061_v18 = vrot.slane %v1033_v12, %v5105_v63  ;;  %v1063_v39 = vcombine.high %v1047_v13, %v1047_v13  ;;  %v1064_v42 = vcombine.high %v1054_v37, %v1054_v37  ;;  %1075 = vst.msk [vmem:[%s6397_s4 + $0x9] sm:$0x1] %vm617_vm9, %v1054_v37  ;;  %1076 = vst.msk [vmem:[%s6397_s4 + $0x11] sm:$0x1] %vm617_vm9, %v1062_v38  ;;  %4462 = vtanh.f32 %v1180_v1 }
 0x695   :  { %1078 = vst.msk [vmem:[%s6397_s4 + $0x21] sm:$0x1] %vm617_vm9, %v1047_v13  ;;  %4464 = vtanh.f32 %v1181_v40  ;;  %v3910_v6 = vmul.f32 -1.442695, %v1179_v59  ;;  %v3911_v7 = vmul.f32 -1.442695, %v1180_v1 }
 0x696   :  { %v1065_v21 = vcombine.high %v1061_v18, %v1061_v18  ;;  %1077 = vst.msk [vmem:[%s6397_s4 + $0x19] sm:$0x1] %vm617_vm9, %v1064_v42  ;;  %1079 = vst.msk [vmem:[%s6397_s4 + $0x29] sm:$0x1] %vm617_vm9, %v1061_v18  ;;  %4466 = vtanh.f32 %v1182_v24  ;;  %v3912_v29 = vmul.f32 -1.442695, %v1181_v40 }
 0x697   :  { %1080 = vst.msk [vmem:[%s6397_s4 + $0x31] sm:$0x1] %vm617_vm9, %v1063_v39  ;;  %4468 = vtanh.f32 %v1183_v19  ;;  %v3913_v32 = vmul.f32 -1.442695, %v1182_v24  ;;  %v3914_v34 = vmul.f32 -1.442695, %v1183_v19 }
 0x698   :  { %1081 = vst.msk [vmem:[%s6397_s4 + $0x39] sm:$0x1] %vm617_vm9, %v1065_v21  ;;  %4470 = vpow2.f32 %v3907_v58 }
 0x699   :  { %v4455_v15 = vpop.eup %4454  ;;  %4472 = vpow2.f32 %v3909_v5 }
 0x69a   :  { %1256 = vrot.lane.b32.xlu0 %v4455_v15, %s4847_s29  ;;  %v4457_v20 = vpop.eup %4456  ;;  %4474 = vpow2.f32 %v3908_v28 }
 0x69b   :  { %1260 = vrot.lane.b32.xlu1 %v4457_v20, %s4847_s29  ;;  %v4459_v25 = vpop.eup %4458  ;;  %4476 = vpow2.f32 %v3910_v6 }
 0x69c   :  { %4478 = vpow2.f32 %v3911_v7 }
 0x69d   :  { %v4461_v41 = vpop.eup %4460  ;;  %4480 = vpow2.f32 %v3912_v29 }
 0x69e   :  { %1258 = vrot.lane.b32.xlu0 %v4459_v25, %s4847_s29  ;;  %v4463_v27 = vpop.eup %4462  ;;  %4482 = vpow2.f32 %v3913_v32 }
 0x69f   :  { %1262 = vrot.lane.b32.xlu1 %v4461_v41, %s4847_s29  ;;  %v4465_v4 = vpop.eup %4464  ;;  %4484 = vpow2.f32 %v3914_v34 }
 0x6a0   :  { %v4467_v54 = vpop.eup %4466 }
 0x6a1   :  { %v4469_v36 = vpop.eup %4468 }
 0x6a2   :  { %1264 = vrot.lane.b32.xlu0 %v4463_v27, %s4847_s29  ;;  %v4471_v33 = vpop.eup %4470 }
 0x6a3   :  { %1266 = vrot.lane.b32.xlu1 %v4465_v4, %s4847_s29  ;;  %v4473_v12 = vpop.eup %4472  ;;  %v1208_v13 = vadd.f32 1.0, %v4471_v33 }
 0x6a4   :  { %v4475_v37 = vpop.eup %4474  ;;  %v1210_v38 = vadd.f32 1.0, %v4473_v12 }
 0x6a5   :  { %v4477_v18 = vpop.eup %4476  ;;  %4486 = vrcp.f32 %v1208_v13  ;;  %v1209_v39 = vadd.f32 1.0, %v4475_v37 }
 0x6a6   :  { %1268 = vrot.lane.b32.xlu0 %v4467_v54, %s4847_s29  ;;  %v4479_v42 = vpop.eup %4478  ;;  %4488 = vrcp.f32 %v1210_v38  ;;  %v1211_v16 = vadd.f32 1.0, %v4477_v18 }
 0x6a7   :  { %1270 = vrot.lane.b32.xlu1 %v4469_v36, %s4847_s29  ;;  %v4481_v43 = vpop.eup %4480  ;;  %4490 = vrcp.f32 %v1209_v39  ;;  %v1212_v21 = vadd.f32 1.0, %v4479_v42 }
 0x6a8   :  { %v4483_v57 = vpop.eup %4482  ;;  %4492 = vrcp.f32 %v1211_v16  ;;  %v1213_v46 = vadd.f32 1.0, %v4481_v43 }
 0x6a9   :  { %v4485_v48 = vpop.eup %4484  ;;  %4494 = vrcp.f32 %v1212_v21  ;;  %v1214_v49 = vadd.f32 1.0, %v4483_v57 }
 0x6aa   :  { %4496 = vrcp.f32 %v1213_v46  ;;  %v1215_v53 = vadd.f32 1.0, %v4485_v48 }
 0x6ab   :  { %4498 = vrcp.f32 %v1214_v49 }
 0x6ac   :  { %4500 = vrcp.f32 %v1215_v53 }
 0x6af   :  { %v5359_v50 = vpop.eup %4486 }
 0x6b0   :  { %v5362_v31 = vpop.eup %4488  ;;  %v1240_v58 = vmul.f32 %v5359_v50, %v5212_v3 }
 0x6b1   :  { %v5366_v59 = vpop.eup %4490  ;;  %v1242_v6 = vmul.f32 %v5362_v31, %v5217_v17 }
 0x6b2   :  { %v5370_v1 = vpop.eup %4492  ;;  %v1241_v32 = vmul.f32 %v5366_v59, %v5222_v26 }
 0x6b3   :  { %v5374_v40 = vpop.eup %4494  ;;  %v1243_v3 = vmul.f32 %v5370_v1, %v5227_v52 }
 0x6b4   :  { %v5378_v15 = vpop.eup %4496  ;;  %v1244_v13 = vmul.f32 %v5374_v40, %v5232_v47 }
 0x6b5   :  { %v5382_v25 = vpop.eup %4498  ;;  %v1245_v38 = vmul.f32 %v5378_v15, %v5237_v60 }
 0x6b6   :  { %v5386_v4 = vpop.eup %4500  ;;  %v1246_v39 = vmul.f32 %v5382_v25, %v5242_v61 }
 0x6b7   :  { %v1247_v43 = vmul.f32 %v5386_v4, %v5248_v35 }
 0x70c   :  { %v1257_v51 = vpop.permute.xlu0 %1256 }
 0x70d   :  { %v1280_v30 = vmul.f32 %v5359_v50, %v1257_v51  ;;  %v1261_v55 = vpop.permute.xlu1 %1260 }
 0x70e   :  { %v1282_v56 = vmul.f32 %v5362_v31, %v1261_v55 }
 0x70f   :  { %1296 = vrot.lane.b32.xlu0 %v1280_v30, %s4847_s29 }
 0x710   :  { %v1259_v0 = vpop.permute.xlu0 %1258  ;;  %1300 = vrot.lane.b32.xlu1 %v1282_v56, %s4847_s29 }
 0x711   :  { %v1281_v44 = vmul.f32 %v5366_v59, %v1259_v0  ;;  %v1263_v45 = vpop.permute.xlu1 %1262 }
 0x712   :  { %v1283_v2 = vmul.f32 %v5370_v1, %v1263_v45 }
 0x713   :  { %1298 = vrot.lane.b32.xlu0 %v1281_v44, %s4847_s29 }
 0x714   :  { %v1265_v14 = vpop.permute.xlu0 %1264  ;;  %1302 = vrot.lane.b32.xlu1 %v1283_v2, %s4847_s29 }
 0x715   :  { %v1284_v24 = vmul.f32 %v5374_v40, %v1265_v14  ;;  %v1267_v19 = vpop.permute.xlu1 %1266 }
 0x716   :  { %v1285_v20 = vmul.f32 %v5378_v15, %v1267_v19 }
 0x717   :  { %1304 = vrot.lane.b32.xlu0 %v1284_v24, %s4847_s29 }
 0x718   :  { %v1269_v41 = vpop.permute.xlu0 %1268  ;;  %1306 = vrot.lane.b32.xlu1 %v1285_v20, %s4847_s29 }
 0x719   :  { %v1286_v27 = vmul.f32 %v5382_v25, %v1269_v41  ;;  %v1271_v54 = vpop.permute.xlu1 %1270 }
 0x71a   :  { %v1287_v36 = vmul.f32 %v5386_v4, %v1271_v54 }
 0x71b   :  { %1308 = vrot.lane.b32.xlu0 %v1286_v27, %s4847_s29 }
 0x71c   :  { %1310 = vrot.lane.b32.xlu1 %v1287_v36, %s4847_s29 }
 0x781   :  { %v1297_v5 = vpop.permute.xlu0 %1296 }
 0x782   :  { %v5393_v28 = vadd.f32 %v1297_v5, %v1240_v58  ;;  %v1301_v7 = vpop.permute.xlu1 %1300 }
 0x783   :  { %v5398_v29 = vadd.f32 %v1301_v7, %v1242_v6 }
 0x784   :  { %4502 = vtanh.f32 %v5393_v28 }
 0x785   :  { %v1299_v33 = vpop.permute.xlu0 %1298  ;;  %4504 = vtanh.f32 %v5398_v29 }
 0x786   :  { %v5403_v34 = vadd.f32 %v1299_v33, %v1241_v32  ;;  %v1303_v12 = vpop.permute.xlu1 %1302 }
 0x787   :  { %v5408_v17 = vadd.f32 %v1303_v12, %v1243_v3 }
 0x788   :  { %4506 = vtanh.f32 %v5403_v34 }
 0x789   :  { %v1305_v37 = vpop.permute.xlu0 %1304  ;;  %4508 = vtanh.f32 %v5408_v17 }
 0x78a   :  { %v5413_v26 = vadd.f32 %v1305_v37, %v1244_v13  ;;  %v1307_v18 = vpop.permute.xlu1 %1306 }
 0x78b   :  { %v5418_v52 = vadd.f32 %v1307_v18, %v1245_v38 }
 0x78c   :  { %4510 = vtanh.f32 %v5413_v26 }
 0x78d   :  { %v1309_v42 = vpop.permute.xlu0 %1308  ;;  %4512 = vtanh.f32 %v5418_v52 }
 0x78e   :  { %v4503_v16 = vpop.eup %4502  ;;  %v5423_v47 = vadd.f32 %v1309_v42, %v1246_v39  ;;  %v1311_v21 = vpop.permute.xlu1 %1310 }
 0x78f   :  { %1344 = vrot.lane.b32.xlu0 %v4503_v16, %s4847_s29  ;;  %v4505_v60 = vpop.eup %4504  ;;  %v5429_v57 = vadd.f32 %v1311_v21, %v1247_v43 }
 0x790   :  { %4514 = vtanh.f32 %v5423_v47  ;;  %1348 = vrot.lane.b32.xlu1 %v4505_v60, %s4847_s29 }
 0x791   :  { %4516 = vtanh.f32 %v5429_v57 }
 0x792   :  { %v4507_v61 = vpop.eup %4506 }
 0x793   :  { %1346 = vrot.lane.b32.xlu0 %v4507_v61, %s4847_s29  ;;  %v4509_v46 = vpop.eup %4508 }
 0x794   :  { %1350 = vrot.lane.b32.xlu1 %v4509_v46, %s4847_s29 }
 0x796   :  { %v4511_v48 = vpop.eup %4510 }
 0x797   :  { %1352 = vrot.lane.b32.xlu0 %v4511_v48, %s4847_s29  ;;  %v4513_v35 = vpop.eup %4512 }
 0x798   :  { %1354 = vrot.lane.b32.xlu1 %v4513_v35, %s4847_s29 }
 0x79a   :  { %v4515_v49 = vpop.eup %4514 }
 0x79b   :  { %1356 = vrot.lane.b32.xlu0 %v4515_v49, %s4847_s29  ;;  %v4517_v51 = vpop.eup %4516 }
 0x79c   :  { %1358 = vrot.lane.b32.xlu1 %v4517_v51, %s4847_s29  ;;  %v1538_v51 = vld [vmem:[%s6393_s0 + $0x3] sm:$0x1] }
 0x801   :  { %v1345_v53 = vpop.permute.xlu0 %1344 }
 0x802   :  { %v1349_v30 = vpop.permute.xlu1 %1348  ;;  %v1368_v45 = vmul.f32 %v5359_v50, %v1345_v53 }
 0x803   :  { %v1370_v55 = vmul.f32 %v5362_v31, %v1349_v30 }
 0x805   :  { %v1347_v56 = vpop.permute.xlu0 %1346  ;;  %v1386_v24 = vrot.slane %v1370_v55, 6  ;;  %v1540_v55 = vld [vmem:[%s6393_s0 + $0x13] sm:$0x1] }
 0x806   :  { %v1369_v0 = vmul.f32 %v5366_v59, %v1347_v56  ;;  %v1351_v44 = vpop.permute.xlu1 %1350 }
 0x807   :  { %v1371_v14 = vmul.f32 %v5370_v1, %v1351_v44  ;;  %v1539_v44 = vld [vmem:[%s6393_s0 + $0xb] sm:$0x1] }
 0x808   :  { %v1384_v2 = vrot.slane %v1369_v0, 7 }
 0x809   :  { %v1353_v19 = vpop.permute.xlu0 %1352  ;;  %v1388_v41 = vrot.slane %v1371_v14, 5  ;;  %v1541_v14 = vld [vmem:[%s6393_s0 + $0x1b] sm:$0x1] }
 0x80a   :  { %v1385_v20 = vsel %vm465_vm2, %v1384_v2, %v1368_v45  ;;  %v1372_v27 = vmul.f32 %v5374_v40, %v1353_v19  ;;  %v1355_v36 = vpop.permute.xlu1 %1354 }
 0x80b   :  { %v1387_v54 = vsel %vm468_vm3, %v1386_v24, %v1385_v20  ;;  %v1373_v59 = vmul.f32 %v5378_v15, %v1355_v36  ;;  %v1542_v20 = vld [vmem:[%s6393_s0 + $0x23] sm:$0x1] }
 0x80c   :  { %v1389_v31 = vsel %vm471_vm4, %v1388_v41, %v1387_v54  ;;  %v1390_v58 = vrot.slane %v1372_v27, 4  ;;  %v1543_v54 = vld [vmem:[%s6393_s0 + $0x2b] sm:$0x1] }
 0x80d   :  { %v1357_v5 = vpop.permute.xlu0 %1356  ;;  %v1392_v6 = vrot.slane %v1373_v59, 3 }
 0x80e   :  { %v1391_v50 = vsel %vm474_vm5, %v1390_v58, %v1389_v31  ;;  %v1374_v1 = vmul.f32 %v5382_v25, %v1357_v5  ;;  %v1359_v7 = vpop.permute.xlu1 %1358  ;;  %v1544_v58 = vld [vmem:[%s6393_s0 + $0x33] sm:$0x1] }
 0x80f   :  { %v1375_v33 = vmul.f32 %v5386_v4, %v1359_v7  ;;  %v1393_v40 = vsel %vm477_vm6, %v1392_v6, %v1391_v50  ;;  %v1545_v50 = vld [vmem:[%s6393_s0 + $0x3b] sm:$0x1] }
 0x810   :  { %v1394_v32 = vrot.slane %v1374_v1, 2 }
 0x811   :  { %v1396_v3 = vrot.slane %v1375_v33, 1 }
 0x812   :  { %v1395_v12 = vsel %vm480_vm7, %v1394_v32, %v1393_v40 }
 0x813   :  { %v1397_v13 = vsel %vm483_vm8, %v1396_v3, %v1395_v12 }
 0x814   :  { %1398 = vrot.lane.b32.xlu0 %v1397_v13, %s4848_s12 }
 0x886   :  { %v1399_v15 = vpop.permute.xlu0 %1398 }
 0x887   :  { %4112 = vmatmul.mubr.msk.f32.vlgmr.msra.gmra.mrb[4].mxu1 %vm122_vm0, %v1399_v15  ;;  %4123 = vmatmul.mubr.msk.f32.vlgmr.msra.gmra.mrb[6].mxu0 %vm122_vm0, %v1399_v15 }
 0x888   :  { %4268 = vmatpush3.bf16.msra.mxu1 %v5056_v22  ;;  %4274 = vmatpush3.bf16.msra.mxu0 %v4917_v8 }
 0x889   :  { %4269 = vmatprep.subr.bf16.mxu1 %v4844_v9  ;;  %4275 = vmatprep.subr.bf16.mxu0 %v4844_v9 }
 0x88a   :  { %4144 = vmatprep.mubr.msk.f32.mxu0 %vm4845_vm1, %v4846_v11  ;;  %4133 = vmatprep.mubr.msk.f32.mxu1 %vm4845_vm1, %v4846_v11 }
 0x88c   :  { %4271 = vmatpush3.bf16.msra.mxu1 %v5062_v23  ;;  %4277 = vmatpush3.bf16.msra.mxu0 %v4922_v10 }
 0x88d   :  { %4278 = vmatprep.subr.bf16.mxu1 %v4844_v9  ;;  %4284 = vmatprep.subr.bf16.mxu0 %v4844_v9 }
 0x95a   :  { %v1468_v25 = vpop.f32.mrb[4].mxu1  ;;  %v1612_v4 = vpop.f32.mrb[6].mxu0 }
 0x95b   :  { %v1469_v37 = vadd.f32 %v5103_v62, %v1468_v25  ;;  %v4113_v38 = vpop.f32.mrb[5].mxu1  ;;  %v4124_v18 = vpop.f32.mrb[7].mxu0  ;;  %v1618_v53 = vrot.slane %v1612_v4, 2  ;;  %v1617_v56 = vrot.slane %v1612_v4, 1  ;;  %v1632_v0 = vadd.f32 %v1612_v4, %v1538_v51 }
 0x95c   :  { %v1619_v45 = vrot.slane %v1612_v4, 3  ;;  %v1620_v24 = vrot.slane %v1612_v4, 4  ;;  %v1621_v41 = vrot.slane %v1612_v4, 5  ;;  %v1622_v36 = vrot.slane %v1612_v4, 6 }
 0x95d   :  { %v1473_v39 = vcombine.high %v1469_v37, %v1469_v37  ;;  %v1480_v42 = vrot.slane %v1469_v37, %v5105_v63  ;;  %v1634_v2 = vadd.f32 %v1618_v53, %v1540_v55  ;;  %v1633_v19 = vadd.f32 %v1617_v56, %v1539_v44 }
 0x95e   :  { %4518 = vtanh.f32 %v1632_v0  ;;  %v1635_v27 = vadd.f32 %v1619_v45, %v1541_v14  ;;  %v1636_v31 = vadd.f32 %v1620_v24, %v1542_v20  ;;  %v1623_v59 = vrot.slane %v1612_v4, 7 }
 0x95f   :  { %v1487_v16 = vrot.slane %v1473_v39, %v5105_v63  ;;  %v1488_v43 = vcombine.high %v1480_v42, %v1480_v42  ;;  %v1496_v21 = vrot.slane %v1480_v42, %v5105_v63  ;;  %4520 = vtanh.f32 %v1634_v2 }
 0x960   :  { %4522 = vtanh.f32 %v1633_v19  ;;  %v1637_v5 = vadd.f32 %v1621_v41, %v1543_v54  ;;  %v1638_v6 = vadd.f32 %v1622_v36, %v1544_v58  ;;  %v1639_v7 = vadd.f32 %v1623_v59, %v1545_v50 }
 0x961   :  { %v1489_v60 = vcombine.high %v1487_v16, %v1487_v16  ;;  %v1503_v61 = vrot.slane %v1487_v16, %v5105_v63  ;;  %v1510_v46 = vrot.slane %v1488_v43, %v5105_v63  ;;  %v1518_v48 = vcombine.high %v1496_v21, %v1496_v21  ;;  %1530 = vst.msk [vmem:[%s6397_s4 + $0x2] sm:$0x1] %vm617_vm9, %v1496_v21 }
 0x962   :  { %4524 = vtanh.f32 %v1635_v27  ;;  %v3917_v25 = vmul.f32 -1.442695, %v1632_v0  ;;  %v3919_v4 = vmul.f32 -1.442695, %v1634_v2  ;;  %v3918_v37 = vmul.f32 -1.442695, %v1633_v19 }
 0x963   :  { %v1517_v62 = vrot.slane %v1489_v60, %v5105_v63  ;;  %v1519_v35 = vcombine.high %v1503_v61, %v1503_v61  ;;  %v1520_v49 = vcombine.high %v1510_v46, %v1510_v46  ;;  %1531 = vst.msk [vmem:[%s6397_s4 + $0xa] sm:$0x1] %vm617_vm9, %v1510_v46  ;;  %1532 = vst.msk [vmem:[%s6397_s4 + $0x12] sm:$0x1] %vm617_vm9, %v1518_v48  ;;  %4526 = vtanh.f32 %v1636_v31 }
 0x964   :  { %1534 = vst.msk [vmem:[%s6397_s4 + $0x22] sm:$0x1] %vm617_vm9, %v1503_v61  ;;  %4528 = vtanh.f32 %v1637_v5  ;;  %v3920_v38 = vmul.f32 -1.442695, %v1635_v27  ;;  %v3921_v18 = vmul.f32 -1.442695, %v1636_v31 }
 0x965   :  { %v1521_v30 = vcombine.high %v1517_v62, %v1517_v62  ;;  %1533 = vst.msk [vmem:[%s6397_s4 + $0x1a] sm:$0x1] %vm617_vm9, %v1520_v49  ;;  %1535 = vst.msk [vmem:[%s6397_s4 + $0x2a] sm:$0x1] %vm617_vm9, %v1517_v62  ;;  %4530 = vtanh.f32 %v1638_v6  ;;  %v3922_v39 = vmul.f32 -1.442695, %v1637_v5 }
 0x966   :  { %1536 = vst.msk [vmem:[%s6397_s4 + $0x32] sm:$0x1] %vm617_vm9, %v1519_v35  ;;  %4532 = vtanh.f32 %v1639_v7  ;;  %v3923_v42 = vmul.f32 -1.442695, %v1638_v6  ;;  %v3924_v43 = vmul.f32 -1.442695, %v1639_v7 }
 0x967   :  { %1537 = vst.msk [vmem:[%s6397_s4 + $0x3a] sm:$0x1] %vm617_vm9, %v1521_v30  ;;  %4534 = vpow2.f32 %v3917_v25 }
 0x968   :  { %v4519_v1 = vpop.eup %4518  ;;  %4536 = vpow2.f32 %v3919_v4 }
 0x969   :  { %1712 = vrot.lane.b32.xlu1 %v4519_v1, %s4847_s29  ;;  %v4521_v32 = vpop.eup %4520  ;;  %4538 = vpow2.f32 %v3918_v37 }
 0x96a   :  { %1716 = vrot.lane.b32.xlu0 %v4521_v32, %s4847_s29  ;;  %v4523_v33 = vpop.eup %4522  ;;  %4540 = vpow2.f32 %v3920_v38 }
 0x96b   :  { %4542 = vpow2.f32 %v3921_v18 }
 0x96c   :  { %v4525_v40 = vpop.eup %4524  ;;  %4544 = vpow2.f32 %v3922_v39 }
 0x96d   :  { %1714 = vrot.lane.b32.xlu1 %v4523_v33, %s4847_s29  ;;  %v4527_v3 = vpop.eup %4526  ;;  %4546 = vpow2.f32 %v3923_v42 }
 0x96e   :  { %1718 = vrot.lane.b32.xlu0 %v4525_v40, %s4847_s29  ;;  %v4529_v12 = vpop.eup %4528  ;;  %4548 = vpow2.f32 %v3924_v43 }
 0x96f   :  { %v4531_v13 = vpop.eup %4530 }
 0x970   :  { %v4533_v15 = vpop.eup %4532 }
 0x971   :  { %1720 = vrot.lane.b32.xlu1 %v4527_v3, %s4847_s29  ;;  %v4535_v16 = vpop.eup %4534 }
 0x972   :  { %1722 = vrot.lane.b32.xlu0 %v4529_v12, %s4847_s29  ;;  %v4537_v21 = vpop.eup %4536  ;;  %v1664_v60 = vadd.f32 1.0, %v4535_v16 }
 0x973   :  { %v4539_v61 = vpop.eup %4538  ;;  %v1666_v46 = vadd.f32 1.0, %v4537_v21 }
 0x974   :  { %v4541_v48 = vpop.eup %4540  ;;  %4550 = vrcp.f32 %v1664_v60  ;;  %v1665_v62 = vadd.f32 1.0, %v4539_v61 }
 0x975   :  { %1724 = vrot.lane.b32.xlu1 %v4531_v13, %s4847_s29  ;;  %v4543_v35 = vpop.eup %4542  ;;  %4552 = vrcp.f32 %v1666_v46  ;;  %v1667_v49 = vadd.f32 1.0, %v4541_v48 }
 0x976   :  { %1726 = vrot.lane.b32.xlu0 %v4533_v15, %s4847_s29  ;;  %v4545_v51 = vpop.eup %4544  ;;  %4554 = vrcp.f32 %v1665_v62  ;;  %v1668_v53 = vadd.f32 1.0, %v4543_v35 }
 0x977   :  { %v4547_v30 = vpop.eup %4546  ;;  %4556 = vrcp.f32 %v1667_v49  ;;  %v1669_v55 = vadd.f32 1.0, %v4545_v51 }
 0x978   :  { %v4549_v56 = vpop.eup %4548  ;;  %4558 = vrcp.f32 %v1668_v53  ;;  %v1670_v0 = vadd.f32 1.0, %v4547_v30 }
 0x979   :  { %4560 = vrcp.f32 %v1669_v55  ;;  %v1671_v2 = vadd.f32 1.0, %v4549_v56 }
 0x97a   :  { %4562 = vrcp.f32 %v1670_v0 }
 0x97b   :  { %4564 = vrcp.f32 %v1671_v2 }
 0x97e   :  { %v5540_v44 = vpop.eup %4550 }
 0x97f   :  { %v5543_v24 = vpop.eup %4552  ;;  %v1696_v15 = vmul.f32 %v5540_v44, %v5393_v28 }
 0x980   :  { %v5547_v41 = vpop.eup %4554  ;;  %v1698_v37 = vmul.f32 %v5543_v24, %v5398_v29 }
 0x981   :  { %v5551_v36 = vpop.eup %4556  ;;  %v1697_v39 = vmul.f32 %v5547_v41, %v5403_v34 }
 0x982   :  { %v5555_v59 = vpop.eup %4558  ;;  %v1699_v28 = vmul.f32 %v5551_v36, %v5408_v17 }
 0x983   :  { %v5559_v6 = vpop.eup %4560  ;;  %v1700_v21 = vmul.f32 %v5555_v59, %v5413_v26 }
 0x984   :  { %v5563_v32 = vpop.eup %4562  ;;  %v1701_v61 = vmul.f32 %v5559_v6, %v5418_v52 }
 0x985   :  { %v5567_v3 = vpop.eup %4564  ;;  %v1702_v48 = vmul.f32 %v5563_v32, %v5423_v47 }
 0x986   :  { %v1703_v49 = vmul.f32 %v5567_v3, %v5429_v57 }
 0x9db   :  { %v1713_v45 = vpop.permute.xlu1 %1712 }
 0x9dc   :  { %v1736_v14 = vmul.f32 %v5540_v44, %v1713_v45  ;;  %v1717_v19 = vpop.permute.xlu0 %1716 }
 0x9dd   :  { %v1738_v20 = vmul.f32 %v5543_v24, %v1717_v19 }
 0x9de   :  { %1752 = vrot.lane.b32.xlu1 %v1736_v14, %s4847_s29 }
 0x9df   :  { %v1715_v27 = vpop.permute.xlu1 %1714  ;;  %1756 = vrot.lane.b32.xlu0 %v1738_v20, %s4847_s29 }
 0x9e0   :  { %v1737_v54 = vmul.f32 %v5547_v41, %v1715_v27  ;;  %v1719_v31 = vpop.permute.xlu0 %1718 }
 0x9e1   :  { %v1739_v58 = vmul.f32 %v5551_v36, %v1719_v31 }
 0x9e2   :  { %1754 = vrot.lane.b32.xlu1 %v1737_v54, %s4847_s29 }
 0x9e3   :  { %v1721_v5 = vpop.permute.xlu1 %1720  ;;  %1758 = vrot.lane.b32.xlu0 %v1739_v58, %s4847_s29 }
 0x9e4   :  { %v1740_v50 = vmul.f32 %v5555_v59, %v1721_v5  ;;  %v1723_v1 = vpop.permute.xlu0 %1722 }
 0x9e5   :  { %v1741_v7 = vmul.f32 %v5559_v6, %v1723_v1 }
 0x9e6   :  { %1760 = vrot.lane.b32.xlu1 %v1740_v50, %s4847_s29 }
 0x9e7   :  { %v1725_v33 = vpop.permute.xlu1 %1724  ;;  %1762 = vrot.lane.b32.xlu0 %v1741_v7, %s4847_s29 }
 0x9e8   :  { %v1742_v40 = vmul.f32 %v5563_v32, %v1725_v33  ;;  %v1727_v12 = vpop.permute.xlu0 %1726 }
 0x9e9   :  { %v1743_v13 = vmul.f32 %v5567_v3, %v1727_v12 }
 0x9ea   :  { %1764 = vrot.lane.b32.xlu1 %v1742_v40, %s4847_s29 }
 0x9eb   :  { %1766 = vrot.lane.b32.xlu0 %v1743_v13, %s4847_s29 }
 0xa50   :  { %v1753_v25 = vpop.permute.xlu1 %1752 }
 0xa51   :  { %v5574_v4 = vadd.f32 %v1753_v25, %v1696_v15  ;;  %v1757_v38 = vpop.permute.xlu0 %1756 }
 0xa52   :  { %v5579_v18 = vadd.f32 %v1757_v38, %v1698_v37 }
 0xa53   :  { %4566 = vtanh.f32 %v5574_v4 }
 0xa54   :  { %v1755_v42 = vpop.permute.xlu1 %1754  ;;  %4568 = vtanh.f32 %v5579_v18 }
 0xa55   :  { %v5584_v16 = vadd.f32 %v1755_v42, %v1697_v39  ;;  %v1759_v43 = vpop.permute.xlu0 %1758 }
 0xa56   :  { %v5589_v29 = vadd.f32 %v1759_v43, %v1699_v28 }
 0xa57   :  { %4570 = vtanh.f32 %v5584_v16 }
 0xa58   :  { %v1761_v60 = vpop.permute.xlu1 %1760  ;;  %4572 = vtanh.f32 %v5589_v29 }
 0xa59   :  { %v5594_v34 = vadd.f32 %v1761_v60, %v1700_v21  ;;  %v1763_v46 = vpop.permute.xlu0 %1762  ;;  %v5653_v21 = vld [vmem:[%s6396_s3] ss:$0 sm:$0xff] }
 0xa5a   :  { %v5599_v17 = vadd.f32 %v1763_v46, %v1701_v61 }
 0xa5b   :  { %4574 = vtanh.f32 %v5594_v34 }
 0xa5c   :  { %v1765_v62 = vpop.permute.xlu1 %1764  ;;  %4576 = vtanh.f32 %v5599_v17 }
 0xa5d   :  { %v4567_v35 = vpop.eup %4566  ;;  %v5604_v26 = vadd.f32 %v1765_v62, %v1702_v48  ;;  %v1767_v51 = vpop.permute.xlu0 %1766 }
 0xa5e   :  { %1800 = vrot.lane.b32.xlu1 %v4567_v35, %s4847_s29  ;;  %v4569_v52 = vpop.eup %4568  ;;  %v5610_v53 = vadd.f32 %v1767_v51, %v1703_v49 }
 0xa5f   :  { %4578 = vtanh.f32 %v5604_v26  ;;  %1804 = vrot.lane.b32.xlu0 %v4569_v52, %s4847_s29 }
 0xa60   :  { %4580 = vtanh.f32 %v5610_v53 }
 0xa61   :  { %v4571_v47 = vpop.eup %4570 }
 0xa62   :  { %1802 = vrot.lane.b32.xlu1 %v4571_v47, %s4847_s29  ;;  %v4573_v30 = vpop.eup %4572 }
 0xa63   :  { %1806 = vrot.lane.b32.xlu0 %v4573_v30, %s4847_s29 }
 0xa65   :  { %v4575_v55 = vpop.eup %4574 }
 0xa66   :  { %1808 = vrot.lane.b32.xlu1 %v4575_v55, %s4847_s29  ;;  %v4577_v57 = vpop.eup %4576 }
 0xa67   :  { %1810 = vrot.lane.b32.xlu0 %v4577_v57, %s4847_s29 }
 0xa69   :  { %v4579_v56 = vpop.eup %4578 }
 0xa6a   :  { %1812 = vrot.lane.b32.xlu1 %v4579_v56, %s4847_s29  ;;  %v4581_v0 = vpop.eup %4580 }
 0xa6b   :  { %1814 = vrot.lane.b32.xlu0 %v4581_v0, %s4847_s29 }
 0xad0   :  { %v1801_v45 = vpop.permute.xlu1 %1800 }
 0xad1   :  { %v1805_v2 = vpop.permute.xlu0 %1804  ;;  %v1824_v54 = vmul.f32 %v5540_v44, %v1801_v45  ;;  %v1994_v45 = vld [vmem:[%s6393_s0 + $0x4] sm:$0x1] }
 0xad2   :  { %v1826_v14 = vmul.f32 %v5543_v24, %v1805_v2 }
 0xad4   :  { %v1803_v19 = vpop.permute.xlu1 %1802  ;;  %v1842_v5 = vrot.slane %v1826_v14, 6 }
 0xad5   :  { %v1825_v20 = vmul.f32 %v5547_v41, %v1803_v19  ;;  %v1807_v27 = vpop.permute.xlu0 %1806  ;;  %v1996_v19 = vld [vmem:[%s6393_s0 + $0x14] sm:$0x1] }
 0xad6   :  { %v1827_v58 = vmul.f32 %v5551_v36, %v1807_v27 }
 0xad7   :  { %v1840_v31 = vrot.slane %v1825_v20, 7 }
 0xad8   :  { %v1809_v50 = vpop.permute.xlu1 %1808  ;;  %v1844_v7 = vrot.slane %v1827_v58, 5 }
 0xad9   :  { %v1841_v1 = vsel %vm465_vm2, %v1840_v31, %v1824_v54  ;;  %v1828_v33 = vmul.f32 %v5555_v59, %v1809_v50  ;;  %v1811_v12 = vpop.permute.xlu0 %1810  ;;  %v1995_v54 = vld [vmem:[%s6393_s0 + $0xc] sm:$0x1] }
 0xada   :  { %v1843_v40 = vsel %vm468_vm3, %v1842_v5, %v1841_v1  ;;  %v1829_v41 = vmul.f32 %v5559_v6, %v1811_v12  ;;  %v1997_v5 = vld [vmem:[%s6393_s0 + $0x1c] sm:$0x1]  ;;  %v1999_v12 = vld [vmem:[%s6393_s0 + $0x2c] sm:$0x1] }
 0xadb   :  { %v1845_v24 = vsel %vm471_vm4, %v1844_v7, %v1843_v40  ;;  %v1846_v13 = vrot.slane %v1828_v33, 4  ;;  %v1998_v7 = vld [vmem:[%s6393_s0 + $0x24] sm:$0x1] }
 0xadc   :  { %v1813_v15 = vpop.permute.xlu1 %1812  ;;  %v1848_v25 = vrot.slane %v1829_v41, 3  ;;  %v2000_v41 = vld [vmem:[%s6393_s0 + $0x34] sm:$0x1] }
 0xadd   :  { %v1847_v44 = vsel %vm474_vm5, %v1846_v13, %v1845_v24  ;;  %v1830_v36 = vmul.f32 %v5563_v32, %v1813_v15  ;;  %v1815_v37 = vpop.permute.xlu0 %1814 }
 0xade   :  { %v1849_v38 = vsel %vm477_vm6, %v1848_v25, %v1847_v44  ;;  %v1831_v59 = vmul.f32 %v5567_v3, %v1815_v37  ;;  %v2001_v25 = vld [vmem:[%s6393_s0 + $0x3c] sm:$0x1] }
 0xadf   :  { %v1850_v39 = vrot.slane %v1830_v36, 2 }
 0xae0   :  { %v1852_v42 = vrot.slane %v1831_v59, 1 }
 0xae1   :  { %v1851_v28 = vsel %vm480_vm7, %v1850_v39, %v1849_v38 }
 0xae2   :  { %v1853_v43 = vsel %vm483_vm8, %v1852_v42, %v1851_v28 }
 0xae3   :  { %1854 = vrot.lane.b32.xlu1 %v1853_v43, %s4848_s12 }
 0xb55   :  { %v1855_v6 = vpop.permute.xlu1 %1854 }
 0xb56   :  { %4134 = vmatmul.mubr.msk.f32.vlgmr.msra.gmra.mrb[6].mxu1 %vm122_vm0, %v1855_v6  ;;  %4145 = vmatmul.mubr.msk.f32.vlgmr.msra.gmra.mrb[8].mxu0 %vm122_vm0, %v1855_v6 }
 0xb57   :  { %4280 = vmatpush3.bf16.msra.mxu1 %v5056_v22  ;;  %4286 = vmatpush3.bf16.msra.mxu0 %v4917_v8 }
 0xb58   :  { %4281 = vmatprep.subr.bf16.mxu1 %v4844_v9  ;;  %4287 = vmatprep.subr.bf16.mxu0 %v4844_v9 }
 0xb59   :  { %4166 = vmatprep.mubr.msk.f32.mxu0 %vm4845_vm1, %v4846_v11  ;;  %4155 = vmatprep.mubr.msk.f32.mxu1 %vm4845_vm1, %v4846_v11 }
 0xb5b   :  { %4283 = vmatpush3.bf16.msra.mxu1 %v5062_v23  ;;  %4289 = vmatpush3.bf16.msra.mxu0 %v4922_v10 }
 0xb5c   :  { %4290 = vmatprep.subr.bf16.mxu1 %v4844_v9  ;;  %4296 = vmatprep.subr.bf16.mxu0 %v4844_v9 }
 0xc29   :  { %v1924_v32 = vpop.f32.mrb[6].mxu1  ;;  %v2068_v3 = vpop.f32.mrb[8].mxu0 }
 0xc2a   :  { %v1925_v60 = vadd.f32 %v5653_v21, %v1924_v32  ;;  %v4135_v61 = vpop.f32.mrb[7].mxu1  ;;  %v4146_v46 = vpop.f32.mrb[9].mxu0  ;;  %v2074_v2 = vrot.slane %v2068_v3, 2  ;;  %v2073_v20 = vrot.slane %v2068_v3, 1  ;;  %v2088_v27 = vadd.f32 %v2068_v3, %v1994_v45 }
 0xc2b   :  { %v2075_v31 = vrot.slane %v2068_v3, 3  ;;  %v2076_v50 = vrot.slane %v2068_v3, 4  ;;  %v2077_v33 = vrot.slane %v2068_v3, 5  ;;  %v2078_v24 = vrot.slane %v2068_v3, 6 }
 0xc2c   :  { %v1929_v48 = vcombine.high %v1925_v60, %v1925_v60  ;;  %v1936_v62 = vrot.slane %v1925_v60, %v5105_v63  ;;  %v2090_v58 = vadd.f32 %v2074_v2, %v1996_v19  ;;  %v2089_v1 = vadd.f32 %v2073_v20, %v1995_v54 }
 0xc2d   :  { %4582 = vtanh.f32 %v2088_v27  ;;  %v2091_v40 = vadd.f32 %v2075_v31, %v1997_v5  ;;  %v2092_v13 = vadd.f32 %v2076_v50, %v1998_v7  ;;  %v2079_v15 = vrot.slane %v2068_v3, 7 }
 0xc2e   :  { %v1943_v35 = vrot.slane %v1929_v48, %v5105_v63  ;;  %v1944_v49 = vcombine.high %v1936_v62, %v1936_v62  ;;  %v1952_v51 = vrot.slane %v1936_v62, %v5105_v63  ;;  %4584 = vtanh.f32 %v2090_v58 }
 0xc2f   :  { %4586 = vtanh.f32 %v2089_v1  ;;  %v2093_v44 = vadd.f32 %v2077_v33, %v1999_v12  ;;  %v2094_v36 = vadd.f32 %v2078_v24, %v2000_v41  ;;  %v2095_v38 = vadd.f32 %v2079_v15, %v2001_v25 }
 0xc30   :  { %v1945_v52 = vcombine.high %v1943_v35, %v1943_v35  ;;  %v1959_v47 = vrot.slane %v1943_v35, %v5105_v63  ;;  %v1966_v30 = vrot.slane %v1944_v49, %v5105_v63  ;;  %v1974_v55 = vcombine.high %v1952_v51, %v1952_v51  ;;  %1986 = vst.msk [vmem:[%s6397_s4 + $0x3] sm:$0x1] %vm617_vm9, %v1952_v51 }
 0xc31   :  { %4588 = vtanh.f32 %v2091_v40  ;;  %v3927_v3 = vmul.f32 -1.442695, %v2088_v27  ;;  %v3929_v60 = vmul.f32 -1.442695, %v2090_v58  ;;  %v3928_v61 = vmul.f32 -1.442695, %v2089_v1 }
 0xc32   :  { %v1973_v57 = vrot.slane %v1945_v52, %v5105_v63  ;;  %v1975_v56 = vcombine.high %v1959_v47, %v1959_v47  ;;  %v1976_v0 = vcombine.high %v1966_v30, %v1966_v30  ;;  %1987 = vst.msk [vmem:[%s6397_s4 + $0xb] sm:$0x1] %vm617_vm9, %v1966_v30  ;;  %1988 = vst.msk [vmem:[%s6397_s4 + $0x13] sm:$0x1] %vm617_vm9, %v1974_v55  ;;  %4590 = vtanh.f32 %v2092_v13 }
 0xc33   :  { %1990 = vst.msk [vmem:[%s6397_s4 + $0x23] sm:$0x1] %vm617_vm9, %v1959_v47  ;;  %4592 = vtanh.f32 %v2093_v44  ;;  %v3930_v46 = vmul.f32 -1.442695, %v2091_v40  ;;  %v3931_v48 = vmul.f32 -1.442695, %v2092_v13 }
 0xc34   :  { %v1977_v14 = vcombine.high %v1973_v57, %v1973_v57  ;;  %1989 = vst.msk [vmem:[%s6397_s4 + $0x1b] sm:$0x1] %vm617_vm9, %v1976_v0  ;;  %1991 = vst.msk [vmem:[%s6397_s4 + $0x2b] sm:$0x1] %vm617_vm9, %v1973_v57  ;;  %4594 = vtanh.f32 %v2094_v36  ;;  %v3932_v62 = vmul.f32 -1.442695, %v2093_v44 }
 0xc35   :  { %1992 = vst.msk [vmem:[%s6397_s4 + $0x33] sm:$0x1] %vm617_vm9, %v1975_v56  ;;  %4596 = vtanh.f32 %v2095_v38  ;;  %v3933_v35 = vmul.f32 -1.442695, %v2094_v36  ;;  %v3934_v51 = vmul.f32 -1.442695, %v2095_v38 }
 0xc36   :  { %1993 = vst.msk [vmem:[%s6397_s4 + $0x3b] sm:$0x1] %vm617_vm9, %v1977_v14  ;;  %4598 = vpow2.f32 %v3927_v3 }
 0xc37   :  { %v4583_v37 = vpop.eup %4582  ;;  %4600 = vpow2.f32 %v3929_v60 }
 0xc38   :  { %2168 = vrot.lane.b32.xlu0 %v4583_v37, %s4847_s29  ;;  %v4585_v39 = vpop.eup %4584  ;;  %4602 = vpow2.f32 %v3928_v61 }
 0xc39   :  { %2172 = vrot.lane.b32.xlu1 %v4585_v39, %s4847_s29  ;;  %v4587_v59 = vpop.eup %4586  ;;  %4604 = vpow2.f32 %v3930_v46 }
 0xc3a   :  { %4606 = vpow2.f32 %v3931_v48 }
 0xc3b   :  { %v4589_v42 = vpop.eup %4588  ;;  %4608 = vpow2.f32 %v3932_v62 }
 0xc3c   :  { %2170 = vrot.lane.b32.xlu0 %v4587_v59, %s4847_s29  ;;  %v4591_v28 = vpop.eup %4590  ;;  %4610 = vpow2.f32 %v3933_v35 }
 0xc3d   :  { %2174 = vrot.lane.b32.xlu1 %v4589_v42, %s4847_s29  ;;  %v4593_v43 = vpop.eup %4592  ;;  %4612 = vpow2.f32 %v3934_v51 }
 0xc3e   :  { %v4595_v6 = vpop.eup %4594 }
 0xc3f   :  { %v4597_v32 = vpop.eup %4596 }
 0xc40   :  { %2176 = vrot.lane.b32.xlu0 %v4591_v28, %s4847_s29  ;;  %v4599_v49 = vpop.eup %4598 }
 0xc41   :  { %2178 = vrot.lane.b32.xlu1 %v4593_v43, %s4847_s29  ;;  %v4601_v52 = vpop.eup %4600  ;;  %v2120_v47 = vadd.f32 1.0, %v4599_v49 }
 0xc42   :  { %v4603_v30 = vpop.eup %4602  ;;  %v2122_v55 = vadd.f32 1.0, %v4601_v52 }
 0xc43   :  { %v4605_v57 = vpop.eup %4604  ;;  %4614 = vrcp.f32 %v2120_v47  ;;  %v2121_v56 = vadd.f32 1.0, %v4603_v30 }
 0xc44   :  { %2180 = vrot.lane.b32.xlu0 %v4595_v6, %s4847_s29  ;;  %v4607_v0 = vpop.eup %4606  ;;  %4616 = vrcp.f32 %v2122_v55  ;;  %v2123_v45 = vadd.f32 1.0, %v4605_v57 }
 0xc45   :  { %2182 = vrot.lane.b32.xlu1 %v4597_v32, %s4847_s29  ;;  %v4609_v2 = vpop.eup %4608  ;;  %4618 = vrcp.f32 %v2121_v56  ;;  %v2124_v14 = vadd.f32 1.0, %v4607_v0 }
 0xc46   :  { %v4611_v19 = vpop.eup %4610  ;;  %4620 = vrcp.f32 %v2123_v45  ;;  %v2125_v20 = vadd.f32 1.0, %v4609_v2 }
 0xc47   :  { %v4613_v27 = vpop.eup %4612  ;;  %4622 = vrcp.f32 %v2124_v14  ;;  %v2126_v54 = vadd.f32 1.0, %v4611_v19 }
 0xc48   :  { %4624 = vrcp.f32 %v2125_v20  ;;  %v2127_v5 = vadd.f32 1.0, %v4613_v27 }
 0xc49   :  { %4626 = vrcp.f32 %v2126_v54 }
 0xc4a   :  { %4628 = vrcp.f32 %v2127_v5 }
 0xc4d   :  { %v5726_v31 = vpop.eup %4614 }
 0xc4e   :  { %v5729_v1 = vpop.eup %4616  ;;  %v2152_v3 = vmul.f32 %v5726_v31, %v5574_v4 }
 0xc4f   :  { %v5733_v40 = vpop.eup %4618  ;;  %v2154_v46 = vmul.f32 %v5729_v1, %v5579_v18 }
 0xc50   :  { %v5737_v13 = vpop.eup %4620  ;;  %v2153_v35 = vmul.f32 %v5733_v40, %v5584_v16 }
 0xc51   :  { %v5741_v44 = vpop.eup %4622  ;;  %v2155_v4 = vmul.f32 %v5737_v13, %v5589_v29 }
 0xc52   :  { %v5745_v37 = vpop.eup %4624  ;;  %v2156_v47 = vmul.f32 %v5741_v44, %v5594_v34 }
 0xc53   :  { %v5749_v59 = vpop.eup %4626  ;;  %v2157_v55 = vmul.f32 %v5745_v37, %v5599_v17 }
 0xc54   :  { %v5753_v43 = vpop.eup %4628  ;;  %v2158_v56 = vmul.f32 %v5749_v59, %v5604_v26 }
 0xc55   :  { %v2159_v2 = vmul.f32 %v5753_v43, %v5610_v53 }
 0xcaa   :  { %v2169_v58 = vpop.permute.xlu0 %2168 }
 0xcab   :  { %v2192_v50 = vmul.f32 %v5726_v31, %v2169_v58  ;;  %v2173_v7 = vpop.permute.xlu1 %2172 }
 0xcac   :  { %v2194_v33 = vmul.f32 %v5729_v1, %v2173_v7 }
 0xcad   :  { %2208 = vrot.lane.b32.xlu0 %v2192_v50, %s4847_s29 }
 0xcae   :  { %v2171_v12 = vpop.permute.xlu0 %2170  ;;  %2212 = vrot.lane.b32.xlu1 %v2194_v33, %s4847_s29 }
 0xcaf   :  { %v2193_v24 = vmul.f32 %v5733_v40, %v2171_v12  ;;  %v2175_v41 = vpop.permute.xlu1 %2174 }
 0xcb0   :  { %v2195_v15 = vmul.f32 %v5737_v13, %v2175_v41 }
 0xcb1   :  { %2210 = vrot.lane.b32.xlu0 %v2193_v24, %s4847_s29 }
 0xcb2   :  { %v2177_v25 = vpop.permute.xlu0 %2176  ;;  %2214 = vrot.lane.b32.xlu1 %v2195_v15, %s4847_s29 }
 0xcb3   :  { %v2196_v36 = vmul.f32 %v5741_v44, %v2177_v25  ;;  %v2179_v38 = vpop.permute.xlu1 %2178 }
 0xcb4   :  { %v2197_v39 = vmul.f32 %v5745_v37, %v2179_v38 }
 0xcb5   :  { %2216 = vrot.lane.b32.xlu0 %v2196_v36, %s4847_s29 }
 0xcb6   :  { %v2181_v42 = vpop.permute.xlu0 %2180  ;;  %2218 = vrot.lane.b32.xlu1 %v2197_v39, %s4847_s29 }
 0xcb7   :  { %v2198_v28 = vmul.f32 %v5749_v59, %v2181_v42  ;;  %v2183_v6 = vpop.permute.xlu1 %2182 }
 0xcb8   :  { %v2199_v32 = vmul.f32 %v5753_v43, %v2183_v6 }
 0xcb9   :  { %2220 = vrot.lane.b32.xlu0 %v2198_v28, %s4847_s29 }
 0xcba   :  { %2222 = vrot.lane.b32.xlu1 %v2199_v32, %s4847_s29 }
 0xd1f   :  { %v2209_v60 = vpop.permute.xlu0 %2208 }
 0xd20   :  { %v5760_v61 = vadd.f32 %v2209_v60, %v2152_v3  ;;  %v2213_v48 = vpop.permute.xlu1 %2212 }
 0xd21   :  { %v5765_v62 = vadd.f32 %v2213_v48, %v2154_v46 }
 0xd22   :  { %4630 = vtanh.f32 %v5760_v61 }
 0xd23   :  { %v2211_v49 = vpop.permute.xlu0 %2210  ;;  %4632 = vtanh.f32 %v5765_v62 }
 0xd24   :  { %v5770_v51 = vadd.f32 %v2211_v49, %v2153_v35  ;;  %v2215_v52 = vpop.permute.xlu1 %2214 }
 0xd25   :  { %v5775_v18 = vadd.f32 %v2215_v52, %v2155_v4 }
 0xd26   :  { %4634 = vtanh.f32 %v5770_v51 }
 0xd27   :  { %v2217_v30 = vpop.permute.xlu0 %2216  ;;  %4636 = vtanh.f32 %v5775_v18 }
 0xd28   :  { %v5780_v16 = vadd.f32 %v2217_v30, %v2156_v47  ;;  %v2219_v57 = vpop.permute.xlu1 %2218 }
 0xd29   :  { %v5785_v29 = vadd.f32 %v2219_v57, %v2157_v55 }
 0xd2a   :  { %4638 = vtanh.f32 %v5780_v16 }
 0xd2b   :  { %v2221_v0 = vpop.permute.xlu0 %2220  ;;  %4640 = vtanh.f32 %v5785_v29 }
 0xd2c   :  { %v4631_v45 = vpop.eup %4630  ;;  %v5790_v34 = vadd.f32 %v2221_v0, %v2158_v56  ;;  %v2223_v14 = vpop.permute.xlu1 %2222 }
 0xd2d   :  { %2256 = vrot.lane.b32.xlu0 %v4631_v45, %s4847_s29  ;;  %v4633_v17 = vpop.eup %4632  ;;  %v5796_v19 = vadd.f32 %v2223_v14, %v2159_v2 }
 0xd2e   :  { %4642 = vtanh.f32 %v5790_v34  ;;  %2260 = vrot.lane.b32.xlu1 %v4633_v17, %s4847_s29 }
 0xd2f   :  { %4644 = vtanh.f32 %v5796_v19 }
 0xd30   :  { %v4635_v26 = vpop.eup %4634 }
 0xd31   :  { %2258 = vrot.lane.b32.xlu0 %v4635_v26, %s4847_s29  ;;  %v4637_v20 = vpop.eup %4636 }
 0xd32   :  { %2262 = vrot.lane.b32.xlu1 %v4637_v20, %s4847_s29 }
 0xd34   :  { %v4639_v27 = vpop.eup %4638 }
 0xd35   :  { %2264 = vrot.lane.b32.xlu0 %v4639_v27, %s4847_s29  ;;  %v4641_v53 = vpop.eup %4640 }
 0xd36   :  { %2266 = vrot.lane.b32.xlu1 %v4641_v53, %s4847_s29 }
 0xd38   :  { %v4643_v54 = vpop.eup %4642 }
 0xd39   :  { %2268 = vrot.lane.b32.xlu0 %v4643_v54, %s4847_s29  ;;  %v4645_v58 = vpop.eup %4644 }
 0xd3a   :  { %2270 = vrot.lane.b32.xlu1 %v4645_v58, %s4847_s29 }
 0xd9f   :  { %v2257_v5 = vpop.permute.xlu0 %2256 }
 0xda0   :  { %v2261_v50 = vpop.permute.xlu1 %2260  ;;  %v2280_v41 = vmul.f32 %v5726_v31, %v2257_v5  ;;  %v2450_v5 = vld [vmem:[%s6393_s0 + $0x5] sm:$0x1] }
 0xda1   :  { %v2282_v7 = vmul.f32 %v5729_v1, %v2261_v50 }
 0xda3   :  { %v2259_v33 = vpop.permute.xlu0 %2258  ;;  %v2298_v36 = vrot.slane %v2282_v7, 6 }
 0xda4   :  { %v2281_v12 = vmul.f32 %v5733_v40, %v2259_v33  ;;  %v2263_v24 = vpop.permute.xlu1 %2262  ;;  %v2452_v33 = vld [vmem:[%s6393_s0 + $0x15] sm:$0x1] }
 0xda5   :  { %v2283_v25 = vmul.f32 %v5737_v13, %v2263_v24 }
 0xda6   :  { %v2296_v15 = vrot.slane %v2281_v12, 7 }
 0xda7   :  { %v2265_v38 = vpop.permute.xlu0 %2264  ;;  %v2300_v42 = vrot.slane %v2283_v25, 5 }
 0xda8   :  { %v2297_v39 = vsel %vm465_vm2, %v2296_v15, %v2280_v41  ;;  %v2284_v28 = vmul.f32 %v5741_v44, %v2265_v38  ;;  %v2267_v32 = vpop.permute.xlu1 %2266  ;;  %v2451_v41 = vld [vmem:[%s6393_s0 + $0xd] sm:$0x1] }
 0xda9   :  { %v2299_v6 = vsel %vm468_vm3, %v2298_v36, %v2297_v39  ;;  %v2285_v40 = vmul.f32 %v5745_v37, %v2267_v32  ;;  %v2453_v36 = vld [vmem:[%s6393_s0 + $0x1d] sm:$0x1]  ;;  %v2455_v32 = vld [vmem:[%s6393_s0 + $0x2d] sm:$0x1] }
 0xdaa   :  { %v2301_v1 = vsel %vm471_vm4, %v2300_v42, %v2299_v6  ;;  %v2302_v3 = vrot.slane %v2284_v28, 4  ;;  %v2454_v42 = vld [vmem:[%s6393_s0 + $0x25] sm:$0x1] }
 0xdab   :  { %v2269_v60 = vpop.permute.xlu0 %2268  ;;  %v2304_v46 = vrot.slane %v2285_v40, 3  ;;  %v2456_v40 = vld [vmem:[%s6393_s0 + $0x35] sm:$0x1] }
 0xdac   :  { %v2303_v31 = vsel %vm474_vm5, %v2302_v3, %v2301_v1  ;;  %v2286_v13 = vmul.f32 %v5749_v59, %v2269_v60  ;;  %v2271_v48 = vpop.permute.xlu1 %2270 }
 0xdad   :  { %v2305_v35 = vsel %vm477_vm6, %v2304_v46, %v2303_v31  ;;  %v2287_v44 = vmul.f32 %v5753_v43, %v2271_v48  ;;  %v2457_v46 = vld [vmem:[%s6393_s0 + $0x3d] sm:$0x1] }
 0xdae   :  { %v2306_v49 = vrot.slane %v2286_v13, 2 }
 0xdaf   :  { %v2308_v52 = vrot.slane %v2287_v44, 1 }
 0xdb0   :  { %v2307_v4 = vsel %vm480_vm7, %v2306_v49, %v2305_v35 }
 0xdb1   :  { %v2309_v47 = vsel %vm483_vm8, %v2308_v52, %v2307_v4 }
 0xdb2   :  { %2310 = vrot.lane.b32.xlu0 %v2309_v47, %s4848_s12 }
 0xe24   :  { %v2311_v37 = vpop.permute.xlu0 %2310 }
 0xe25   :  { %4156 = vmatmul.mubr.msk.f32.vlgmr.msra.gmra.mrb[8].mxu1 %vm122_vm0, %v2311_v37  ;;  %4167 = vmatmul.mubr.msk.f32.vlgmr.msra.gmra.mrb[10].mxu0 %vm122_vm0, %v2311_v37 }
 0xe26   :  { %4292 = vmatpush3.bf16.msra.mxu1 %v5056_v22  ;;  %4298 = vmatpush3.bf16.msra.mxu0 %v4917_v8 }
 0xe27   :  { %4293 = vmatprep.subr.bf16.mxu1 %v4844_v9  ;;  %4299 = vmatprep.subr.bf16.mxu0 %v4844_v9 }
 0xe28   :  { %4188 = vmatprep.mubr.msk.f32.mxu0 %vm4845_vm1, %v4846_v11  ;;  %4177 = vmatprep.mubr.msk.f32.mxu1 %vm4845_vm1, %v4846_v11 }
 0xe2a   :  { %4295 = vmatpush3.bf16.msra.mxu1 %v5062_v23  ;;  %4301 = vmatpush3.bf16.msra.mxu0 %v4922_v10 }
 0xe2b   :  { %4302 = vmatprep.subr.bf16.mxu1 %v4844_v9  ;;  %4308 = vmatprep.subr.bf16.mxu0 %v4844_v9 }
 0xef8   :  { %v2380_v59 = vpop.f32.mrb[8].mxu1  ;;  %v2524_v43 = vpop.f32.mrb[10].mxu0 }
 0xef9   :  { %v2381_v30 = vadd.f32 %v5653_v21, %v2380_v59  ;;  %v4157_v55 = vpop.f32.mrb[9].mxu1  ;;  %v4168_v57 = vpop.f32.mrb[11].mxu0  ;;  %v2530_v50 = vrot.slane %v2524_v43, 2  ;;  %v2529_v12 = vrot.slane %v2524_v43, 1  ;;  %v2544_v24 = vadd.f32 %v2524_v43, %v2450_v5 }
 0xefa   :  { %v2531_v15 = vrot.slane %v2524_v43, 3  ;;  %v2532_v38 = vrot.slane %v2524_v43, 4  ;;  %v2533_v28 = vrot.slane %v2524_v43, 5  ;;  %v2534_v1 = vrot.slane %v2524_v43, 6 }
 0xefb   :  { %v2385_v56 = vcombine.high %v2381_v30, %v2381_v30  ;;  %v2392_v0 = vrot.slane %v2381_v30, %v5105_v63  ;;  %v2546_v25 = vadd.f32 %v2530_v50, %v2452_v33  ;;  %v2545_v39 = vadd.f32 %v2529_v12, %v2451_v41 }
 0xefc   :  { %4646 = vtanh.f32 %v2544_v24  ;;  %v2547_v6 = vadd.f32 %v2531_v15, %v2453_v36  ;;  %v2548_v3 = vadd.f32 %v2532_v38, %v2454_v42  ;;  %v2535_v60 = vrot.slane %v2524_v43, 7 }
 0xefd   :  { %v2399_v45 = vrot.slane %v2385_v56, %v5105_v63  ;;  %v2400_v2 = vcombine.high %v2392_v0, %v2392_v0  ;;  %v2408_v14 = vrot.slane %v2392_v0, %v5105_v63  ;;  %4648 = vtanh.f32 %v2546_v25 }
 0xefe   :  { %4650 = vtanh.f32 %v2545_v39  ;;  %v2549_v31 = vadd.f32 %v2533_v28, %v2455_v32  ;;  %v2550_v13 = vadd.f32 %v2534_v1, %v2456_v40  ;;  %v2551_v35 = vadd.f32 %v2535_v60, %v2457_v46 }
 0xeff   :  { %v2401_v17 = vcombine.high %v2399_v45, %v2399_v45  ;;  %v2415_v26 = vrot.slane %v2399_v45, %v5105_v63  ;;  %v2422_v20 = vrot.slane %v2400_v2, %v5105_v63  ;;  %v2430_v27 = vcombine.high %v2408_v14, %v2408_v14  ;;  %2442 = vst.msk [vmem:[%s6397_s4 + $0x4] sm:$0x1] %vm617_vm9, %v2408_v14 }
 0xf00   :  { %4652 = vtanh.f32 %v2547_v6  ;;  %v3937_v43 = vmul.f32 -1.442695, %v2544_v24  ;;  %v3939_v30 = vmul.f32 -1.442695, %v2546_v25  ;;  %v3938_v55 = vmul.f32 -1.442695, %v2545_v39 }
 0xf01   :  { %v2429_v53 = vrot.slane %v2401_v17, %v5105_v63  ;;  %v2431_v54 = vcombine.high %v2415_v26, %v2415_v26  ;;  %v2432_v58 = vcombine.high %v2422_v20, %v2422_v20  ;;  %2443 = vst.msk [vmem:[%s6397_s4 + $0xc] sm:$0x1] %vm617_vm9, %v2422_v20  ;;  %2444 = vst.msk [vmem:[%s6397_s4 + $0x14] sm:$0x1] %vm617_vm9, %v2430_v27  ;;  %4654 = vtanh.f32 %v2548_v3 }
 0xf02   :  { %2446 = vst.msk [vmem:[%s6397_s4 + $0x24] sm:$0x1] %vm617_vm9, %v2415_v26  ;;  %4656 = vtanh.f32 %v2549_v31  ;;  %v3940_v57 = vmul.f32 -1.442695, %v2547_v6  ;;  %v3941_v56 = vmul.f32 -1.442695, %v2548_v3 }
 0xf03   :  { %v2433_v7 = vcombine.high %v2429_v53, %v2429_v53  ;;  %2445 = vst.msk [vmem:[%s6397_s4 + $0x1c] sm:$0x1] %vm617_vm9, %v2432_v58  ;;  %2447 = vst.msk [vmem:[%s6397_s4 + $0x2c] sm:$0x1] %vm617_vm9, %v2429_v53  ;;  %4658 = vtanh.f32 %v2550_v13  ;;  %v3942_v0 = vmul.f32 -1.442695, %v2549_v31 }
 0xf04   :  { %2448 = vst.msk [vmem:[%s6397_s4 + $0x34] sm:$0x1] %vm617_vm9, %v2431_v54  ;;  %4660 = vtanh.f32 %v2551_v35  ;;  %v3943_v45 = vmul.f32 -1.442695, %v2550_v13  ;;  %v3944_v14 = vmul.f32 -1.442695, %v2551_v35 }
 0xf05   :  { %2449 = vst.msk [vmem:[%s6397_s4 + $0x3c] sm:$0x1] %vm617_vm9, %v2433_v7  ;;  %4662 = vpow2.f32 %v3937_v43 }
 0xf06   :  { %v4647_v48 = vpop.eup %4646  ;;  %4664 = vpow2.f32 %v3939_v30 }
 0xf07   :  { %2624 = vrot.lane.b32.xlu1 %v4647_v48, %s4847_s29  ;;  %v4649_v49 = vpop.eup %4648  ;;  %4666 = vpow2.f32 %v3938_v55 }
 0xf08   :  { %2628 = vrot.lane.b32.xlu0 %v4649_v49, %s4847_s29  ;;  %v4651_v44 = vpop.eup %4650  ;;  %4668 = vpow2.f32 %v3940_v57 }
 0xf09   :  { %4670 = vpow2.f32 %v3941_v56 }
 0xf0a   :  { %v4653_v4 = vpop.eup %4652  ;;  %4672 = vpow2.f32 %v3942_v0 }
 0xf0b   :  { %2626 = vrot.lane.b32.xlu1 %v4651_v44, %s4847_s29  ;;  %v4655_v52 = vpop.eup %4654  ;;  %4674 = vpow2.f32 %v3943_v45 }
 0xf0c   :  { %2630 = vrot.lane.b32.xlu0 %v4653_v4, %s4847_s29  ;;  %v4657_v47 = vpop.eup %4656  ;;  %4676 = vpow2.f32 %v3944_v14 }
 0xf0d   :  { %v4659_v37 = vpop.eup %4658 }
 0xf0e   :  { %v4661_v59 = vpop.eup %4660 }
 0xf0f   :  { %2632 = vrot.lane.b32.xlu1 %v4655_v52, %s4847_s29  ;;  %v4663_v2 = vpop.eup %4662 }
 0xf10   :  { %2634 = vrot.lane.b32.xlu0 %v4657_v47, %s4847_s29  ;;  %v4665_v17 = vpop.eup %4664  ;;  %v2576_v26 = vadd.f32 1.0, %v4663_v2 }
 0xf11   :  { %v4667_v20 = vpop.eup %4666  ;;  %v2578_v27 = vadd.f32 1.0, %v4665_v17 }
 0xf12   :  { %v4669_v53 = vpop.eup %4668  ;;  %4678 = vrcp.f32 %v2576_v26  ;;  %v2577_v54 = vadd.f32 1.0, %v4667_v20 }
 0xf13   :  { %2636 = vrot.lane.b32.xlu1 %v4659_v37, %s4847_s29  ;;  %v4671_v58 = vpop.eup %4670  ;;  %4680 = vrcp.f32 %v2578_v27  ;;  %v2579_v5 = vadd.f32 1.0, %v4669_v53 }
 0xf14   :  { %2638 = vrot.lane.b32.xlu0 %v4661_v59, %s4847_s29  ;;  %v4673_v50 = vpop.eup %4672  ;;  %4682 = vrcp.f32 %v2577_v54  ;;  %v2580_v7 = vadd.f32 1.0, %v4671_v58 }
 0xf15   :  { %v4675_v33 = vpop.eup %4674  ;;  %4684 = vrcp.f32 %v2579_v5  ;;  %v2581_v12 = vadd.f32 1.0, %v4673_v50 }
 0xf16   :  { %v4677_v24 = vpop.eup %4676  ;;  %4686 = vrcp.f32 %v2580_v7  ;;  %v2582_v41 = vadd.f32 1.0, %v4675_v33 }
 0xf17   :  { %4688 = vrcp.f32 %v2581_v12  ;;  %v2583_v36 = vadd.f32 1.0, %v4677_v24 }
 0xf18   :  { %4690 = vrcp.f32 %v2582_v41 }
 0xf19   :  { %4692 = vrcp.f32 %v2583_v36 }
 0xf1c   :  { %v5907_v15 = vpop.eup %4678 }
 0xf1d   :  { %v5910_v39 = vpop.eup %4680  ;;  %v2608_v43 = vmul.f32 %v5907_v15, %v5760_v61 }
 0xf1e   :  { %v5914_v6 = vpop.eup %4682  ;;  %v2610_v57 = vmul.f32 %v5910_v39, %v5765_v62 }
 0xf1f   :  { %v5918_v3 = vpop.eup %4684  ;;  %v2609_v45 = vmul.f32 %v5914_v6, %v5770_v51 }
 0xf20   :  { %v5922_v31 = vpop.eup %4686  ;;  %v2611_v61 = vmul.f32 %v5918_v3, %v5775_v18 }
 0xf21   :  { %v5926_v48 = vpop.eup %4688  ;;  %v2612_v26 = vmul.f32 %v5922_v31, %v5780_v16 }
 0xf22   :  { %v5930_v44 = vpop.eup %4690  ;;  %v2613_v27 = vmul.f32 %v5926_v48, %v5785_v29 }
 0xf23   :  { %v5934_v47 = vpop.eup %4692  ;;  %v2614_v54 = vmul.f32 %v5930_v44, %v5790_v34 }
 0xf24   :  { %v2615_v50 = vmul.f32 %v5934_v47, %v5796_v19 }
 0xf79   :  { %v2625_v25 = vpop.permute.xlu1 %2624 }
 0xf7a   :  { %v2648_v38 = vmul.f32 %v5907_v15, %v2625_v25  ;;  %v2629_v42 = vpop.permute.xlu0 %2628 }
 0xf7b   :  { %v2650_v28 = vmul.f32 %v5910_v39, %v2629_v42 }
 0xf7c   :  { %2664 = vrot.lane.b32.xlu1 %v2648_v38, %s4847_s29 }
 0xf7d   :  { %v2627_v32 = vpop.permute.xlu1 %2626  ;;  %2668 = vrot.lane.b32.xlu0 %v2650_v28, %s4847_s29 }
 0xf7e   :  { %v2649_v1 = vmul.f32 %v5914_v6, %v2627_v32  ;;  %v2631_v40 = vpop.permute.xlu0 %2630 }
 0xf7f   :  { %v2651_v60 = vmul.f32 %v5918_v3, %v2631_v40 }
 0xf80   :  { %2666 = vrot.lane.b32.xlu1 %v2649_v1, %s4847_s29 }
 0xf81   :  { %v2633_v46 = vpop.permute.xlu1 %2632  ;;  %2670 = vrot.lane.b32.xlu0 %v2651_v60, %s4847_s29 }
 0xf82   :  { %v2652_v13 = vmul.f32 %v5922_v31, %v2633_v46  ;;  %v2635_v35 = vpop.permute.xlu0 %2634 }
 0xf83   :  { %v2653_v49 = vmul.f32 %v5926_v48, %v2635_v35 }
 0xf84   :  { %2672 = vrot.lane.b32.xlu1 %v2652_v13, %s4847_s29 }
 0xf85   :  { %v2637_v4 = vpop.permute.xlu1 %2636  ;;  %2674 = vrot.lane.b32.xlu0 %v2653_v49, %s4847_s29 }
 0xf86   :  { %v2654_v52 = vmul.f32 %v5930_v44, %v2637_v4  ;;  %v2639_v37 = vpop.permute.xlu0 %2638 }
 0xf87   :  { %v2655_v59 = vmul.f32 %v5934_v47, %v2639_v37 }
 0xf88   :  { %2676 = vrot.lane.b32.xlu1 %v2654_v52, %s4847_s29 }
 0xf89   :  { %2678 = vrot.lane.b32.xlu0 %v2655_v59, %s4847_s29 }
 0xfee   :  { %v2665_v30 = vpop.permute.xlu1 %2664 }
 0xfef   :  { %v5941_v55 = vadd.f32 %v2665_v30, %v2608_v43  ;;  %v2669_v56 = vpop.permute.xlu0 %2668 }
 0xff0   :  { %v5946_v0 = vadd.f32 %v2669_v56, %v2610_v57 }
 0xff1   :  { %4694 = vtanh.f32 %v5941_v55 }
 0xff2   :  { %v2667_v2 = vpop.permute.xlu1 %2666  ;;  %4696 = vtanh.f32 %v5946_v0 }
 0xff3   :  { %v5951_v14 = vadd.f32 %v2667_v2, %v2609_v45  ;;  %v2671_v17 = vpop.permute.xlu0 %2670 }
 0xff4   :  { %v5956_v62 = vadd.f32 %v2671_v17, %v2611_v61 }
 0xff5   :  { %4698 = vtanh.f32 %v5951_v14 }
 0xff6   :  { %v2673_v20 = vpop.permute.xlu1 %2672  ;;  %4700 = vtanh.f32 %v5956_v62 }
 0xff7   :  { %v5961_v51 = vadd.f32 %v2673_v20, %v2612_v26  ;;  %v2675_v53 = vpop.permute.xlu0 %2674 }
 0xff8   :  { %v5966_v18 = vadd.f32 %v2675_v53, %v2613_v27 }
 0xff9   :  { %4702 = vtanh.f32 %v5961_v51 }
 0xffa   :  { %v2677_v58 = vpop.permute.xlu1 %2676  ;;  %4704 = vtanh.f32 %v5966_v18 }
 0xffb   :  { %v4695_v5 = vpop.eup %4694  ;;  %v5971_v16 = vadd.f32 %v2677_v58, %v2614_v54  ;;  %v2679_v7 = vpop.permute.xlu0 %2678 }
 0xffc   :  { %2712 = vrot.lane.b32.xlu1 %v4695_v5, %s4847_s29  ;;  %v4697_v29 = vpop.eup %4696  ;;  %v5977_v33 = vadd.f32 %v2679_v7, %v2615_v50 }
 0xffd   :  { %4706 = vtanh.f32 %v5971_v16  ;;  %2716 = vrot.lane.b32.xlu0 %v4697_v29, %s4847_s29 }
 0xffe   :  { %4708 = vtanh.f32 %v5977_v33 }
 0xfff   :  { %v4699_v34 = vpop.eup %4698 }
0x1000   :  { %2714 = vrot.lane.b32.xlu1 %v4699_v34, %s4847_s29  ;;  %v4701_v12 = vpop.eup %4700 }
0x1001   :  { %2718 = vrot.lane.b32.xlu0 %v4701_v12, %s4847_s29 }
0x1003   :  { %v4703_v24 = vpop.eup %4702 }
0x1004   :  { %2720 = vrot.lane.b32.xlu1 %v4703_v24, %s4847_s29  ;;  %v4705_v19 = vpop.eup %4704 }
0x1005   :  { %2722 = vrot.lane.b32.xlu0 %v4705_v19, %s4847_s29  ;;  %v2906_v19 = vld [vmem:[%s6393_s0 + $0x6] sm:$0x1] }
0x1007   :  { %v4707_v41 = vpop.eup %4706 }
0x1008   :  { %2724 = vrot.lane.b32.xlu1 %v4707_v41, %s4847_s29  ;;  %v4709_v25 = vpop.eup %4708 }
0x1009   :  { %2726 = vrot.lane.b32.xlu0 %v4709_v25, %s4847_s29 }
0x106e   :  { %v2713_v36 = vpop.permute.xlu1 %2712 }
0x106f   :  { %v2717_v38 = vpop.permute.xlu0 %2716  ;;  %v2736_v40 = vmul.f32 %v5907_v15, %v2713_v36  ;;  %v2908_v36 = vld [vmem:[%s6393_s0 + $0x16] sm:$0x1] }
0x1070   :  { %v2738_v42 = vmul.f32 %v5910_v39, %v2717_v38 }
0x1072   :  { %v2715_v28 = vpop.permute.xlu1 %2714  ;;  %v2754_v13 = vrot.slane %v2738_v42, 6 }
0x1073   :  { %v2737_v32 = vmul.f32 %v5914_v6, %v2715_v28  ;;  %v2719_v1 = vpop.permute.xlu0 %2718  ;;  %v2907_v28 = vld [vmem:[%s6393_s0 + $0xe] sm:$0x1] }
0x1074   :  { %v2739_v46 = vmul.f32 %v5918_v3, %v2719_v1 }
0x1075   :  { %v2752_v60 = vrot.slane %v2737_v32, 7 }
0x1076   :  { %v2721_v35 = vpop.permute.xlu1 %2720  ;;  %v2756_v4 = vrot.slane %v2739_v46, 5 }
0x1077   :  { %v2753_v49 = vsel %vm465_vm2, %v2752_v60, %v2736_v40  ;;  %v2740_v52 = vmul.f32 %v5922_v31, %v2721_v35  ;;  %v2723_v59 = vpop.permute.xlu0 %2722  ;;  %v2909_v40 = vld [vmem:[%s6393_s0 + $0x1e] sm:$0x1] }
0x1078   :  { %v2755_v37 = vsel %vm468_vm3, %v2754_v13, %v2753_v49  ;;  %v2741_v6 = vmul.f32 %v5926_v48, %v2723_v59  ;;  %v2910_v13 = vld [vmem:[%s6393_s0 + $0x26] sm:$0x1]  ;;  %v2912_v59 = vld [vmem:[%s6393_s0 + $0x36] sm:$0x1] }
0x1079   :  { %v2757_v39 = vsel %vm471_vm4, %v2756_v4, %v2755_v37  ;;  %v2758_v43 = vrot.slane %v2740_v52, 4  ;;  %v2911_v4 = vld [vmem:[%s6393_s0 + $0x2e] sm:$0x1] }
0x107a   :  { %v2725_v30 = vpop.permute.xlu1 %2724  ;;  %v2760_v57 = vrot.slane %v2741_v6, 3  ;;  %v2913_v6 = vld [vmem:[%s6393_s0 + $0x3e] sm:$0x1] }
0x107b   :  { %v2759_v15 = vsel %vm474_vm5, %v2758_v43, %v2757_v39  ;;  %v2742_v3 = vmul.f32 %v5930_v44, %v2725_v30  ;;  %v2727_v56 = vpop.permute.xlu0 %2726 }
0x107c   :  { %v2761_v45 = vsel %vm477_vm6, %v2760_v57, %v2759_v15  ;;  %v2743_v31 = vmul.f32 %v5934_v47, %v2727_v56 }
0x107d   :  { %v2762_v2 = vrot.slane %v2742_v3, 2 }
0x107e   :  { %v2764_v17 = vrot.slane %v2743_v31, 1 }
0x107f   :  { %v2763_v61 = vsel %vm480_vm7, %v2762_v2, %v2761_v45 }
0x1080   :  { %v2765_v26 = vsel %vm483_vm8, %v2764_v17, %v2763_v61 }
0x1081   :  { %2766 = vrot.lane.b32.xlu1 %v2765_v26, %s4848_s12 }
0x10f3   :  { %v2767_v48 = vpop.permute.xlu1 %2766 }
0x10f4   :  { %4178 = vmatmul.mubr.msk.f32.vlgmr.msra.gmra.mrb[10].mxu1 %vm122_vm0, %v2767_v48  ;;  %4189 = vmatmul.mubr.msk.f32.vlgmr.msra.gmra.mrb[12].mxu0 %vm122_vm0, %v2767_v48 }
0x10f5   :  { %4304 = vmatpush3.bf16.msra.mxu1 %v5056_v22  ;;  %4310 = vmatpush3.bf16.msra.mxu0 %v4917_v8 }
0x10f6   :  { %4305 = vmatprep.subr.bf16.mxu1 %v4844_v9  ;;  %4311 = vmatprep.subr.bf16.mxu0 %v4844_v9 }
0x10f7   :  { %4210 = vmatprep.mubr.msk.f32.mxu0 %vm4845_vm1, %v4846_v11  ;;  %4199 = vmatprep.mubr.msk.f32.mxu1 %vm4845_vm1, %v4846_v11 }
0x10f9   :  { %4307 = vmatpush3.bf16.msra.mxu1 %v5062_v23  ;;  %4313 = vmatpush3.bf16.msra.mxu0 %v4922_v10 }
0x10fa   :  { %4314 = vmatprep.subr.bf16.mxu1 %v4844_v9 }
0x11c7   :  { %v2836_v44 = vpop.f32.mrb[10].mxu1  ;;  %v2980_v47 = vpop.f32.mrb[12].mxu0 }
0x11c8   :  { %v2837_v8 = vadd.f32 %v5653_v21, %v2836_v44  ;;  %v4179_v20 = vpop.f32.mrb[11].mxu1  ;;  %v4190_v27 = vpop.f32.mrb[13].mxu0  ;;  %v2986_v41 = vrot.slane %v2980_v47, 2  ;;  %v2985_v38 = vrot.slane %v2980_v47, 1  ;;  %v3000_v42 = vadd.f32 %v2980_v47, %v2906_v19 }
0x11c9   :  { %v2987_v32 = vrot.slane %v2980_v47, 3  ;;  %v2988_v60 = vrot.slane %v2980_v47, 4  ;;  %v2989_v35 = vrot.slane %v2980_v47, 5  ;;  %v2990_v52 = vrot.slane %v2980_v47, 6 }
0x11ca   :  { %v2841_v53 = vcombine.high %v2837_v8, %v2837_v8  ;;  %v2848_v54 = vrot.slane %v2837_v8, %v5105_v63  ;;  %v3002_v1 = vadd.f32 %v2986_v41, %v2908_v36  ;;  %v3001_v46 = vadd.f32 %v2985_v38, %v2907_v28 }
0x11cb   :  { %4710 = vtanh.f32 %v3000_v42  ;;  %v3003_v49 = vadd.f32 %v2987_v32, %v2909_v40  ;;  %v3004_v37 = vadd.f32 %v2988_v60, %v2910_v13  ;;  %v2991_v39 = vrot.slane %v2980_v47, 7 }
0x11cc   :  { %v2855_v58 = vrot.slane %v2841_v53, %v5105_v63  ;;  %v2856_v5 = vcombine.high %v2848_v54, %v2848_v54  ;;  %v2864_v50 = vrot.slane %v2848_v54, %v5105_v63  ;;  %4712 = vtanh.f32 %v3002_v1 }
0x11cd   :  { %4714 = vtanh.f32 %v3001_v46  ;;  %v3005_v43 = vadd.f32 %v2989_v35, %v2911_v4  ;;  %v3006_v30 = vadd.f32 %v2990_v52, %v2912_v59  ;;  %v3007_v57 = vadd.f32 %v2991_v39, %v2913_v6 }
0x11ce   :  { %v2857_v7 = vcombine.high %v2855_v58, %v2855_v58  ;;  %v2871_v29 = vrot.slane %v2855_v58, %v5105_v63  ;;  %v2878_v10 = vrot.slane %v2856_v5, %v5105_v63  ;;  %v2886_v34 = vcombine.high %v2864_v50, %v2864_v50  ;;  %2898 = vst.msk [vmem:[%s6397_s4 + $0x5] sm:$0x1] %vm617_vm9, %v2864_v50 }
0x11cf   :  { %4716 = vtanh.f32 %v3003_v49  ;;  %v3947_v26 = vmul.f32 -1.442695, %v3000_v42  ;;  %v3949_v48 = vmul.f32 -1.442695, %v3002_v1  ;;  %v3948_v44 = vmul.f32 -1.442695, %v3001_v46 }
0x11d0   :  { %v2885_v21 = vrot.slane %v2857_v7, %v5105_v63  ;;  %v2887_v12 = vcombine.high %v2871_v29, %v2871_v29  ;;  %v2888_v24 = vcombine.high %v2878_v10, %v2878_v10  ;;  %2899 = vst.msk [vmem:[%s6397_s4 + $0xd] sm:$0x1] %vm617_vm9, %v2878_v10  ;;  %2900 = vst.msk [vmem:[%s6397_s4 + $0x15] sm:$0x1] %vm617_vm9, %v2886_v34  ;;  %4718 = vtanh.f32 %v3004_v37 }
0x11d1   :  { %2902 = vst.msk [vmem:[%s6397_s4 + $0x25] sm:$0x1] %vm617_vm9, %v2871_v29  ;;  %4720 = vtanh.f32 %v3005_v43  ;;  %v3950_v47 = vmul.f32 -1.442695, %v3003_v49  ;;  %v3951_v8 = vmul.f32 -1.442695, %v3004_v37 }
0x11d2   :  { %v2889_v25 = vcombine.high %v2885_v21, %v2885_v21  ;;  %2901 = vst.msk [vmem:[%s6397_s4 + $0x1d] sm:$0x1] %vm617_vm9, %v2888_v24  ;;  %2903 = vst.msk [vmem:[%s6397_s4 + $0x2d] sm:$0x1] %vm617_vm9, %v2885_v21  ;;  %4722 = vtanh.f32 %v3006_v30  ;;  %v3952_v20 = vmul.f32 -1.442695, %v3005_v43 }
0x11d3   :  { %2904 = vst.msk [vmem:[%s6397_s4 + $0x35] sm:$0x1] %vm617_vm9, %v2887_v12  ;;  %4724 = vtanh.f32 %v3007_v57  ;;  %v3953_v27 = vmul.f32 -1.442695, %v3006_v30  ;;  %v3954_v54 = vmul.f32 -1.442695, %v3007_v57 }
0x11d4   :  { %2905 = vst.msk [vmem:[%s6397_s4 + $0x3d] sm:$0x1] %vm617_vm9, %v2889_v25  ;;  %4726 = vpow2.f32 %v3947_v26 }
0x11d5   :  { %v4711_v15 = vpop.eup %4710  ;;  %4728 = vpow2.f32 %v3949_v48 }
0x11d6   :  { %3080 = vrot.lane.b32.xlu0 %v4711_v15, %s4847_s29  ;;  %v4713_v3 = vpop.eup %4712  ;;  %4730 = vpow2.f32 %v3948_v44 }
0x11d7   :  { %3084 = vrot.lane.b32.xlu1 %v4713_v3, %s4847_s29  ;;  %v4715_v56 = vpop.eup %4714  ;;  %4732 = vpow2.f32 %v3950_v47 }
0x11d8   :  { %4734 = vpow2.f32 %v3951_v8 }
0x11d9   :  { %v4717_v45 = vpop.eup %4716  ;;  %4736 = vpow2.f32 %v3952_v20 }
0x11da   :  { %3082 = vrot.lane.b32.xlu0 %v4715_v56, %s4847_s29  ;;  %v4719_v2 = vpop.eup %4718  ;;  %4738 = vpow2.f32 %v3953_v27 }
0x11db   :  { %3086 = vrot.lane.b32.xlu1 %v4717_v45, %s4847_s29  ;;  %v4721_v31 = vpop.eup %4720  ;;  %4740 = vpow2.f32 %v3954_v54 }
0x11dc   :  { %v4723_v61 = vpop.eup %4722 }
0x11dd   :  { %v4725_v17 = vpop.eup %4724 }
0x11de   :  { %3088 = vrot.lane.b32.xlu0 %v4719_v2, %s4847_s29  ;;  %v4727_v53 = vpop.eup %4726 }
0x11df   :  { %3090 = vrot.lane.b32.xlu1 %v4721_v31, %s4847_s29  ;;  %v4729_v58 = vpop.eup %4728  ;;  %v3032_v5 = vadd.f32 1.0, %v4727_v53 }
0x11e0   :  { %v4731_v50 = vpop.eup %4730  ;;  %v3034_v7 = vadd.f32 1.0, %v4729_v58 }
0x11e1   :  { %v4733_v29 = vpop.eup %4732  ;;  %4742 = vrcp.f32 %v3032_v5  ;;  %v3033_v10 = vadd.f32 1.0, %v4731_v50 }
0x11e2   :  { %3092 = vrot.lane.b32.xlu0 %v4723_v61, %s4847_s29  ;;  %v4735_v34 = vpop.eup %4734  ;;  %4744 = vrcp.f32 %v3034_v7  ;;  %v3035_v21 = vadd.f32 1.0, %v4733_v29 }
0x11e3   :  { %3094 = vrot.lane.b32.xlu1 %v4725_v17, %s4847_s29  ;;  %v4737_v12 = vpop.eup %4736  ;;  %4746 = vrcp.f32 %v3033_v10  ;;  %v3036_v24 = vadd.f32 1.0, %v4735_v34 }
0x11e4   :  { %v4739_v19 = vpop.eup %4738  ;;  %4748 = vrcp.f32 %v3035_v21  ;;  %v3037_v41 = vadd.f32 1.0, %v4737_v12 }
0x11e5   :  { %v4741_v25 = vpop.eup %4740  ;;  %4750 = vrcp.f32 %v3036_v24  ;;  %v3038_v36 = vadd.f32 1.0, %v4739_v19 }
0x11e6   :  { %4752 = vrcp.f32 %v3037_v41  ;;  %v3039_v28 = vadd.f32 1.0, %v4741_v25 }
0x11e7   :  { %4754 = vrcp.f32 %v3038_v36 }
0x11e8   :  { %4756 = vrcp.f32 %v3039_v28 }
0x11eb   :  { %v6087_v38 = vpop.eup %4742 }
0x11ec   :  { %v6090_v1 = vpop.eup %4744  ;;  %v3064_v31 = vmul.f32 %v6087_v38, %v5941_v55 }
0x11ed   :  { %v6094_v46 = vpop.eup %4746  ;;  %v3066_v26 = vmul.f32 %v6090_v1, %v5946_v0 }
0x11ee   :  { %v6098_v49 = vpop.eup %4748  ;;  %v3065_v47 = vmul.f32 %v6094_v46, %v5951_v14 }
0x11ef   :  { %v6102_v37 = vpop.eup %4750  ;;  %v3067_v55 = vmul.f32 %v6098_v49, %v5956_v62 }
0x11f0   :  { %v6106_v43 = vpop.eup %4752  ;;  %v3068_v53 = vmul.f32 %v6102_v37, %v5961_v51 }
0x11f1   :  { %v6110_v15 = vpop.eup %4754  ;;  %v3069_v58 = vmul.f32 %v6106_v43, %v5966_v18 }
0x11f2   :  { %v6114_v56 = vpop.eup %4756  ;;  %v3070_v50 = vmul.f32 %v6110_v15, %v5971_v16 }
0x11f3   :  { %v3071_v10 = vmul.f32 %v6114_v56, %v5977_v33 }
0x1248   :  { %v3081_v42 = vpop.permute.xlu0 %3080 }
0x1249   :  { %v3104_v32 = vmul.f32 %v6087_v38, %v3081_v42  ;;  %v3085_v40 = vpop.permute.xlu1 %3084 }
0x124a   :  { %v3106_v60 = vmul.f32 %v6090_v1, %v3085_v40 }
0x124b   :  { %3120 = vrot.lane.b32.xlu0 %v3104_v32, %s4847_s29 }
0x124c   :  { %v3083_v13 = vpop.permute.xlu0 %3082  ;;  %3124 = vrot.lane.b32.xlu1 %v3106_v60, %s4847_s29 }
0x124d   :  { %v3105_v35 = vmul.f32 %v6094_v46, %v3083_v13  ;;  %v3087_v4 = vpop.permute.xlu1 %3086 }
0x124e   :  { %v3107_v52 = vmul.f32 %v6098_v49, %v3087_v4 }
0x124f   :  { %3122 = vrot.lane.b32.xlu0 %v3105_v35, %s4847_s29 }
0x1250   :  { %v3089_v59 = vpop.permute.xlu0 %3088  ;;  %3126 = vrot.lane.b32.xlu1 %v3107_v52, %s4847_s29 }
0x1251   :  { %v3108_v39 = vmul.f32 %v6102_v37, %v3089_v59  ;;  %v3091_v6 = vpop.permute.xlu1 %3090 }
0x1252   :  { %v3109_v30 = vmul.f32 %v6106_v43, %v3091_v6 }
0x1253   :  { %3128 = vrot.lane.b32.xlu0 %v3108_v39, %s4847_s29 }
0x1254   :  { %v3093_v57 = vpop.permute.xlu0 %3092  ;;  %3130 = vrot.lane.b32.xlu1 %v3109_v30, %s4847_s29 }
0x1255   :  { %v3110_v3 = vmul.f32 %v6110_v15, %v3093_v57  ;;  %v3095_v45 = vpop.permute.xlu1 %3094 }
0x1256   :  { %v3111_v2 = vmul.f32 %v6114_v56, %v3095_v45 }
0x1257   :  { %3132 = vrot.lane.b32.xlu0 %v3110_v3, %s4847_s29 }
0x1258   :  { %3134 = vrot.lane.b32.xlu1 %v3111_v2, %s4847_s29 }
0x12bd   :  { %v3121_v61 = vpop.permute.xlu0 %3120 }
0x12be   :  { %v6121_v17 = vadd.f32 %v3121_v61, %v3064_v31  ;;  %v3125_v48 = vpop.permute.xlu1 %3124 }
0x12bf   :  { %v6126_v44 = vadd.f32 %v3125_v48, %v3066_v26 }
0x12c0   :  { %4758 = vtanh.f32 %v6121_v17 }
0x12c1   :  { %v3123_v8 = vpop.permute.xlu0 %3122  ;;  %4760 = vtanh.f32 %v6126_v44 }
0x12c2   :  { %v6131_v20 = vadd.f32 %v3123_v8, %v3065_v47  ;;  %v3127_v27 = vpop.permute.xlu1 %3126 }
0x12c3   :  { %v6136_v0 = vadd.f32 %v3127_v27, %v3067_v55  ;;  %v6193_v55 = vld [vmem:[%s6396_s3] ss:$0 sm:$0xff] }
0x12c4   :  { %4762 = vtanh.f32 %v6131_v20 }
0x12c5   :  { %v3129_v54 = vpop.permute.xlu0 %3128  ;;  %4764 = vtanh.f32 %v6136_v0 }
0x12c6   :  { %v6141_v14 = vadd.f32 %v3129_v54, %v3068_v53  ;;  %v3131_v5 = vpop.permute.xlu1 %3130 }
0x12c7   :  { %v6146_v62 = vadd.f32 %v3131_v5, %v3069_v58 }
0x12c8   :  { %4766 = vtanh.f32 %v6141_v14 }
0x12c9   :  { %v3133_v7 = vpop.permute.xlu0 %3132  ;;  %4768 = vtanh.f32 %v6146_v62 }
0x12ca   :  { %v4759_v29 = vpop.eup %4758  ;;  %v6151_v51 = vadd.f32 %v3133_v7, %v3070_v50  ;;  %v3135_v34 = vpop.permute.xlu1 %3134 }
0x12cb   :  { %3168 = vrot.lane.b32.xlu0 %v4759_v29, %s4847_s29  ;;  %v4761_v18 = vpop.eup %4760  ;;  %v6157_v21 = vadd.f32 %v3135_v34, %v3071_v10 }
0x12cc   :  { %4770 = vtanh.f32 %v6151_v51  ;;  %3172 = vrot.lane.b32.xlu1 %v4761_v18, %s4847_s29 }
0x12cd   :  { %4772 = vtanh.f32 %v6157_v21 }
0x12ce   :  { %v4763_v16 = vpop.eup %4762 }
0x12cf   :  { %3170 = vrot.lane.b32.xlu0 %v4763_v16, %s4847_s29  ;;  %v4765_v12 = vpop.eup %4764  ;;  %v3362_v16 = vld [vmem:[%s6393_s0 + $0x7] sm:$0x1] }
0x12d0   :  { %3174 = vrot.lane.b32.xlu1 %v4765_v12, %s4847_s29 }
0x12d2   :  { %v4767_v24 = vpop.eup %4766 }
0x12d3   :  { %3176 = vrot.lane.b32.xlu0 %v4767_v24, %s4847_s29  ;;  %v4769_v33 = vpop.eup %4768 }
0x12d4   :  { %3178 = vrot.lane.b32.xlu1 %v4769_v33, %s4847_s29  ;;  %v3364_v33 = vld [vmem:[%s6393_s0 + $0x17] sm:$0x1] }
0x12d6   :  { %v4771_v19 = vpop.eup %4770 }
0x12d7   :  { %3180 = vrot.lane.b32.xlu0 %v4771_v19, %s4847_s29  ;;  %v4773_v41 = vpop.eup %4772 }
0x12d8   :  { %3182 = vrot.lane.b32.xlu1 %v4773_v41, %s4847_s29 }
0x133d   :  { %v3169_v25 = vpop.permute.xlu0 %3168 }
0x133e   :  { %v3173_v36 = vpop.permute.xlu1 %3172  ;;  %v3192_v60 = vmul.f32 %v6087_v38, %v3169_v25  ;;  %v3363_v25 = vld [vmem:[%s6393_s0 + $0xf] sm:$0x1] }
0x133f   :  { %v3194_v42 = vmul.f32 %v6090_v1, %v3173_v36 }
0x1341   :  { %v3171_v28 = vpop.permute.xlu0 %3170  ;;  %v3210_v4 = vrot.slane %v3194_v42, 6 }
0x1342   :  { %v3193_v32 = vmul.f32 %v6094_v46, %v3171_v28  ;;  %v3175_v40 = vpop.permute.xlu1 %3174  ;;  %v3365_v28 = vld [vmem:[%s6393_s0 + $0x1f] sm:$0x1] }
0x1343   :  { %v3195_v35 = vmul.f32 %v6098_v49, %v3175_v40 }
0x1344   :  { %v3208_v13 = vrot.slane %v3193_v32, 7 }
0x1345   :  { %v3177_v52 = vpop.permute.xlu0 %3176  ;;  %v3212_v39 = vrot.slane %v3195_v35, 5 }
0x1346   :  { %v3209_v59 = vsel %vm465_vm2, %v3208_v13, %v3192_v60  ;;  %v3196_v6 = vmul.f32 %v6102_v37, %v3177_v52  ;;  %v3179_v57 = vpop.permute.xlu1 %3178  ;;  %v3366_v60 = vld [vmem:[%s6393_s0 + $0x27] sm:$0x1] }
0x1347   :  { %v3211_v30 = vsel %vm468_vm3, %v3210_v4, %v3209_v59  ;;  %v3197_v46 = vmul.f32 %v6106_v43, %v3179_v57  ;;  %v3367_v4 = vld [vmem:[%s6393_s0 + $0x2f] sm:$0x1]  ;;  %v3369_v57 = vld [vmem:[%s6393_s0 + $0x3f] sm:$0x1] }
0x1348   :  { %v3213_v1 = vsel %vm471_vm4, %v3212_v39, %v3211_v30  ;;  %v3214_v3 = vrot.slane %v3196_v6, 4  ;;  %v3368_v39 = vld [vmem:[%s6393_s0 + $0x37] sm:$0x1] }
0x1349   :  { %v3181_v45 = vpop.permute.xlu0 %3180  ;;  %v3216_v2 = vrot.slane %v3197_v46, 3 }
0x134a   :  { %v3215_v38 = vsel %vm474_vm5, %v3214_v3, %v3213_v1  ;;  %v3198_v49 = vmul.f32 %v6110_v15, %v3181_v45  ;;  %v3183_v31 = vpop.permute.xlu1 %3182 }
0x134b   :  { %v3217_v61 = vsel %vm477_vm6, %v3216_v2, %v3215_v38  ;;  %v3199_v37 = vmul.f32 %v6114_v56, %v3183_v31 }
0x134c   :  { %v3218_v26 = vrot.slane %v3198_v49, 2 }
0x134d   :  { %v3220_v47 = vrot.slane %v3199_v37, 1 }
0x134e   :  { %v3219_v48 = vsel %vm480_vm7, %v3218_v26, %v3217_v61 }
0x134f   :  { %v3221_v8 = vsel %vm483_vm8, %v3220_v47, %v3219_v48 }
0x1350   :  { %3222 = vrot.lane.b32.xlu0 %v3221_v8, %s4848_s12 }
0x13c2   :  { %v3223_v43 = vpop.permute.xlu0 %3222 }
0x13c3   :  { %4200 = vmatmul.mubr.msk.f32.vlgmr.msra.gmra.mrb[12].mxu1 %vm122_vm0, %v3223_v43  ;;  %4211 = vmatmul.mubr.msk.f32.vlgmr.msra.gmra.mrb[14].mxu0 %vm122_vm0, %v3223_v43 }
0x13c4   :  { %4316 = vmatpush3.bf16.msra.mxu1 %v5056_v22  ;;  %4221 = vmatprep.mubr.msk.f32.mxu1 %vm4845_vm1, %v4846_v11 }
0x13c5   :  { %4317 = vmatprep.subr.bf16.mxu1 %v4844_v9 }
0x13c8   :  { %4319 = vmatpush3.bf16.msra.mxu1 %v5062_v23 }
0x1496   :  { %v3292_v15 = vpop.f32.mrb[12].mxu1  ;;  %v3436_v56 = vpop.f32.mrb[14].mxu0 }
0x1497   :  { %v3293_v27 = vadd.f32 %v6193_v55, %v3292_v15  ;;  %v4201_v53 = vpop.f32.mrb[13].mxu1  ;;  %v4212_v54 = vpop.f32.mrb[15].mxu0  ;;  %v3442_v12 = vrot.slane %v3436_v56, 2  ;;  %v3441_v19 = vrot.slane %v3436_v56, 1  ;;  %v3456_v41 = vadd.f32 %v3436_v56, %v3362_v16 }
0x1498   :  { %v3443_v36 = vrot.slane %v3436_v56, 3  ;;  %v3444_v32 = vrot.slane %v3436_v56, 4  ;;  %v3445_v13 = vrot.slane %v3436_v56, 5  ;;  %v3446_v52 = vrot.slane %v3436_v56, 6 }
0x1499   :  { %v3297_v58 = vcombine.high %v3293_v27, %v3293_v27  ;;  %v3304_v22 = vrot.slane %v3293_v27, %v5105_v63  ;;  %v3458_v42 = vadd.f32 %v3442_v12, %v3364_v33  ;;  %v3457_v40 = vadd.f32 %v3441_v19, %v3363_v25 }
0x149a   :  { %4774 = vtanh.f32 %v3456_v41  ;;  %v3459_v35 = vadd.f32 %v3443_v36, %v3365_v28  ;;  %v3460_v59 = vadd.f32 %v3444_v32, %v3366_v60  ;;  %v3447_v6 = vrot.slane %v3436_v56, 7 }
0x149b   :  { %v3311_v11 = vrot.slane %v3297_v58, %v5105_v63  ;;  %v3312_v5 = vcombine.high %v3304_v22, %v3304_v22  ;;  %v3320_v9 = vrot.slane %v3304_v22, %v5105_v63  ;;  %4776 = vtanh.f32 %v3458_v42 }
0x149c   :  { %4778 = vtanh.f32 %v3457_v40  ;;  %v3461_v30 = vadd.f32 %v3445_v13, %v3367_v4  ;;  %v3462_v1 = vadd.f32 %v3446_v52, %v3368_v39  ;;  %v3463_v46 = vadd.f32 %v3447_v6, %v3369_v57 }
0x149d   :  { %v3313_v23 = vcombine.high %v3311_v11, %v3311_v11  ;;  %v3327_v50 = vrot.slane %v3311_v11, %v5105_v63  ;;  %v3334_v7 = vrot.slane %v3312_v5, %v5105_v63  ;;  %v3342_v29 = vcombine.high %v3320_v9, %v3320_v9  ;;  %3354 = vst.msk [vmem:[%s6397_s4 + $0x6] sm:$0x1] %vm617_vm9, %v3320_v9 }
0x149e   :  { %4780 = vtanh.f32 %v3459_v35  ;;  %v3957_v37 = vmul.f32 -1.442695, %v3456_v41  ;;  %v3959_v48 = vmul.f32 -1.442695, %v3458_v42  ;;  %v3958_v47 = vmul.f32 -1.442695, %v3457_v40 }
0x149f   :  { %v3341_v10 = vrot.slane %v3313_v23, %v5105_v63  ;;  %v3343_v34 = vcombine.high %v3327_v50, %v3327_v50  ;;  %v3344_v18 = vcombine.high %v3334_v7, %v3334_v7  ;;  %3355 = vst.msk [vmem:[%s6397_s4 + $0xe] sm:$0x1] %vm617_vm9, %v3334_v7  ;;  %3356 = vst.msk [vmem:[%s6397_s4 + $0x16] sm:$0x1] %vm617_vm9, %v3342_v29  ;;  %4782 = vtanh.f32 %v3460_v59 }
0x14a0   :  { %3358 = vst.msk [vmem:[%s6397_s4 + $0x26] sm:$0x1] %vm617_vm9, %v3327_v50  ;;  %4784 = vtanh.f32 %v3461_v30  ;;  %v3960_v8 = vmul.f32 -1.442695, %v3459_v35  ;;  %v3961_v43 = vmul.f32 -1.442695, %v3460_v59 }
0x14a1   :  { %v3345_v24 = vcombine.high %v3341_v10, %v3341_v10  ;;  %3357 = vst.msk [vmem:[%s6397_s4 + $0x1e] sm:$0x1] %vm617_vm9, %v3344_v18  ;;  %3359 = vst.msk [vmem:[%s6397_s4 + $0x2e] sm:$0x1] %vm617_vm9, %v3341_v10  ;;  %4786 = vtanh.f32 %v3462_v1  ;;  %v3962_v15 = vmul.f32 -1.442695, %v3461_v30 }
0x14a2   :  { %3360 = vst.msk [vmem:[%s6397_s4 + $0x36] sm:$0x1] %vm617_vm9, %v3343_v34  ;;  %4788 = vtanh.f32 %v3463_v46  ;;  %v3963_v56 = vmul.f32 -1.442695, %v3462_v1  ;;  %v3964_v53 = vmul.f32 -1.442695, %v3463_v46 }
0x14a3   :  { %3361 = vst.msk [vmem:[%s6397_s4 + $0x3e] sm:$0x1] %vm617_vm9, %v3345_v24  ;;  %4790 = vpow2.f32 %v3957_v37 }
0x14a4   :  { %v4775_v3 = vpop.eup %4774  ;;  %4792 = vpow2.f32 %v3959_v48 }
0x14a5   :  { %3536 = vrot.lane.b32.xlu1 %v4775_v3, %s4847_s29  ;;  %v4777_v45 = vpop.eup %4776  ;;  %4794 = vpow2.f32 %v3958_v47 }
0x14a6   :  { %3540 = vrot.lane.b32.xlu0 %v4777_v45, %s4847_s29  ;;  %v4779_v38 = vpop.eup %4778  ;;  %4796 = vpow2.f32 %v3960_v8 }
0x14a7   :  { %4798 = vpow2.f32 %v3961_v43 }
0x14a8   :  { %v4781_v2 = vpop.eup %4780  ;;  %4800 = vpow2.f32 %v3962_v15 }
0x14a9   :  { %3538 = vrot.lane.b32.xlu1 %v4779_v38, %s4847_s29  ;;  %v4783_v49 = vpop.eup %4782  ;;  %4802 = vpow2.f32 %v3963_v56 }
0x14aa   :  { %3542 = vrot.lane.b32.xlu0 %v4781_v2, %s4847_s29  ;;  %v4785_v31 = vpop.eup %4784  ;;  %4804 = vpow2.f32 %v3964_v53 }
0x14ab   :  { %v4787_v61 = vpop.eup %4786 }
0x14ac   :  { %v4789_v26 = vpop.eup %4788 }
0x14ad   :  { %3544 = vrot.lane.b32.xlu1 %v4783_v49, %s4847_s29  ;;  %v4791_v27 = vpop.eup %4790 }
0x14ae   :  { %3546 = vrot.lane.b32.xlu0 %v4785_v31, %s4847_s29  ;;  %v4793_v54 = vpop.eup %4792  ;;  %v3488_v58 = vadd.f32 1.0, %v4791_v27 }
0x14af   :  { %v4795_v22 = vpop.eup %4794  ;;  %v3490_v11 = vadd.f32 1.0, %v4793_v54 }
0x14b0   :  { %v4797_v5 = vpop.eup %4796  ;;  %4806 = vrcp.f32 %v3488_v58  ;;  %v3489_v9 = vadd.f32 1.0, %v4795_v22 }
0x14b1   :  { %3548 = vrot.lane.b32.xlu1 %v4787_v61, %s4847_s29  ;;  %v4799_v23 = vpop.eup %4798  ;;  %4808 = vrcp.f32 %v3490_v11  ;;  %v3491_v50 = vadd.f32 1.0, %v4797_v5 }
0x14b2   :  { %3550 = vrot.lane.b32.xlu0 %v4789_v26, %s4847_s29  ;;  %v4801_v7 = vpop.eup %4800  ;;  %4810 = vrcp.f32 %v3489_v9  ;;  %v3492_v29 = vadd.f32 1.0, %v4799_v23 }
0x14b3   :  { %v4803_v10 = vpop.eup %4802  ;;  %4812 = vrcp.f32 %v3491_v50  ;;  %v3493_v34 = vadd.f32 1.0, %v4801_v7 }
0x14b4   :  { %v4805_v18 = vpop.eup %4804  ;;  %4814 = vrcp.f32 %v3492_v29  ;;  %v3494_v16 = vadd.f32 1.0, %v4803_v10 }
0x14b5   :  { %4816 = vrcp.f32 %v3493_v34  ;;  %v3495_v33 = vadd.f32 1.0, %v4805_v18 }
0x14b6   :  { %4818 = vrcp.f32 %v3494_v16 }
0x14b7   :  { %4820 = vrcp.f32 %v3495_v33 }
0x14ba   :  { %v6266_v12 = vpop.eup %4806 }
0x14bb   :  { %v6269_v41 = vpop.eup %4808  ;;  %v3520_v38 = vmul.f32 %v6266_v12, %v6121_v17 }
0x14bc   :  { %v6273_v42 = vpop.eup %4810  ;;  %v3522_v31 = vmul.f32 %v6269_v41, %v6126_v44 }
0x14bd   :  { %v6277_v40 = vpop.eup %4812  ;;  %v3521_v37 = vmul.f32 %v6273_v42, %v6131_v20 }
0x14be   :  { %v6281_v35 = vpop.eup %4814  ;;  %v3523_v8 = vmul.f32 %v6277_v40, %v6136_v0 }
0x14bf   :  { %v6285_v59 = vpop.eup %4816  ;;  %v3524_v56 = vmul.f32 %v6281_v35, %v6141_v14 }
0x14c0   :  { %v6289_v30 = vpop.eup %4818  ;;  %v3525_v53 = vmul.f32 %v6285_v59, %v6146_v62 }
0x14c1   :  { %v6293_v3 = vpop.eup %4820  ;;  %v3526_v11 = vmul.f32 %v6289_v30, %v6151_v51 }
0x14c2   :  { %v3527_v62 = vmul.f32 %v6293_v3, %v6157_v21 }
0x1517   :  { %v3537_v24 = vpop.permute.xlu1 %3536 }
0x1518   :  { %v3560_v19 = vmul.f32 %v6266_v12, %v3537_v24  ;;  %v3541_v25 = vpop.permute.xlu0 %3540 }
0x1519   :  { %v3562_v36 = vmul.f32 %v6269_v41, %v3541_v25 }
0x151a   :  { %3576 = vrot.lane.b32.xlu1 %v3560_v19, %s4847_s29 }
0x151b   :  { %v3539_v28 = vpop.permute.xlu1 %3538  ;;  %3580 = vrot.lane.b32.xlu0 %v3562_v36, %s4847_s29 }
0x151c   :  { %v3561_v32 = vmul.f32 %v6273_v42, %v3539_v28  ;;  %v3543_v60 = vpop.permute.xlu0 %3542 }
0x151d   :  { %v3563_v13 = vmul.f32 %v6277_v40, %v3543_v60 }
0x151e   :  { %3578 = vrot.lane.b32.xlu1 %v3561_v32, %s4847_s29 }
0x151f   :  { %v3545_v4 = vpop.permute.xlu1 %3544  ;;  %3582 = vrot.lane.b32.xlu0 %v3563_v13, %s4847_s29 }
0x1520   :  { %v3564_v52 = vmul.f32 %v6281_v35, %v3545_v4  ;;  %v3547_v39 = vpop.permute.xlu0 %3546 }
0x1521   :  { %v3565_v6 = vmul.f32 %v6285_v59, %v3547_v39 }
0x1522   :  { %3584 = vrot.lane.b32.xlu1 %v3564_v52, %s4847_s29 }
0x1523   :  { %v3549_v57 = vpop.permute.xlu1 %3548  ;;  %3586 = vrot.lane.b32.xlu0 %v3565_v6, %s4847_s29 }
0x1524   :  { %v3566_v1 = vmul.f32 %v6289_v30, %v3549_v57  ;;  %v3551_v46 = vpop.permute.xlu0 %3550 }
0x1525   :  { %v3567_v45 = vmul.f32 %v6293_v3, %v3551_v46 }
0x1526   :  { %3588 = vrot.lane.b32.xlu1 %v3566_v1, %s4847_s29 }
0x1527   :  { %3590 = vrot.lane.b32.xlu0 %v3567_v45, %s4847_s29 }
0x158c   :  { %v3577_v2 = vpop.permute.xlu1 %3576 }
0x158d   :  { %v3600_v49 = vadd.f32 %v3577_v2, %v3520_v38  ;;  %v3581_v61 = vpop.permute.xlu0 %3580 }
0x158e   :  { %v3602_v26 = vadd.f32 %v3581_v61, %v3522_v31 }
0x158f   :  { %4822 = vtanh.f32 %v3600_v49 }
0x1590   :  { %v3579_v48 = vpop.permute.xlu1 %3578  ;;  %4824 = vtanh.f32 %v3602_v26  ;;  %v3828_v44 = vrot.slane %v3602_v26, 6 }
0x1591   :  { %v3601_v47 = vadd.f32 %v3579_v48, %v3521_v37  ;;  %v3583_v43 = vpop.permute.xlu0 %3582 }
0x1592   :  { %v3603_v15 = vadd.f32 %v3583_v43, %v3523_v8 }
0x1593   :  { %4826 = vtanh.f32 %v3601_v47  ;;  %v3826_v17 = vrot.slane %v3601_v47, 7 }
0x1594   :  { %v3585_v27 = vpop.permute.xlu1 %3584  ;;  %4828 = vtanh.f32 %v3603_v15  ;;  %v3830_v54 = vrot.slane %v3603_v15, 5 }
0x1595   :  { %v3827_v20 = vsel %vm465_vm2, %v3826_v17, %v3600_v49  ;;  %v3604_v58 = vadd.f32 %v3585_v27, %v3524_v56  ;;  %v3587_v0 = vpop.permute.xlu0 %3586 }
0x1596   :  { %v3829_v22 = vsel %vm468_vm3, %v3828_v44, %v3827_v20  ;;  %v3605_v9 = vadd.f32 %v3587_v0, %v3525_v53 }
0x1597   :  { %v3831_v5 = vsel %vm471_vm4, %v3830_v54, %v3829_v22  ;;  %4830 = vtanh.f32 %v3604_v58  ;;  %v3832_v14 = vrot.slane %v3604_v58, 4 }
0x1598   :  { %v3589_v23 = vpop.permute.xlu1 %3588  ;;  %4832 = vtanh.f32 %v3605_v9  ;;  %v3834_v29 = vrot.slane %v3605_v9, 3 }
0x1599   :  { %v4823_v50 = vpop.eup %4822  ;;  %v3833_v7 = vsel %vm474_vm5, %v3832_v14, %v3831_v5  ;;  %v3606_v10 = vadd.f32 %v3589_v23, %v3526_v11  ;;  %v3591_v34 = vpop.permute.xlu0 %3590 }
0x159a   :  { %3624 = vrot.lane.b32.xlu1 %v4823_v50, %s4847_s29  ;;  %v4825_v18 = vpop.eup %4824  ;;  %v3835_v51 = vsel %vm477_vm6, %v3834_v29, %v3833_v7  ;;  %v3607_v24 = vadd.f32 %v3591_v34, %v3527_v62 }
0x159b   :  { %4834 = vtanh.f32 %v3606_v10  ;;  %v3836_v16 = vrot.slane %v3606_v10, 2  ;;  %3628 = vrot.lane.b32.xlu0 %v4825_v18, %s4847_s29 }
0x159c   :  { %4836 = vtanh.f32 %v3607_v24  ;;  %v3838_v19 = vrot.slane %v3607_v24, 1 }
0x159d   :  { %v4827_v33 = vpop.eup %4826  ;;  %v3837_v21 = vsel %vm480_vm7, %v3836_v16, %v3835_v51 }
0x159e   :  { %3626 = vrot.lane.b32.xlu1 %v4827_v33, %s4847_s29  ;;  %v4829_v25 = vpop.eup %4828  ;;  %v3839_v36 = vsel %vm483_vm8, %v3838_v19, %v3837_v21 }
0x159f   :  { %3841 = vst.msk [vmem:[%s6398_s5] sm:$0xff] %vm122_vm0, %v3839_v36  ;;  %3630 = vrot.lane.b32.xlu0 %v4829_v25, %s4847_s29 }
0x15a1   :  { %v4831_v28 = vpop.eup %4830 }
0x15a2   :  { %3632 = vrot.lane.b32.xlu1 %v4831_v28, %s4847_s29  ;;  %v4833_v32 = vpop.eup %4832 }
0x15a3   :  { %3634 = vrot.lane.b32.xlu0 %v4833_v32, %s4847_s29 }
0x15a5   :  { %v4835_v60 = vpop.eup %4834 }
0x15a6   :  { %3636 = vrot.lane.b32.xlu1 %v4835_v60, %s4847_s29  ;;  %v4837_v13 = vpop.eup %4836 }
0x15a7   :  { %3638 = vrot.lane.b32.xlu0 %v4837_v13, %s4847_s29 }
0x160c   :  { %v3625_v4 = vpop.permute.xlu1 %3624 }
0x160d   :  { %v3629_v52 = vpop.permute.xlu0 %3628  ;;  %v3648_v46 = vmul.f32 %v6266_v12, %v3625_v4 }
0x160e   :  { %v3650_v39 = vmul.f32 %v6269_v41, %v3629_v52 }
0x1610   :  { %v3627_v6 = vpop.permute.xlu1 %3626  ;;  %v3666_v2 = vrot.slane %v3650_v39, 6 }
0x1611   :  { %v3649_v57 = vmul.f32 %v6273_v42, %v3627_v6  ;;  %v3631_v1 = vpop.permute.xlu0 %3630 }
0x1612   :  { %v3651_v38 = vmul.f32 %v6277_v40, %v3631_v1 }
0x1613   :  { %v3664_v45 = vrot.slane %v3649_v57, 7 }
0x1614   :  { %v3633_v49 = vpop.permute.xlu1 %3632  ;;  %v3668_v61 = vrot.slane %v3651_v38, 5 }
0x1615   :  { %v3665_v31 = vsel %vm465_vm2, %v3664_v45, %v3648_v46  ;;  %v3652_v26 = vmul.f32 %v6281_v35, %v3633_v49  ;;  %v3635_v48 = vpop.permute.xlu0 %3634 }
0x1616   :  { %v3667_v37 = vsel %vm468_vm3, %v3666_v2, %v3665_v31  ;;  %v3653_v42 = vmul.f32 %v6285_v59, %v3635_v48 }
0x1617   :  { %v3669_v41 = vsel %vm471_vm4, %v3668_v61, %v3667_v37  ;;  %v3670_v47 = vrot.slane %v3652_v26, 4 }
0x1618   :  { %v3637_v8 = vpop.permute.xlu1 %3636  ;;  %v3672_v43 = vrot.slane %v3653_v42, 3 }
0x1619   :  { %v3671_v12 = vsel %vm474_vm5, %v3670_v47, %v3669_v41  ;;  %v3654_v40 = vmul.f32 %v6289_v30, %v3637_v8  ;;  %v3639_v17 = vpop.permute.xlu0 %3638 }
0x161a   :  { %v3673_v15 = vsel %vm477_vm6, %v3672_v43, %v3671_v12  ;;  %v3655_v35 = vmul.f32 %v6293_v3, %v3639_v17 }
0x161b   :  { %v3674_v56 = vrot.slane %v3654_v40, 2 }
0x161c   :  { %v3676_v27 = vrot.slane %v3655_v35, 1 }
0x161d   :  { %v3675_v44 = vsel %vm480_vm7, %v3674_v56, %v3673_v15 }
0x161e   :  { %v3677_v53 = vsel %vm483_vm8, %v3676_v27, %v3675_v44 }
0x161f   :  { %3678 = vrot.lane.b32.xlu1 %v3677_v53, %s4848_s12 }
0x1691   :  { %v3679_v59 = vpop.permute.xlu1 %3678 }
0x1692   :  { %3843 = vst.msk [vmem:[%s6399_s6] sm:$0xff] %vm122_vm0, %v3679_v59  ;;  %4222 = vmatmul.mubr.msk.f32.vlgmr.msra.gmra.mrb[14].mxu1 %vm122_vm0, %v3679_v59 }
0x1765   :  { %v3748_v30 = vpop.f32.mrb[14].mxu1 }
0x1766   :  { %v3749_v20 = vadd.f32 %v6193_v55, %v3748_v30  ;;  %v4223_v54 = vpop.f32.mrb[15].mxu1 }
0x1768   :  { %v3753_v3 = vcombine.high %v3749_v20, %v3749_v20  ;;  %v3760_v58 = vrot.slane %v3749_v20, %v5105_v63 }
0x176a   :  { %v3767_v22 = vrot.slane %v3753_v3, %v5105_v63  ;;  %v3768_v0 = vcombine.high %v3760_v58, %v3760_v58  ;;  %v3776_v11 = vrot.slane %v3760_v58, %v5105_v63 }
0x176c   :  { %v3769_v5 = vcombine.high %v3767_v22, %v3767_v22  ;;  %v3783_v14 = vrot.slane %v3767_v22, %v5105_v63  ;;  %v3790_v9 = vrot.slane %v3768_v0, %v5105_v63  ;;  %v3798_v23 = vcombine.high %v3776_v11, %v3776_v11  ;;  %3810 = vst.msk [vmem:[%s6397_s4 + $0x7] sm:$0x1] %vm617_vm9, %v3776_v11 }
0x176e   :  { %v3797_v55 = vrot.slane %v3769_v5, %v5105_v63  ;;  %v3799_v62 = vcombine.high %v3783_v14, %v3783_v14  ;;  %v3800_v50 = vcombine.high %v3790_v9, %v3790_v9  ;;  %3811 = vst.msk [vmem:[%s6397_s4 + $0xf] sm:$0x1] %vm617_vm9, %v3790_v9  ;;  %3812 = vst.msk [vmem:[%s6397_s4 + $0x17] sm:$0x1] %vm617_vm9, %v3798_v23 }
0x176f   :  { %3814 = vst.msk [vmem:[%s6397_s4 + $0x27] sm:$0x1] %vm617_vm9, %v3783_v14 }
0x1770   :  { %v3801_v7 = vcombine.high %v3797_v55, %v3797_v55  ;;  %3813 = vst.msk [vmem:[%s6397_s4 + $0x1f] sm:$0x1] %vm617_vm9, %v3800_v50  ;;  %3815 = vst.msk [vmem:[%s6397_s4 + $0x2f] sm:$0x1] %vm617_vm9, %v3797_v55 }
0x1771   :  { %3816 = vst.msk [vmem:[%s6397_s4 + $0x37] sm:$0x1] %vm617_vm9, %v3799_v62 }
0x1772   :  { %3817 = vst.msk [vmem:[%s6397_s4 + $0x3f] sm:$0x1] %vm617_vm9, %v3801_v7 }
0x1773   :  { %3856 = vsyncmov [#allocation4] }
0x1776   :  { %s3857_s14 = vpop.sfrf %3856 }
0x1777   :  { %p3966_p0 = scmp.ne.s32.totalorder %s3857_s14, 0 }
0x1779   :  { %3861 = shalt.err (%p3966_p0)  }
0x177a   :  { %3863 = vsyncmov [#allocation4 + $0x1] }
0x177d   :  { %s3864_s15 = vpop.sfrf %3863 }
0x177e   :  { %p3967_p1 = scmp.ne.s32.totalorder %s3864_s15, 0 }
0x1780   :  { %3868 = shalt.err (%p3967_p1)  }

</bundles_post_ra>
